<compile_context>
chip_gen: v5e
topology: v5e:2x2
jax: 0.10.0
libtpu: 0.0.40
codegen_flags: <defaults>
</compile_context>

<pallas_src>
import jax
import jax.numpy as jnp
from jax import lax
from jax.experimental import pallas as pl
from jax.experimental.pallas import tpu as pltpu
import numpy as np

# Mamba(d_model=64, d_state=16, d_conv=4, expand=4)
D_MODEL = 64
D_STATE = 16
D_CONV = 4
EXPAND = 4
D_INNER = EXPAND * D_MODEL            # 256
DT_RANK = (D_MODEL + 15) // 16        # 4

# fused/padded x_proj layout: [delta 0:256 | B 256:272 (pad to 384) | C 384:400 (pad to 512)]
COL_B = D_INNER
COL_C = D_INNER + 128
W_SBC_COLS = D_INNER + 256            # 512

PKEYS = ("w_in", "conv_w", "conv_b", "w_sbc", "dt_b", "A_t", "D", "w_out")


def _silu(v):
    return v * jax.nn.sigmoid(v)


def _softplus(v):
    return jnp.maximum(v, 0.0) + jnp.log1p(jnp.exp(-jnp.abs(v)))


def mamba_dir_kernel(x_ref, w_in_ref, conv_w_ref, conv_b_ref, w_sbc_ref,
                     dt_b_ref, A_ref, D_ref, w_out_ref, o_ref):
    """One direction (selected by grid axis 0 via index_map), TB batch rows."""
    TB, L, _ = x_ref.shape
    R = TB * L

    x3 = x_ref[...]                                   # (TB, L, 64) f32
    x2 = x3.reshape(R, D_MODEL)                       # residual path (f32)
    x2_bf = x2.astype(jnp.bfloat16)

    # ----- fused in_proj: one (R,64)@(64,512) bf16 matmul, then split --------
    xz = jnp.dot(x2_bf, w_in_ref[...], preferred_element_type=jnp.float32)
    xc = xz[:, :D_INNER]                              # (R, 256) conv branch
    z = xz[:, D_INNER:]                               # (R, 256) gate branch

    # ----- depthwise causal conv: pltpu.roll + iota mask per tap -------------
    #   u[l] = sum_s w[D_CONV-1-s] * x[l-s]   (x[l-s] = 0 for l-s < 0)
    xc3 = xc.reshape(TB, L, D_INNER)
    cw = conv_w_ref[...]                              # (4, 256)
    pos = lax.broadcasted_iota(jnp.int32, (L, D_INNER), 0)       # (L, 256)
    acc = xc3 * cw[D_CONV - 1:D_CONV, :]              # tap s = 0
    for s in range(1, D_CONV):
        if s >= L:
            break
        rolled = pltpu.roll(xc3, s, axis=1)           # [:, l] = xc3[:, (l-s) % L]
        keep = (pos >= s)[None, :, :]                 # zero the wrapped rows
        tap = jnp.where(keep, rolled, 0.0)
        acc = acc + tap * cw[D_CONV - 1 - s:D_CONV - s, :]
    u3 = _silu(acc + conv_b_ref[...])                 # (TB, L, 256)
    u2 = u3.reshape(R, D_INNER)

    # ----- fused x_proj (+ dt_proj folded), 128-aligned columns --------------
    sbc = jnp.dot(u2.astype(jnp.bfloat16), w_sbc_ref[...],
                  preferred_element_type=jnp.float32)             # (R, 512)
    delta = _softplus(sbc[:, :D_INNER] + dt_b_ref[...])           # (R, 256)
    Bm3 = sbc[:, COL_B:COL_B + D_STATE].reshape(TB, L, D_STATE)   # (TB, L, 16)
    Cm3 = sbc[:, COL_C:COL_C + D_STATE].reshape(TB, L, D_STATE)   # (TB, L, 16)
    delta3 = delta.reshape(TB, L, D_INNER)

    # ----- hoist exp / B-broadcast off the serial scan chain -----------------
    A = A_ref[...]                                                # (16, 256)
    dA = jnp.exp(delta3[:, :, None, :] * A[None, None, :, :])     # (TB,L,16,256)
    dBuB = (delta3 * u3)[:, :, None, :] * Bm3[:, :, :, None]      # (TB,L,16,256)

    # ----- selective scan: FMA-only recurrence, state (TB,16,256) f32 --------
    h = jnp.zeros((TB, D_STATE, D_INNER), jnp.float32)
    ys = []
    for l in range(L):                 # static unroll: L is small & static
        h = dA[:, l] * h + dBuB[:, l]                             # (TB,16,256)
        y_l = jnp.sum(h * Cm3[:, l, :, None], axis=1)             # (TB, 256)
        ys.append(y_l[:, None, :])
    y3 = jnp.concatenate(ys, axis=1)                              # (TB, L, 256)
    y = y3.reshape(R, D_INNER)

    # ----- skip term, gate, out_proj, residual --------------------------------
    y = y + u2 * D_ref[...]
    y = y * _silu(z)
    out = jnp.dot(y.astype(jnp.bfloat16), w_out_ref[...],
                  preferred_element_type=jnp.float32)             # (R, 64)
    o_ref[...] = (out + x2).reshape(TB, L, D_MODEL)


def pack_params(p_fwd, p_bwd):
    """Fuse / pre-transform parameters once in the wrapper (hoisted from kernel)."""
    def stack(fn):
        return jnp.stack([fn(p_fwd), fn(p_bwd)], axis=0)

    def sbc(p):
        w_delta = p['w_x_dt'] @ p['w_dt']                         # (256, 256)
        wB = jnp.pad(p['w_x_B'], ((0, 0), (0, 128 - D_STATE)))    # (256, 128)
        wC = jnp.pad(p['w_x_C'], ((0, 0), (0, 128 - D_STATE)))    # (256, 128)
        return jnp.concatenate([w_delta, wB, wC], axis=1)         # (256, 512)

    return dict(
        w_in=stack(lambda p: jnp.concatenate([p['w_in_x'], p['w_in_z']],
                                             axis=1)).astype(jnp.bfloat16),
        conv_w=stack(lambda p: p['conv_w']),
        conv_b=stack(lambda p: p['conv_b']),
        w_sbc=stack(sbc).astype(jnp.bfloat16),
        dt_b=stack(lambda p: p['dt_b']),
        A_t=stack(lambda p: -jnp.exp(p['A_log']).T),              # (16, 256)
        D=stack(lambda p: p['D']),
        w_out=stack(lambda p: p['w_out']).astype(jnp.bfloat16),
    )


def _wspec(arr):
    """Per-direction weight: squeeze the stacked leading dim via the index_map."""
    rest = arr.shape[1:]
    n = len(rest)
    return pl.BlockSpec((None,) + rest, lambda d, b, _n=n: (d,) + (0,) * _n)


def mamba_block_forward(x, p_fwd, p_bwd):
    """x: (B, L, 64) -> (B, L, 128)  (matches torch MambaBlock.forward)."""
    B, L, _ = x.shape
    params = pack_params(p_fwd, p_bwd)

    # Backward direction consumes time-flipped input (tiny XLA copy); the
    # kernel itself is branch-free and causal for both directions.
    x_pair = jnp.stack([x, jnp.flip(x, axis=1)], axis=0)          # (2, B, L, 64)

    # Batch rows per grid step: target TB*L >= 128 matmul rows, but cap TB at 8
    # so the scan state h = (TB,16,256) f32 stays within ~half the vreg file.
    tb = min(B, 8, max(1, -(-128 // L)))
    while B % tb:
        tb -= 1
    grid = (2, B // tb)                                           # length >= 2

    in_specs = [pl.BlockSpec((None, tb, L, D_MODEL), lambda d, b: (d, b, 0, 0))]
    in_specs += [_wspec(params[k]) for k in PKEYS]
    out_specs = pl.BlockSpec((None, tb, L, D_MODEL), lambda d, b: (d, b, 0, 0))

    y_pair = pl.pallas_call(
        mamba_dir_kernel,
        out_shape=jax.ShapeDtypeStruct((2, B, L, D_MODEL), jnp.float32),
        grid=grid,
        in_specs=in_specs,
        out_specs=out_specs,
        compiler_params=pltpu.CompilerParams(
            dimension_semantics=("parallel", "parallel")),
    )(x_pair, *[params[k] for k in PKEYS])

    # y_forward | flip(y_backward)  (both already include their residual)
    return jnp.concatenate([y_pair[0], jnp.flip(y_pair[1], axis=1)], axis=-1)


# ------------------------- pure-JAX f32 reference ----------------------------
def mamba_ref(x, p):
    B, L, _ = x.shape
    xc = x @ p['w_in_x']
    z = x @ p['w_in_z']
    xpad = jnp.pad(xc, ((0, 0), (D_CONV - 1, 0), (0, 0)))
    y_conv = sum(xpad[:, k:k + L, :] * p['conv_w'][k] for k in range(D_CONV)) + p['conv_b']
    u = y_conv * jax.nn.sigmoid(y_conv)
    delta = jax.nn.softplus((u @ p['w_x_dt']) @ p['w_dt'] + p['dt_b'])
    Bm = u @ p['w_x_B']
    Cm = u @ p['w_x_C']
    A = -jnp.exp(p['A_log'])

    def step(h, inp):
        d_l, b_l, c_l, u_l = inp
        dA = jnp.exp(d_l[:, :, None] * A[None])
        h = dA * h + d_l[:, :, None] * b_l[:, None, :] * u_l[:, :, None]
        y = jnp.sum(h * c_l[:, None, :], axis=-1)
        return h, y

    h0 = jnp.zeros((B, D_INNER, D_STATE), jnp.float32)
    _, ys = lax.scan(step, h0,
                     (jnp.swapaxes(delta, 0, 1), jnp.swapaxes(Bm, 0, 1),
                      jnp.swapaxes(Cm, 0, 1), jnp.swapaxes(u, 0, 1)))
    y = jnp.swapaxes(ys, 0, 1)
    y = y + u * p['D']
    y = y * (z * jax.nn.sigmoid(z))
    return y @ p['w_out']


def mamba_block_ref(x, p_fwd, p_bwd):
    xf, xb = x, jnp.flip(x, axis=1)
    yf = mamba_ref(xf, p_fwd) + xf
    yb = jnp.flip(mamba_ref(xb, p_bwd) + xb, axis=1)
    return jnp.concatenate([yf, yb], axis=-1)


# ------------------------- deterministic synthetic params --------------------
def init_mamba_params(key):
    ks = jax.random.split(key, 8)
    s = 0.1
    return dict(
        w_in_x=s * jax.random.normal(ks[0], (D_MODEL, D_INNER), jnp.float32),
        w_in_z=s * jax.random.normal(ks[1], (D_MODEL, D_INNER), jnp.float32),
        conv_w=s * jax.random.normal(ks[2], (D_CONV, D_INNER), jnp.float32),
        conv_b=s * jax.random.normal(ks[3], (1, D_INNER), jnp.float32),
        w_x_dt=s * jax.random.normal(ks[4], (D_INNER, DT_RANK), jnp.float32),
        w_x_B=s * jax.random.normal(ks[5], (D_INNER, D_STATE), jnp.float32),
        w_x_C=s * jax.random.normal(ks[6], (D_INNER, D_STATE), jnp.float32),
        w_dt=s * jax.random.normal(ks[7], (DT_RANK, D_INNER), jnp.float32),
        dt_b=jnp.full((1, D_INNER), -2.0, jnp.float32),
        A_log=jnp.log(jnp.broadcast_to(
            jnp.arange(1, D_STATE + 1, dtype=jnp.float32), (D_INNER, D_STATE))),
        D=jnp.ones((1, D_INNER), jnp.float32),
        w_out=s * jax.random.normal(jax.random.fold_in(key, 99),
                                    (D_INNER, D_MODEL), jnp.float32),
    )


if __name__ == "__main__":
    key = jax.random.PRNGKey(0)
    kx, kf, kb = jax.random.split(key, 3)
    B, L = 2, 8
    x = jax.random.normal(kx, (B, L, D_MODEL), jnp.float32)
    p_fwd = init_mamba_params(kf)
    p_bwd = init_mamba_params(kb)

    fwd = jax.jit(mamba_block_forward)
    out = jax.block_until_ready(fwd(x, p_fwd, p_bwd))
    assert out.shape == (B, L, 2 * D_MODEL), out.shape

    ref = jax.block_until_ready(mamba_block_ref(x, p_fwd, p_bwd))
    np.testing.assert_allclose(np.asarray(out), np.asarray(ref),
                               rtol=2e-2, atol=2e-2)

    print("KERNEL_OK")
</pallas_src>

<mosaic_0001>
module attributes {stable_mosaic.version = 11 : i64} {
  func.func @mamba_dir_kernel(%arg0: i32, %arg1: i32, %arg2: memref<1x2x8x64xf32, #tpu.memory_space<vmem>>, %arg3: memref<1x64x512xbf16, #tpu.memory_space<vmem>>, %arg4: memref<1x4x256xf32, #tpu.memory_space<vmem>>, %arg5: memref<1x1x256xf32, #tpu.memory_space<vmem>>, %arg6: memref<1x256x512xbf16, #tpu.memory_space<vmem>>, %arg7: memref<1x1x256xf32, #tpu.memory_space<vmem>>, %arg8: memref<1x16x256xf32, #tpu.memory_space<vmem>>, %arg9: memref<1x1x256xf32, #tpu.memory_space<vmem>>, %arg10: memref<1x256x64xbf16, #tpu.memory_space<vmem>>, %arg11: memref<1x2x8x64xf32, #tpu.memory_space<vmem>>) attributes {dimension_semantics = [#tpu.dimension_semantics<parallel>, #tpu.dimension_semantics<parallel>], iteration_bounds = array<i64: 2, 1>, scalar_prefetch = 0 : i64, scratch_operands = 0 : i64, tpu.core_type = #tpu.core_type<tc>, window_params = [{transform_indices = @transform_0, window_bounds = array<i64: 1, 2, 8, 64>}, {transform_indices = @transform_1, window_bounds = array<i64: 1, 64, 512>}, {transform_indices = @transform_2, window_bounds = array<i64: 1, 4, 256>}, {transform_indices = @transform_3, window_bounds = array<i64: 1, 1, 256>}, {transform_indices = @transform_4, window_bounds = array<i64: 1, 256, 512>}, {transform_indices = @transform_5, window_bounds = array<i64: 1, 1, 256>}, {transform_indices = @transform_6, window_bounds = array<i64: 1, 16, 256>}, {transform_indices = @transform_7, window_bounds = array<i64: 1, 1, 256>}, {transform_indices = @transform_8, window_bounds = array<i64: 1, 256, 64>}, {transform_indices = @transform_9, window_bounds = array<i64: 1, 2, 8, 64>}]} {
    %c0 = arith.constant 0 : index
    %c0_0 = arith.constant 0 : index
    %c0_1 = arith.constant 0 : index
    %c0_2 = arith.constant 0 : index
    %0 = vector.load %arg2[%c0, %c0_0, %c0_1, %c0_2] : memref<1x2x8x64xf32, #tpu.memory_space<vmem>>, vector<1x2x8x64xf32>
    %1 = vector.shape_cast %0 : vector<1x2x8x64xf32> to vector<2x8x64xf32>
    %2 = vector.shape_cast %1 : vector<2x8x64xf32> to vector<16x64xf32>
    %3 = arith.truncf %2 : vector<16x64xf32> to vector<16x64xbf16>
    %c0_3 = arith.constant 0 : index
    %c0_4 = arith.constant 0 : index
    %c0_5 = arith.constant 0 : index
    %4 = vector.load %arg3[%c0_3, %c0_4, %c0_5] : memref<1x64x512xbf16, #tpu.memory_space<vmem>>, vector<1x64x512xbf16>
    %5 = vector.shape_cast %4 : vector<1x64x512xbf16> to vector<64x512xbf16>
    %cst = arith.constant dense<0.000000e+00> : vector<16x512xf32>
    %6 = tpu.matmul %3, %5, %cst {dimension_numbers = #tpu.dot_dimension_numbers<[1], [0], [0], [1], [0, 0, 1, 1], [], []>} : vector<16x64xbf16>, vector<64x512xbf16>, vector<16x512xf32> -> vector<16x512xf32>
    %7 = vector.extract_strided_slice %6 {offsets = [0, 0], sizes = [16, 256], strides = [1, 1]} : vector<16x512xf32> to vector<16x256xf32>
    %8 = vector.extract_strided_slice %6 {offsets = [0, 256], sizes = [16, 256], strides = [1, 1]} : vector<16x512xf32> to vector<16x256xf32>
    %9 = vector.shape_cast %7 : vector<16x256xf32> to vector<2x8x256xf32>
    %c0_6 = arith.constant 0 : index
    %c0_7 = arith.constant 0 : index
    %c0_8 = arith.constant 0 : index
    %10 = vector.load %arg4[%c0_6, %c0_7, %c0_8] : memref<1x4x256xf32, #tpu.memory_space<vmem>>, vector<1x4x256xf32>
    %11 = vector.shape_cast %10 : vector<1x4x256xf32> to vector<4x256xf32>
    %12 = tpu.iota {dimensions = array<i32: 0>} : vector<8x256xi32>
    %13 = vector.extract_strided_slice %11 {offsets = [3, 0], sizes = [1, 256], strides = [1, 1]} : vector<4x256xf32> to vector<1x256xf32>
    %14 = vector.shape_cast %13 : vector<1x256xf32> to vector<1x1x256xf32>
    %15 = vector.broadcast %14 : vector<1x1x256xf32> to vector<2x8x256xf32>
    %16 = arith.mulf %9, %15 : vector<2x8x256xf32>
    %c1_i32 = arith.constant 1 : i32
    %17 = tpu.dynamic_rotate %9 by %c1_i32 dim 1 : vector<2x8x256xf32>, i32 -> vector<2x8x256xf32>
    %c1_i32_9 = arith.constant 1 : i32
    %18 = vector.broadcast %c1_i32_9 : i32 to vector<8x256xi32>
    %19 = arith.cmpi sge, %12, %18 : vector<8x256xi32>
    %20 = vector.shape_cast %19 : vector<8x256xi1> to vector<1x8x256xi1>
    %cst_10 = arith.constant 0.000000e+00 : f32
    %21 = vector.shape_cast %20 : vector<1x8x256xi1> to vector<1x8x256xi1>
    %22 = vector.broadcast %21 : vector<1x8x256xi1> to vector<2x8x256xi1>
    %23 = vector.broadcast %cst_10 : f32 to vector<2x8x256xf32>
    %24 = arith.select %22, %17, %23 : vector<2x8x256xi1>, vector<2x8x256xf32>
    %25 = vector.extract_strided_slice %11 {offsets = [2, 0], sizes = [1, 256], strides = [1, 1]} : vector<4x256xf32> to vector<1x256xf32>
    %26 = vector.shape_cast %25 : vector<1x256xf32> to vector<1x1x256xf32>
    %27 = vector.broadcast %26 : vector<1x1x256xf32> to vector<2x8x256xf32>
    %28 = arith.mulf %24, %27 : vector<2x8x256xf32>
    %29 = arith.addf %16, %28 : vector<2x8x256xf32>
    %c2_i32 = arith.constant 2 : i32
    %30 = tpu.dynamic_rotate %9 by %c2_i32 dim 1 : vector<2x8x256xf32>, i32 -> vector<2x8x256xf32>
    %c2_i32_11 = arith.constant 2 : i32
    %31 = vector.broadcast %c2_i32_11 : i32 to vector<8x256xi32>
    %32 = arith.cmpi sge, %12, %31 : vector<8x256xi32>
    %33 = vector.shape_cast %32 : vector<8x256xi1> to vector<1x8x256xi1>
    %cst_12 = arith.constant 0.000000e+00 : f32
    %34 = vector.shape_cast %33 : vector<1x8x256xi1> to vector<1x8x256xi1>
    %35 = vector.broadcast %34 : vector<1x8x256xi1> to vector<2x8x256xi1>
    %36 = vector.broadcast %cst_12 : f32 to vector<2x8x256xf32>
    %37 = arith.select %35, %30, %36 : vector<2x8x256xi1>, vector<2x8x256xf32>
    %38 = vector.extract_strided_slice %11 {offsets = [1, 0], sizes = [1, 256], strides = [1, 1]} : vector<4x256xf32> to vector<1x256xf32>
    %39 = vector.shape_cast %38 : vector<1x256xf32> to vector<1x1x256xf32>
    %40 = vector.broadcast %39 : vector<1x1x256xf32> to vector<2x8x256xf32>
    %41 = arith.mulf %37, %40 : vector<2x8x256xf32>
    %42 = arith.addf %29, %41 : vector<2x8x256xf32>
    %c3_i32 = arith.constant 3 : i32
    %43 = tpu.dynamic_rotate %9 by %c3_i32 dim 1 : vector<2x8x256xf32>, i32 -> vector<2x8x256xf32>
    %c3_i32_13 = arith.constant 3 : i32
    %44 = vector.broadcast %c3_i32_13 : i32 to vector<8x256xi32>
    %45 = arith.cmpi sge, %12, %44 : vector<8x256xi32>
    %46 = vector.shape_cast %45 : vector<8x256xi1> to vector<1x8x256xi1>
    %cst_14 = arith.constant 0.000000e+00 : f32
    %47 = vector.shape_cast %46 : vector<1x8x256xi1> to vector<1x8x256xi1>
    %48 = vector.broadcast %47 : vector<1x8x256xi1> to vector<2x8x256xi1>
    %49 = vector.broadcast %cst_14 : f32 to vector<2x8x256xf32>
    %50 = arith.select %48, %43, %49 : vector<2x8x256xi1>, vector<2x8x256xf32>
    %51 = vector.extract_strided_slice %11 {offsets = [0, 0], sizes = [1, 256], strides = [1, 1]} : vector<4x256xf32> to vector<1x256xf32>
    %52 = vector.shape_cast %51 : vector<1x256xf32> to vector<1x1x256xf32>
    %53 = vector.broadcast %52 : vector<1x1x256xf32> to vector<2x8x256xf32>
    %54 = arith.mulf %50, %53 : vector<2x8x256xf32>
    %55 = arith.addf %42, %54 : vector<2x8x256xf32>
    %c0_15 = arith.constant 0 : index
    %c0_16 = arith.constant 0 : index
    %c0_17 = arith.constant 0 : index
    %56 = vector.load %arg5[%c0_15, %c0_16, %c0_17] : memref<1x1x256xf32, #tpu.memory_space<vmem>>, vector<1x1x256xf32>
    %57 = vector.shape_cast %56 : vector<1x1x256xf32> to vector<1x256xf32>
    %58 = vector.shape_cast %57 : vector<1x256xf32> to vector<1x1x256xf32>
    %59 = vector.broadcast %58 : vector<1x1x256xf32> to vector<2x8x256xf32>
    %60 = arith.addf %55, %59 : vector<2x8x256xf32>
    %61 = arith.negf %60 : vector<2x8x256xf32>
    %62 = math.exp %61 : vector<2x8x256xf32>
    %cst_18 = arith.constant 1.000000e+00 : f32
    %63 = vector.broadcast %cst_18 : f32 to vector<2x8x256xf32>
    %64 = arith.addf %63, %62 : vector<2x8x256xf32>
    %65 = arith.divf %63, %64 : vector<2x8x256xf32>
    %66 = arith.mulf %60, %65 : vector<2x8x256xf32>
    %67 = vector.shape_cast %66 : vector<2x8x256xf32> to vector<16x256xf32>
    %68 = arith.truncf %67 : vector<16x256xf32> to vector<16x256xbf16>
    %c0_19 = arith.constant 0 : index
    %c0_20 = arith.constant 0 : index
    %c0_21 = arith.constant 0 : index
    %69 = vector.load %arg6[%c0_19, %c0_20, %c0_21] : memref<1x256x512xbf16, #tpu.memory_space<vmem>>, vector<1x256x512xbf16>
    %70 = vector.shape_cast %69 : vector<1x256x512xbf16> to vector<256x512xbf16>
    %cst_22 = arith.constant dense<0.000000e+00> : vector<16x512xf32>
    %71 = tpu.matmul %68, %70, %cst_22 {dimension_numbers = #tpu.dot_dimension_numbers<[1], [0], [0], [1], [0, 0, 1, 1], [], []>} : vector<16x256xbf16>, vector<256x512xbf16>, vector<16x512xf32> -> vector<16x512xf32>
    %72 = vector.extract_strided_slice %71 {offsets = [0, 0], sizes = [16, 256], strides = [1, 1]} : vector<16x512xf32> to vector<16x256xf32>
    %c0_23 = arith.constant 0 : index
    %c0_24 = arith.constant 0 : index
    %c0_25 = arith.constant 0 : index
    %73 = vector.load %arg7[%c0_23, %c0_24, %c0_25] : memref<1x1x256xf32, #tpu.memory_space<vmem>>, vector<1x1x256xf32>
    %74 = vector.shape_cast %73 : vector<1x1x256xf32> to vector<1x256xf32>
    %75 = vector.broadcast %74 : vector<1x256xf32> to vector<16x256xf32>
    %76 = arith.addf %72, %75 : vector<16x256xf32>
    %cst_26 = arith.constant 0.000000e+00 : f32
    %77 = vector.broadcast %cst_26 : f32 to vector<16x256xf32>
    %78 = arith.maximumf %76, %77 : vector<16x256xf32>
    %79 = math.absf %76 : vector<16x256xf32>
    %cst_27 = arith.constant 0.000000e+00 : f32
    %80 = vector.broadcast %cst_27 : f32 to vector<16x256xf32>
    %81 = arith.subf %80, %79 : vector<16x256xf32>
    %82 = math.exp %81 : vector<16x256xf32>
    %83 = math.log1p %82 : vector<16x256xf32>
    %84 = arith.addf %78, %83 : vector<16x256xf32>
    %85 = vector.extract_strided_slice %71 {offsets = [0, 256], sizes = [16, 16], strides = [1, 1]} : vector<16x512xf32> to vector<16x16xf32>
    %86 = vector.shape_cast %85 : vector<16x16xf32> to vector<2x8x16xf32>
    %87 = vector.extract_strided_slice %71 {offsets = [0, 384], sizes = [16, 16], strides = [1, 1]} : vector<16x512xf32> to vector<16x16xf32>
    %88 = vector.shape_cast %87 : vector<16x16xf32> to vector<2x8x16xf32>
    %89 = vector.shape_cast %84 : vector<16x256xf32> to vector<2x8x256xf32>
    %c0_28 = arith.constant 0 : index
    %c0_29 = arith.constant 0 : index
    %c0_30 = arith.constant 0 : index
    %90 = vector.load %arg8[%c0_28, %c0_29, %c0_30] : memref<1x16x256xf32, #tpu.memory_space<vmem>>, vector<1x16x256xf32>
    %91 = vector.shape_cast %90 : vector<1x16x256xf32> to vector<16x256xf32>
    %92 = vector.shape_cast %89 : vector<2x8x256xf32> to vector<2x8x1x256xf32>
    %93 = vector.shape_cast %91 : vector<16x256xf32> to vector<1x1x16x256xf32>
    %94 = vector.broadcast %92 : vector<2x8x1x256xf32> to vector<2x8x16x256xf32>
    %95 = vector.broadcast %93 : vector<1x1x16x256xf32> to vector<2x8x16x256xf32>
    %96 = arith.mulf %94, %95 : vector<2x8x16x256xf32>
    %97 = math.exp %96 : vector<2x8x16x256xf32>
    %98 = arith.mulf %89, %66 : vector<2x8x256xf32>
    %99 = vector.shape_cast %98 : vector<2x8x256xf32> to vector<2x8x1x256xf32>
    %100 = vector.shape_cast %86 : vector<2x8x16xf32> to vector<2x8x16x1xf32>
    %101 = vector.broadcast %99 : vector<2x8x1x256xf32> to vector<2x8x16x256xf32>
    %102 = vector.broadcast %100 : vector<2x8x16x1xf32> to vector<2x8x16x256xf32>
    %103 = arith.mulf %101, %102 : vector<2x8x16x256xf32>
    %cst_31 = arith.constant 0.000000e+00 : f32
    %104 = vector.broadcast %cst_31 : f32 to vector<2x16x256xf32>
    %105 = vector.extract_strided_slice %97 {offsets = [0, 0, 0, 0], sizes = [2, 1, 16, 256], strides = [1, 1, 1, 1]} : vector<2x8x16x256xf32> to vector<2x1x16x256xf32>
    %106 = vector.shape_cast %105 : vector<2x1x16x256xf32> to vector<2x16x256xf32>
    %107 = arith.mulf %106, %104 : vector<2x16x256xf32>
    %108 = vector.extract_strided_slice %103 {offsets = [0, 0, 0, 0], sizes = [2, 1, 16, 256], strides = [1, 1, 1, 1]} : vector<2x8x16x256xf32> to vector<2x1x16x256xf32>
    %109 = vector.shape_cast %108 : vector<2x1x16x256xf32> to vector<2x16x256xf32>
    %110 = arith.addf %107, %109 : vector<2x16x256xf32>
    %111 = vector.extract_strided_slice %88 {offsets = [0, 0, 0], sizes = [2, 1, 16], strides = [1, 1, 1]} : vector<2x8x16xf32> to vector<2x1x16xf32>
    %112 = vector.shape_cast %111 : vector<2x1x16xf32> to vector<2x16xf32>
    %113 = vector.shape_cast %112 : vector<2x16xf32> to vector<2x16x1xf32>
    %114 = vector.broadcast %113 : vector<2x16x1xf32> to vector<2x16x256xf32>
    %115 = arith.mulf %110, %114 : vector<2x16x256xf32>
    %cst_32 = arith.constant dense<0.000000e+00> : vector<2x256xf32>
    %116 = vector.multi_reduction <add>, %115, %cst_32 [1] : vector<2x16x256xf32> to vector<2x256xf32>
    %117 = vector.shape_cast %116 : vector<2x256xf32> to vector<2x1x256xf32>
    %118 = vector.extract_strided_slice %97 {offsets = [0, 1, 0, 0], sizes = [2, 1, 16, 256], strides = [1, 1, 1, 1]} : vector<2x8x16x256xf32> to vector<2x1x16x256xf32>
    %119 = vector.shape_cast %118 : vector<2x1x16x256xf32> to vector<2x16x256xf32>
    %120 = arith.mulf %119, %110 : vector<2x16x256xf32>
    %121 = vector.extract_strided_slice %103 {offsets = [0, 1, 0, 0], sizes = [2, 1, 16, 256], strides = [1, 1, 1, 1]} : vector<2x8x16x256xf32> to vector<2x1x16x256xf32>
    %122 = vector.shape_cast %121 : vector<2x1x16x256xf32> to vector<2x16x256xf32>
    %123 = arith.addf %120, %122 : vector<2x16x256xf32>
    %124 = vector.extract_strided_slice %88 {offsets = [0, 1, 0], sizes = [2, 1, 16], strides = [1, 1, 1]} : vector<2x8x16xf32> to vector<2x1x16xf32>
    %125 = vector.shape_cast %124 : vector<2x1x16xf32> to vector<2x16xf32>
    %126 = vector.shape_cast %125 : vector<2x16xf32> to vector<2x16x1xf32>
    %127 = vector.broadcast %126 : vector<2x16x1xf32> to vector<2x16x256xf32>
    %128 = arith.mulf %123, %127 : vector<2x16x256xf32>
    %cst_33 = arith.constant dense<0.000000e+00> : vector<2x256xf32>
    %129 = vector.multi_reduction <add>, %128, %cst_33 [1] : vector<2x16x256xf32> to vector<2x256xf32>
    %130 = vector.shape_cast %129 : vector<2x256xf32> to vector<2x1x256xf32>
    %131 = vector.extract_strided_slice %97 {offsets = [0, 2, 0, 0], sizes = [2, 1, 16, 256], strides = [1, 1, 1, 1]} : vector<2x8x16x256xf32> to vector<2x1x16x256xf32>
    %132 = vector.shape_cast %131 : vector<2x1x16x256xf32> to vector<2x16x256xf32>
    %133 = arith.mulf %132, %123 : vector<2x16x256xf32>
    %134 = vector.extract_strided_slice %103 {offsets = [0, 2, 0, 0], sizes = [2, 1, 16, 256], strides = [1, 1, 1, 1]} : vector<2x8x16x256xf32> to vector<2x1x16x256xf32>
    %135 = vector.shape_cast %134 : vector<2x1x16x256xf32> to vector<2x16x256xf32>
    %136 = arith.addf %133, %135 : vector<2x16x256xf32>
    %137 = vector.extract_strided_slice %88 {offsets = [0, 2, 0], sizes = [2, 1, 16], strides = [1, 1, 1]} : vector<2x8x16xf32> to vector<2x1x16xf32>
    %138 = vector.shape_cast %137 : vector<2x1x16xf32> to vector<2x16xf32>
    %139 = vector.shape_cast %138 : vector<2x16xf32> to vector<2x16x1xf32>
    %140 = vector.broadcast %139 : vector<2x16x1xf32> to vector<2x16x256xf32>
    %141 = arith.mulf %136, %140 : vector<2x16x256xf32>
    %cst_34 = arith.constant dense<0.000000e+00> : vector<2x256xf32>
    %142 = vector.multi_reduction <add>, %141, %cst_34 [1] : vector<2x16x256xf32> to vector<2x256xf32>
    %143 = vector.shape_cast %142 : vector<2x256xf32> to vector<2x1x256xf32>
    %144 = vector.extract_strided_slice %97 {offsets = [0, 3, 0, 0], sizes = [2, 1, 16, 256], strides = [1, 1, 1, 1]} : vector<2x8x16x256xf32> to vector<2x1x16x256xf32>
    %145 = vector.shape_cast %144 : vector<2x1x16x256xf32> to vector<2x16x256xf32>
    %146 = arith.mulf %145, %136 : vector<2x16x256xf32>
    %147 = vector.extract_strided_slice %103 {offsets = [0, 3, 0, 0], sizes = [2, 1, 16, 256], strides = [1, 1, 1, 1]} : vector<2x8x16x256xf32> to vector<2x1x16x256xf32>
    %148 = vector.shape_cast %147 : vector<2x1x16x256xf32> to vector<2x16x256xf32>
    %149 = arith.addf %146, %148 : vector<2x16x256xf32>
    %150 = vector.extract_strided_slice %88 {offsets = [0, 3, 0], sizes = [2, 1, 16], strides = [1, 1, 1]} : vector<2x8x16xf32> to vector<2x1x16xf32>
    %151 = vector.shape_cast %150 : vector<2x1x16xf32> to vector<2x16xf32>
    %152 = vector.shape_cast %151 : vector<2x16xf32> to vector<2x16x1xf32>
    %153 = vector.broadcast %152 : vector<2x16x1xf32> to vector<2x16x256xf32>
    %154 = arith.mulf %149, %153 : vector<2x16x256xf32>
    %cst_35 = arith.constant dense<0.000000e+00> : vector<2x256xf32>
    %155 = vector.multi_reduction <add>, %154, %cst_35 [1] : vector<2x16x256xf32> to vector<2x256xf32>
    %156 = vector.shape_cast %155 : vector<2x256xf32> to vector<2x1x256xf32>
    %157 = vector.extract_strided_slice %97 {offsets = [0, 4, 0, 0], sizes = [2, 1, 16, 256], strides = [1, 1, 1, 1]} : vector<2x8x16x256xf32> to vector<2x1x16x256xf32>
    %158 = vector.shape_cast %157 : vector<2x1x16x256xf32> to vector<2x16x256xf32>
    %159 = arith.mulf %158, %149 : vector<2x16x256xf32>
    %160 = vector.extract_strided_slice %103 {offsets = [0, 4, 0, 0], sizes = [2, 1, 16, 256], strides = [1, 1, 1, 1]} : vector<2x8x16x256xf32> to vector<2x1x16x256xf32>
    %161 = vector.shape_cast %160 : vector<2x1x16x256xf32> to vector<2x16x256xf32>
    %162 = arith.addf %159, %161 : vector<2x16x256xf32>
    %163 = vector.extract_strided_slice %88 {offsets = [0, 4, 0], sizes = [2, 1, 16], strides = [1, 1, 1]} : vector<2x8x16xf32> to vector<2x1x16xf32>
    %164 = vector.shape_cast %163 : vector<2x1x16xf32> to vector<2x16xf32>
    %165 = vector.shape_cast %164 : vector<2x16xf32> to vector<2x16x1xf32>
    %166 = vector.broadcast %165 : vector<2x16x1xf32> to vector<2x16x256xf32>
    %167 = arith.mulf %162, %166 : vector<2x16x256xf32>
    %cst_36 = arith.constant dense<0.000000e+00> : vector<2x256xf32>
    %168 = vector.multi_reduction <add>, %167, %cst_36 [1] : vector<2x16x256xf32> to vector<2x256xf32>
    %169 = vector.shape_cast %168 : vector<2x256xf32> to vector<2x1x256xf32>
    %170 = vector.extract_strided_slice %97 {offsets = [0, 5, 0, 0], sizes = [2, 1, 16, 256], strides = [1, 1, 1, 1]} : vector<2x8x16x256xf32> to vector<2x1x16x256xf32>
    %171 = vector.shape_cast %170 : vector<2x1x16x256xf32> to vector<2x16x256xf32>
    %172 = arith.mulf %171, %162 : vector<2x16x256xf32>
    %173 = vector.extract_strided_slice %103 {offsets = [0, 5, 0, 0], sizes = [2, 1, 16, 256], strides = [1, 1, 1, 1]} : vector<2x8x16x256xf32> to vector<2x1x16x256xf32>
    %174 = vector.shape_cast %173 : vector<2x1x16x256xf32> to vector<2x16x256xf32>
    %175 = arith.addf %172, %174 : vector<2x16x256xf32>
    %176 = vector.extract_strided_slice %88 {offsets = [0, 5, 0], sizes = [2, 1, 16], strides = [1, 1, 1]} : vector<2x8x16xf32> to vector<2x1x16xf32>
    %177 = vector.shape_cast %176 : vector<2x1x16xf32> to vector<2x16xf32>
    %178 = vector.shape_cast %177 : vector<2x16xf32> to vector<2x16x1xf32>
    %179 = vector.broadcast %178 : vector<2x16x1xf32> to vector<2x16x256xf32>
    %180 = arith.mulf %175, %179 : vector<2x16x256xf32>
    %cst_37 = arith.constant dense<0.000000e+00> : vector<2x256xf32>
    %181 = vector.multi_reduction <add>, %180, %cst_37 [1] : vector<2x16x256xf32> to vector<2x256xf32>
    %182 = vector.shape_cast %181 : vector<2x256xf32> to vector<2x1x256xf32>
    %183 = vector.extract_strided_slice %97 {offsets = [0, 6, 0, 0], sizes = [2, 1, 16, 256], strides = [1, 1, 1, 1]} : vector<2x8x16x256xf32> to vector<2x1x16x256xf32>
    %184 = vector.shape_cast %183 : vector<2x1x16x256xf32> to vector<2x16x256xf32>
    %185 = arith.mulf %184, %175 : vector<2x16x256xf32>
    %186 = vector.extract_strided_slice %103 {offsets = [0, 6, 0, 0], sizes = [2, 1, 16, 256], strides = [1, 1, 1, 1]} : vector<2x8x16x256xf32> to vector<2x1x16x256xf32>
    %187 = vector.shape_cast %186 : vector<2x1x16x256xf32> to vector<2x16x256xf32>
    %188 = arith.addf %185, %187 : vector<2x16x256xf32>
    %189 = vector.extract_strided_slice %88 {offsets = [0, 6, 0], sizes = [2, 1, 16], strides = [1, 1, 1]} : vector<2x8x16xf32> to vector<2x1x16xf32>
    %190 = vector.shape_cast %189 : vector<2x1x16xf32> to vector<2x16xf32>
    %191 = vector.shape_cast %190 : vector<2x16xf32> to vector<2x16x1xf32>
    %192 = vector.broadcast %191 : vector<2x16x1xf32> to vector<2x16x256xf32>
    %193 = arith.mulf %188, %192 : vector<2x16x256xf32>
    %cst_38 = arith.constant dense<0.000000e+00> : vector<2x256xf32>
    %194 = vector.multi_reduction <add>, %193, %cst_38 [1] : vector<2x16x256xf32> to vector<2x256xf32>
    %195 = vector.shape_cast %194 : vector<2x256xf32> to vector<2x1x256xf32>
    %196 = vector.extract_strided_slice %97 {offsets = [0, 7, 0, 0], sizes = [2, 1, 16, 256], strides = [1, 1, 1, 1]} : vector<2x8x16x256xf32> to vector<2x1x16x256xf32>
    %197 = vector.shape_cast %196 : vector<2x1x16x256xf32> to vector<2x16x256xf32>
    %198 = arith.mulf %197, %188 : vector<2x16x256xf32>
    %199 = vector.extract_strided_slice %103 {offsets = [0, 7, 0, 0], sizes = [2, 1, 16, 256], strides = [1, 1, 1, 1]} : vector<2x8x16x256xf32> to vector<2x1x16x256xf32>
    %200 = vector.shape_cast %199 : vector<2x1x16x256xf32> to vector<2x16x256xf32>
    %201 = arith.addf %198, %200 : vector<2x16x256xf32>
    %202 = vector.extract_strided_slice %88 {offsets = [0, 7, 0], sizes = [2, 1, 16], strides = [1, 1, 1]} : vector<2x8x16xf32> to vector<2x1x16xf32>
    %203 = vector.shape_cast %202 : vector<2x1x16xf32> to vector<2x16xf32>
    %204 = vector.shape_cast %203 : vector<2x16xf32> to vector<2x16x1xf32>
    %205 = vector.broadcast %204 : vector<2x16x1xf32> to vector<2x16x256xf32>
    %206 = arith.mulf %201, %205 : vector<2x16x256xf32>
    %cst_39 = arith.constant dense<0.000000e+00> : vector<2x256xf32>
    %207 = vector.multi_reduction <add>, %206, %cst_39 [1] : vector<2x16x256xf32> to vector<2x256xf32>
    %208 = vector.shape_cast %207 : vector<2x256xf32> to vector<2x1x256xf32>
    %209 = tpu.concatenate %117, %130, %143, %156, %169, %182, %195, %208 in 1 : vector<2x1x256xf32>, vector<2x1x256xf32>, vector<2x1x256xf32>, vector<2x1x256xf32>, vector<2x1x256xf32>, vector<2x1x256xf32>, vector<2x1x256xf32>, vector<2x1x256xf32> -> vector<2x8x256xf32>
    %210 = vector.shape_cast %209 : vector<2x8x256xf32> to vector<16x256xf32>
    %c0_40 = arith.constant 0 : index
    %c0_41 = arith.constant 0 : index
    %c0_42 = arith.constant 0 : index
    %211 = vector.load %arg9[%c0_40, %c0_41, %c0_42] : memref<1x1x256xf32, #tpu.memory_space<vmem>>, vector<1x1x256xf32>
    %212 = vector.shape_cast %211 : vector<1x1x256xf32> to vector<1x256xf32>
    %213 = vector.broadcast %212 : vector<1x256xf32> to vector<16x256xf32>
    %214 = arith.mulf %67, %213 : vector<16x256xf32>
    %215 = arith.addf %210, %214 : vector<16x256xf32>
    %216 = arith.negf %8 : vector<16x256xf32>
    %217 = math.exp %216 : vector<16x256xf32>
    %cst_43 = arith.constant 1.000000e+00 : f32
    %218 = vector.broadcast %cst_43 : f32 to vector<16x256xf32>
    %219 = arith.addf %218, %217 : vector<16x256xf32>
    %220 = arith.divf %218, %219 : vector<16x256xf32>
    %221 = arith.mulf %8, %220 : vector<16x256xf32>
    %222 = arith.mulf %215, %221 : vector<16x256xf32>
    %223 = arith.truncf %222 : vector<16x256xf32> to vector<16x256xbf16>
    %c0_44 = arith.constant 0 : index
    %c0_45 = arith.constant 0 : index
    %c0_46 = arith.constant 0 : index
    %224 = vector.load %arg10[%c0_44, %c0_45, %c0_46] : memref<1x256x64xbf16, #tpu.memory_space<vmem>>, vector<1x256x64xbf16>
    %225 = vector.shape_cast %224 : vector<1x256x64xbf16> to vector<256x64xbf16>
    %cst_47 = arith.constant dense<0.000000e+00> : vector<16x64xf32>
    %226 = tpu.matmul %223, %225, %cst_47 {dimension_numbers = #tpu.dot_dimension_numbers<[1], [0], [0], [1], [0, 0, 1, 1], [], []>} : vector<16x256xbf16>, vector<256x64xbf16>, vector<16x64xf32> -> vector<16x64xf32>
    %227 = arith.addf %226, %2 : vector<16x64xf32>
    %228 = vector.shape_cast %227 : vector<16x64xf32> to vector<2x8x64xf32>
    %c0_48 = arith.constant 0 : index
    %c0_49 = arith.constant 0 : index
    %c0_50 = arith.constant 0 : index
    %c0_51 = arith.constant 0 : index
    %229 = vector.load %arg11[%c0_48, %c0_49, %c0_50, %c0_51] : memref<1x2x8x64xf32, #tpu.memory_space<vmem>>, vector<1x2x8x64xf32>
    %230 = vector.shape_cast %229 : vector<1x2x8x64xf32> to vector<2x8x64xf32>
    %231 = vector.shape_cast %228 : vector<2x8x64xf32> to vector<1x2x8x64xf32>
    tpu.vector_store %arg11[%c0_48, %c0_49, %c0_50, %c0_51], %231 {strides = array<i32>} : memref<1x2x8x64xf32, #tpu.memory_space<vmem>>, vector<1x2x8x64xf32>,
    return
  }
  func.func @transform_0(%arg0: i32, %arg1: i32) -> (i32, i32, i32, i32) {
    %c0_i32 = arith.constant 0 : i32
    %c0_i32_0 = arith.constant 0 : i32
    %c0_i32_1 = arith.constant 0 : i32
    return %arg0, %arg1, %c0_i32, %c0_i32_0 : i32, i32, i32, i32
  }
  func.func @transform_1(%arg0: i32, %arg1: i32) -> (i32, i32, i32) {
    %c0_i32 = arith.constant 0 : i32
    %c0_i32_0 = arith.constant 0 : i32
    %c0_i32_1 = arith.constant 0 : i32
    return %arg0, %c0_i32, %c0_i32_0 : i32, i32, i32
  }
  func.func @transform_2(%arg0: i32, %arg1: i32) -> (i32, i32, i32) {
    %c0_i32 = arith.constant 0 : i32
    %c0_i32_0 = arith.constant 0 : i32
    %c0_i32_1 = arith.constant 0 : i32
    return %arg0, %c0_i32, %c0_i32_0 : i32, i32, i32
  }
  func.func @transform_3(%arg0: i32, %arg1: i32) -> (i32, i32, i32) {
    %c0_i32 = arith.constant 0 : i32
    %c0_i32_0 = arith.constant 0 : i32
    %c0_i32_1 = arith.constant 0 : i32
    return %arg0, %c0_i32, %c0_i32_0 : i32, i32, i32
  }
  func.func @transform_4(%arg0: i32, %arg1: i32) -> (i32, i32, i32) {
    %c0_i32 = arith.constant 0 : i32
    %c0_i32_0 = arith.constant 0 : i32
    %c0_i32_1 = arith.constant 0 : i32
    return %arg0, %c0_i32, %c0_i32_0 : i32, i32, i32
  }
  func.func @transform_5(%arg0: i32, %arg1: i32) -> (i32, i32, i32) {
    %c0_i32 = arith.constant 0 : i32
    %c0_i32_0 = arith.constant 0 : i32
    %c0_i32_1 = arith.constant 0 : i32
    return %arg0, %c0_i32, %c0_i32_0 : i32, i32, i32
  }
  func.func @transform_6(%arg0: i32, %arg1: i32) -> (i32, i32, i32) {
    %c0_i32 = arith.constant 0 : i32
    %c0_i32_0 = arith.constant 0 : i32
    %c0_i32_1 = arith.constant 0 : i32
    return %arg0, %c0_i32, %c0_i32_0 : i32, i32, i32
  }
  func.func @transform_7(%arg0: i32, %arg1: i32) -> (i32, i32, i32) {
    %c0_i32 = arith.constant 0 : i32
    %c0_i32_0 = arith.constant 0 : i32
    %c0_i32_1 = arith.constant 0 : i32
    return %arg0, %c0_i32, %c0_i32_0 : i32, i32, i32
  }
  func.func @transform_8(%arg0: i32, %arg1: i32) -> (i32, i32, i32) {
    %c0_i32 = arith.constant 0 : i32
    %c0_i32_0 = arith.constant 0 : i32
    %c0_i32_1 = arith.constant 0 : i32
    return %arg0, %c0_i32, %c0_i32_0 : i32, i32, i32
  }
  func.func @transform_9(%arg0: i32, %arg1: i32) -> (i32, i32, i32, i32) {
    %c0_i32 = arith.constant 0 : i32
    %c0_i32_0 = arith.constant 0 : i32
    %c0_i32_1 = arith.constant 0 : i32
    return %arg0, %arg1, %c0_i32, %c0_i32_0 : i32, i32, i32, i32
  }
}

</mosaic_0001>

<bundles_post_ra>
// kernel: mamba_block_forward.1
= control target key start
LH: loop header
LB: loop body
LE: loop exit
PB: predicated region body
PF: predicated region fallthrough
CT: control target
= control target key end

     0   :  { %s4062_s30 = smov 0   ;;  %s4064_s10 = smov 0   ;;  %s5756_s0 = inlined_call_operand.vmem [shape: f32[2,2,8,64], index: 0, kind: input, shape index: {}]   ;;  %s5757_s1 = inlined_call_operand.vmem [shape: bf16[2,64,512], index: 1, kind: input, shape index: {}]   ;;  %s5758_s2 = inlined_call_operand.vmem [shape: f32[2,4,256], index: 2, kind: input, shape index: {}]   ;;  %s5759_s3 = inlined_call_operand.vmem [shape: f32[2,1,256], index: 3, kind: input, shape index: {}]   ;;  %s5760_s4 = inlined_call_operand.vmem [shape: bf16[2,256,512], index: 4, kind: input, shape index: {}]   ;;  %s5761_s5 = inlined_call_operand.vmem [shape: f32[2,1,256], index: 5, kind: input, shape index: {}]   ;;  %s5762_s6 = inlined_call_operand.vmem [shape: f32[2,16,256], index: 6, kind: input, shape index: {}]   ;;  %s5763_s7 = inlined_call_operand.vmem [shape: f32[2,1,256], index: 7, kind: input, shape index: {}]   ;;  %s5764_s8 = inlined_call_operand.vmem [shape: bf16[2,256,64], index: 8, kind: input, shape index: {}]   ;;  %s5765_s9 = inlined_call_operand.vmem [shape: f32[2,2,8,64], index: 9, kind: output, shape index: {}]  }
   0x1   :  { %s4066_s11 = smov 0  }
   0x2 LB: > { %s31_s12 = sadd.s32 1, %s4006_s10  ;;  %p3212_p0 = scmp.ge.s32.totalorder %s4010_s11, 1  ;;  %s4010_s11 = sphi %s4066_s11, %s19_s11   ;;  %s4006_s10 = sphi %s4064_s10, %s5868_s10   ;;  %s4002_s30 = sphi %s4062_s30, %s5867_s30  }
   0x3   : > { %p33_p1 = scmp.ge.s32.totalorder %s31_s12, 2  ;;  %p385_p2 = scmp.lt.s32.totalorder %s4010_s11, 3 }
   0x5   : > { %s5870_s12 = smov (%p33_p1, %s31_s12), 0  ;;  %p386_p3 = pnand %p3212_p0, %p385_p2 }
   0x7   : > { %389 = sbr.rel (%p386_p3) target bundleno = 990 (0x3de), region = 56 }
   0xc   : > { %p467_p4 = scmp.lt.s32.totalorder %s4002_s30, 1  ;;  %vm623_vm0 = vcmask 523264   ;;  %v684_v33 = vlaneseq }
   0xe   : > { %s5872_s30 = smov (!%p467_p4, %s4002_s30), 1  ;;  %v4128_v36 = vshrl.u32 %v684_v33, 7 }
   0xf   : > { %s3629_s13 = sshll.u32 %s5872_s30, 7  ;;  %s3628_s17 = sshll.u32 %s5872_s30, 4 }
  0x10   : > { %s4088_s16 = scalar_lea.vmem %s5757_s1, %s3629_s13  ;;  %s4111_s20 = scalar_lea.vmem %s5756_s0, %s3628_s17  ;;  %3759 = vset.pattern.permute.xlu2 %v4128_v36  ;;  %3757 = vset.pattern.permute.xlu1 %v4128_v36  ;;  %vm701_vm1 = vcmp.ge.s32.totalorder %v4128_v36, 1  ;;  %vm726_vm2 = vcmp.ge.s32.totalorder %v4128_v36, 2  ;;  %vm751_vm3 = vcmp.ge.s32.totalorder %v4128_v36, 3 }
  0x11   : > { %v3280_v0 = vld [vmem:[%s4088_s16 + $0x60] sm:$0xf]  ;;  %v3649_v1 = vld [vmem:[%s4088_s16 + $0x6c] sm:$0xf0]  ;;  %v3647_v2 = vld [vmem:[%s4088_s16 + $0x64] sm:$0xf]  ;;  %3755 = vset.pattern.permute.xlu0 %v4128_v36  ;;  %s521_s18 = scalar_lea.vmem %s5765_s9, %s3628_s17 }
  0x12   : > { %v3281_v3 = vor.u32 %v3649_v1, %v3280_v0  ;;  %v3282_v4 = vld [vmem:[%s4088_s16 + $0x70] sm:$0xf0]  ;;  %v3264_v5 = vld [vmem:[%s4088_s16 + $0x40] sm:$0xf]  ;;  %v3645_v6 = vld [vmem:[%s4088_s16 + $0x4c] sm:$0xf0] }
  0x13   : > { %v3285_v7 = vor.u32 %v3647_v2, %v3282_v4  ;;  %v3643_v8 = vld [vmem:[%s4088_s16 + $0x44] sm:$0xf]  ;;  %v3266_v9 = vld [vmem:[%s4088_s16 + $0x50] sm:$0xf0]  ;;  %v3265_v10 = vor.u32 %v3645_v6, %v3264_v5  ;;  %v3248_v12 = vld [vmem:[%s4088_s16 + $0x20] sm:$0xf] }
  0x14   : > { %631 = vmatpush.bf16.msra.mxu2 %v3281_v3  ;;  %v3269_v11 = vor.u32 %v3643_v8, %v3266_v9  ;;  %v3641_v13 = vld [vmem:[%s4088_s16 + $0x2c] sm:$0xf0]  ;;  %v3639_v14 = vld [vmem:[%s4088_s16 + $0x24] sm:$0xf]  ;;  %v3250_v15 = vld [vmem:[%s4088_s16 + $0x30] sm:$0xf0] }
  0x15   : > { %645 = vmatpush.bf16.msra.mxu3 %v3285_v7  ;;  %v3249_v16 = vor.u32 %v3641_v13, %v3248_v12  ;;  %v3253_v17 = vor.u32 %v3639_v14, %v3250_v15  ;;  %v3232_v18 = vld [vmem:[%s4088_s16] sm:$0xf]  ;;  %v3637_v19 = vld [vmem:[%s4088_s16 + $0xc] sm:$0xf0]  ;;  %v3635_v20 = vld [vmem:[%s4088_s16 + $0x4] sm:$0xf] }
  0x16   : > { %v3234_v21 = vld [vmem:[%s4088_s16 + $0x10] sm:$0xf0]  ;;  %v3288_v22 = vld [vmem:[%s4088_s16 + $0x68] sm:$0xf]  ;;  %v3650_v23 = vld [vmem:[%s4088_s16 + $0x74] sm:$0xf0]  ;;  %v3233_v26 = vor.u32 %v3637_v19, %v3232_v18 }
  0x17   : > { %v3648_v24 = vld [vmem:[%s4088_s16 + $0x6c] sm:$0xf]  ;;  %v3290_v25 = vld [vmem:[%s4088_s16 + $0x78] sm:$0xf0]  ;;  %v524_v27 = vld [vmem:[%s4111_s20] sm:$0xff]  ;;  %v3237_v29 = vor.u32 %v3635_v20, %v3234_v21  ;;  %v3289_v30 = vor.u32 %v3650_v23, %v3288_v22  ;;  %s3630_s21 = sshll.u32 %s5872_s30, 3 }
  0x18   : > { %632 = vmatpush.bf16.msra.mxu2 %v3265_v10  ;;  %v525_v28 = vld [vmem:[%s4111_s20 + $0x8] sm:$0xff]  ;;  %v3293_v31 = vor.u32 %v3648_v24, %v3290_v25  ;;  %v3646_v35 = vld [vmem:[%s4088_s16 + $0x54] sm:$0xf0]  ;;  %v3274_v39 = vld [vmem:[%s4088_s16 + $0x58] sm:$0xf0]  ;;  %s3631_s22 = sshll.u32 %s5872_s30, 9  ;;  %s485_s25 = scalar_lea.vmem %s5758_s2, %s3630_s21 }
  0x19   : > { %646 = vmatpush.bf16.msra.mxu3 %v3269_v11  ;;  %v4120_v32 = vpack.c.bf16 %v525_v28, %v524_v27  ;;  %v3272_v34 = vld [vmem:[%s4088_s16 + $0x48] sm:$0xf]  ;;  %v3644_v38 = vld [vmem:[%s4088_s16 + $0x4c] sm:$0xf]  ;;  %v3642_v42 = vld [vmem:[%s4088_s16 + $0x34] sm:$0xf0]  ;;  %s4147_s28 = scalar_lea.vmem %s5760_s4, %s3631_s22 }
  0x1a   : > { %v3273_v37 = vor.u32 %v3646_v35, %v3272_v34  ;;  %v3256_v40 = vld [vmem:[%s4088_s16 + $0x28] sm:$0xf]  ;;  %v3277_v41 = vor.u32 %v3644_v38, %v3274_v39  ;;  %v3640_v43 = vld [vmem:[%s4088_s16 + $0x2c] sm:$0xf]  ;;  %v3258_v45 = vld [vmem:[%s4088_s16 + $0x38] sm:$0xf0] }
  0x1b   : > { %v3257_v44 = vor.u32 %v3642_v42, %v3256_v40  ;;  %v3261_v46 = vor.u32 %v3640_v43, %v3258_v45  ;;  %v4149_v47 = vld [vmem:[%s485_s25] sm:$0xff]  ;;  %v3240_v48 = vld [vmem:[%s4088_s16 + $0x8] sm:$0xf]  ;;  %v3638_v49 = vld [vmem:[%s4088_s16 + $0x14] sm:$0xf0]  ;;  %s4176_s29 = sshll.u32 %s5872_s30, 1 }
  0x1c   : > { %633 = vmatpush.bf16.msra.mxu2 %v3249_v16  ;;  %v3241_v50 = vor.u32 %v3638_v49, %v3240_v48  ;;  %v3636_v51 = vld [vmem:[%s4088_s16 + $0xc] sm:$0xf]  ;;  %v3242_v52 = vld [vmem:[%s4088_s16 + $0x18] sm:$0xf0]  ;;  %v3416_v53 = vld [vmem:[%s4147_s28 + $0xe0] sm:$0xf]  ;;  %s489_s16 = scalar_lea.vmem %s5759_s3, %s4176_s29  ;;  %s498_s21 = scalar_lea.vmem %s5761_s5, %s4176_s29 }
  0x1d   : > { %647 = vmatpush.bf16.msra.mxu3 %v3253_v17  ;;  %v3245_v54 = vor.u32 %v3636_v51, %v3242_v52  ;;  %v3681_v55 = vld [vmem:[%s4147_s28 + $0xec] sm:$0xf0]  ;;  %v3544_v56 = vld [vmem:[%s4147_s28 + $0x1e0] sm:$0xf]  ;;  %v3679_v60 = vld [vmem:[%s4147_s28 + $0xe4] sm:$0xf]  ;;  %s507_s15 = scalar_lea.vmem %s5763_s7, %s4176_s29 }
  0x1e   : > { %v3713_v57 = vld [vmem:[%s4147_s28 + $0x1ec] sm:$0xf0]  ;;  %v3417_v58 = vor.u32 %v3681_v55, %v3416_v53  ;;  %v3418_v61 = vld [vmem:[%s4147_s28 + $0xf0] sm:$0xf0]  ;;  %v3711_v62 = vld [vmem:[%s4147_s28 + $0x1e4] sm:$0xf] }
  0x1f   : > { %v3545_v59 = vor.u32 %v3713_v57, %v3544_v56  ;;  %v687_v63 = vperm.slane %v4149_v47, 3  ;;  %v688_v0 = vperm.slane %v4149_v47, 7  ;;  %v3421_v1 = vor.u32 %v3679_v60, %v3418_v61  ;;  %v3546_v2 = vld [vmem:[%s4147_s28 + $0x1f0] sm:$0xf0]  ;;  %v3400_v4 = vld [vmem:[%s4147_s28 + $0xc0] sm:$0xf] }
  0x20   : > { %634 = vmatpush.bf16.msra.mxu2 %v3233_v26  ;;  %1248 = vmatpush.bf16.msra.mxu0 %v3417_v58  ;;  %v3549_v3 = vor.u32 %v3711_v62, %v3546_v2  ;;  %v3677_v5 = vld [vmem:[%s4147_s28 + $0xcc] sm:$0xf0]  ;;  %v3528_v6 = vld [vmem:[%s4147_s28 + $0x1c0] sm:$0xf]  ;;  %v3675_v9 = vld [vmem:[%s4147_s28 + $0xc4] sm:$0xf] }
  0x21   : > { %648 = vmatpush.bf16.msra.mxu3 %v3237_v29  ;;  %1262 = vmatpush.bf16.msra.mxu1 %v3545_v59  ;;  %v3401_v7 = vor.u32 %v3677_v5, %v3400_v4  ;;  %v3709_v8 = vld [vmem:[%s4147_s28 + $0x1cc] sm:$0xf0]  ;;  %v3402_v10 = vld [vmem:[%s4147_s28 + $0xd0] sm:$0xf0]  ;;  %v3707_v13 = vld [vmem:[%s4147_s28 + $0x1c4] sm:$0xf] }
  0x22   : > { %v3529_v11 = vor.u32 %v3709_v8, %v3528_v6  ;;  %v3405_v12 = vor.u32 %v3675_v9, %v3402_v10  ;;  %v3530_v14 = vld [vmem:[%s4147_s28 + $0x1d0] sm:$0xf0]  ;;  %v4178_v15 = vperm.slane %v687_v63, 3  ;;  %v4180_v16 = vperm.slane %v688_v0, 3  ;;  %v3384_v18 = vld [vmem:[%s4147_s28 + $0xa0] sm:$0xf] }
  0x23   : > { %3294 = vmatmul.msk.bf16.vlgmr.msra.gmra.mxu2 %vm623_vm0, %v4120_v32  ;;  %v3533_v17 = vor.u32 %v3707_v13, %v3530_v14  ;;  %v3673_v19 = vld [vmem:[%s4147_s28 + $0xac] sm:$0xf0]  ;;  %v3512_v20 = vld [vmem:[%s4147_s28 + $0x1a0] sm:$0xf]  ;;  %v3671_v23 = vld [vmem:[%s4147_s28 + $0xa4] sm:$0xf] }
  0x24   : > { %659 = vmatpush.bf16.msrb.mxu2 %v3289_v30  ;;  %3295 = vmatmul.msk.bf16.vlgmr.msra.gmra.mxu3 %vm623_vm0, %v4120_v32  ;;  %v3385_v21 = vor.u32 %v3673_v19, %v3384_v18  ;;  %v3705_v22 = vld [vmem:[%s4147_s28 + $0x1ac] sm:$0xf0]  ;;  %v3386_v24 = vld [vmem:[%s4147_s28 + $0xb0] sm:$0xf0]  ;;  %v708_v25 = vperm.slane %v4149_v47, 2  ;;  %v733_v26 = vperm.slane %v4149_v47, 1 }
  0x25   : > { %673 = vmatpush.bf16.msrb.mxu3 %v3293_v31  ;;  %1249 = vmatpush.bf16.msra.mxu0 %v3401_v7  ;;  %v3513_v27 = vor.u32 %v3705_v22, %v3512_v20  ;;  %v3389_v28 = vor.u32 %v3671_v23, %v3386_v24  ;;  %v3703_v29 = vld [vmem:[%s4147_s28 + $0x1a4] sm:$0xf]  ;;  %v3514_v30 = vld [vmem:[%s4147_s28 + $0x1b0] sm:$0xf0]  ;;  %v758_v31 = vperm.slane %v4149_v47, 0  ;;  %v734_v33 = vperm.slane %v4149_v47, 5 }
  0x26   : > { %1263 = vmatpush.bf16.msra.mxu1 %v3529_v11  ;;  %v3517_v34 = vor.u32 %v3703_v29, %v3514_v30  ;;  %v3368_v35 = vld [vmem:[%s4147_s28 + $0x80] sm:$0xf]  ;;  %v3701_v40 = vld [vmem:[%s4147_s28 + $0x18c] sm:$0xf0]  ;;  %v3370_v42 = vld [vmem:[%s4147_s28 + $0x90] sm:$0xf0] }
  0x27   : > { %v3496_v38 = vld [vmem:[%s4147_s28 + $0x180] sm:$0xf]  ;;  %v759_v43 = vperm.slane %v4149_v47, 4  ;;  %v3498_v48 = vld [vmem:[%s4147_s28 + $0x190] sm:$0xf0]  ;;  %v4211_v49 = vperm.slane %v708_v25, 2 }
  0x28   : > { %660 = vmatpush.bf16.msrb.mxu2 %v3273_v37  ;;  %v3669_v37 = vld [vmem:[%s4147_s28 + $0x8c] sm:$0xf0]  ;;  %v4216_v51 = vld [vmem:[%s489_s16] sm:$0x3]  ;;  %v3663_v57 = vld [vmem:[%s4147_s28 + $0x64] sm:$0xf] }
  0x29   : > { %674 = vmatpush.bf16.msrb.mxu3 %v3277_v41  ;;  %1250 = vmatpush.bf16.msra.mxu0 %v3385_v21  ;;  %v3369_v39 = vor.u32 %v3669_v37, %v3368_v35  ;;  %v3667_v41 = vld [vmem:[%s4147_s28 + $0x84] sm:$0xf]  ;;  %v3665_v53 = vld [vmem:[%s4147_s28 + $0x6c] sm:$0xf0]  ;;  %v3354_v58 = vld [vmem:[%s4147_s28 + $0x70] sm:$0xf0] }
  0x2a   : > { %1264 = vmatpush.bf16.msra.mxu1 %v3513_v27  ;;  %v3373_v45 = vor.u32 %v3667_v41, %v3370_v42  ;;  %v3697_v56 = vld [vmem:[%s4147_s28 + $0x16c] sm:$0xf0]  ;;  %v4225_v59 = vperm.slane %v758_v31, 0  ;;  %v3357_v61 = vor.u32 %v3663_v57, %v3354_v58  ;;  %v3695_v62 = vld [vmem:[%s4147_s28 + $0x164] sm:$0xf]  ;;  %v4231_v2 = vperm.slane %v734_v33, 1 }
  0x2b   : > { %v3482_v63 = vld [vmem:[%s4147_s28 + $0x170] sm:$0xf0]  ;;  %v774_v8 = vperm.slane %v4216_v51, 0  ;;  %v3336_v10 = vld [vmem:[%s4147_s28 + $0x40] sm:$0xf]  ;;  %v775_v14 = vperm.slane %v4216_v51, 1 }
  0x2c   : > { %661 = vmatpush.bf16.msrb.mxu2 %v3257_v44  ;;  %v3497_v44 = vor.u32 %v3701_v40, %v3496_v38  ;;  %v3485_v4 = vor.u32 %v3695_v62, %v3482_v63  ;;  %v3464_v22 = vld [vmem:[%s4147_s28 + $0x140] sm:$0xf]  ;;  %v3693_v27 = vld [vmem:[%s4147_s28 + $0x14c] sm:$0xf0]  ;;  %v3338_v33 = vld [vmem:[%s4147_s28 + $0x50] sm:$0xf0] }
  0x2d   : > { %675 = vmatpush.bf16.msrb.mxu3 %v3261_v46  ;;  %v3699_v46 = vld [vmem:[%s4147_s28 + $0x184] sm:$0xf]  ;;  %1251 = vmatpush.bf16.msra.mxu0 %v3369_v39  ;;  %v3466_v39 = vld [vmem:[%s4147_s28 + $0x150] sm:$0xf0]  ;;  %v3320_v40 = vld [vmem:[%s4147_s28 + $0x20] sm:$0xf] }
  0x2e   : > { %v3501_v52 = vor.u32 %v3699_v46, %v3498_v48  ;;  %1265 = vmatpush.bf16.msra.mxu1 %v3497_v44  ;;  %v3657_v41 = vld [vmem:[%s4147_s28 + $0x2c] sm:$0xf0]  ;;  %v3448_v46 = vld [vmem:[%s4147_s28 + $0x120] sm:$0xf]  ;;  %v3704_v51 = vld [vmem:[%s4147_s28 + $0x1ac] sm:$0xf] }
  0x2f   : > { %v3689_v48 = vld [vmem:[%s4147_s28 + $0x12c] sm:$0xf0]  ;;  %s3632_s22 = sshll.u32 %s5872_s30, 5 }
  0x30   : > { %662 = vmatpush.bf16.msrb.mxu2 %v3241_v50  ;;  %v4214_v50 = vperm.slane %v733_v26, 1  ;;  %s4709_s25 = scalar_lea.vmem %s5762_s6, %s3632_s22 }
  0x31   : > { %676 = vmatpush.bf16.msrb.mxu3 %v3245_v54  ;;  %v3480_v54 = vld [vmem:[%s4147_s28 + $0x160] sm:$0xf] }
  0x32   : > { %v3481_v60 = vor.u32 %v3697_v56, %v3480_v54 }
  0x33   : > { %3296 = vmatmul.msk.bf16.vlgmr.msrb.gmra.mxu2 %vm623_vm0, %v4120_v32 }
  0x34   : > { %1276 = vmatpush.bf16.msra.mxu2 %v3421_v1  ;;  %3297 = vmatmul.msk.bf16.vlgmr.msrb.gmra.mxu3 %vm623_vm0, %v4120_v32  ;;  %v709_v32 = vperm.slane %v4149_v47, 6  ;;  %v3352_v47 = vld [vmem:[%s4147_s28 + $0x60] sm:$0xf] }
  0x35   : > { %1290 = vmatpush.bf16.msra.mxu3 %v3549_v3  ;;  %v3353_v55 = vor.u32 %v3665_v53, %v3352_v47  ;;  %v4233_v3 = vperm.slane %v759_v43, 0  ;;  %1266 = vmatpush.bf16.msra.mxu1 %v3481_v60 }
  0x36   : > { %v4229_v1 = vperm.slane %v709_v32, 2  ;;  %v3465_v32 = vor.u32 %v3693_v27, %v3464_v22  ;;  %v3685_v22 = vld [vmem:[%s4147_s28 + $0x10c] sm:$0xf0]  ;;  %v3683_v27 = vld [vmem:[%s4147_s28 + $0x104] sm:$0xf] }
  0x37   : > { %1252 = vmatpush.bf16.msra.mxu0 %v3353_v55  ;;  %v3449_v55 = vor.u32 %v3689_v48, %v3448_v46 }
  0x38   : > { %1277 = vmatpush.bf16.msra.mxu2 %v3405_v12 }
  0x39   : > { %1291 = vmatpush.bf16.msra.mxu3 %v3533_v17  ;;  %v3661_v17 = vld [vmem:[%s4147_s28 + $0x4c] sm:$0xf0]  ;;  %1267 = vmatpush.bf16.msra.mxu1 %v3465_v32 }
  0x3a   : > { %v3337_v21 = vor.u32 %v3661_v17, %v3336_v10 }
  0x3c   : > { %1278 = vmatpush.bf16.msra.mxu2 %v3389_v28  ;;  %v3659_v28 = vld [vmem:[%s4147_s28 + $0x44] sm:$0xf]  ;;  %1253 = vmatpush.bf16.msra.mxu0 %v3337_v21  ;;  %v3432_v21 = vld [vmem:[%s4147_s28 + $0x100] sm:$0xf] }
  0x3d   : > { %1292 = vmatpush.bf16.msra.mxu3 %v3517_v34  ;;  %v3691_v34 = vld [vmem:[%s4147_s28 + $0x144] sm:$0xf]  ;;  %v3341_v38 = vor.u32 %v3659_v28, %v3338_v33  ;;  %1268 = vmatpush.bf16.msra.mxu1 %v3449_v55  ;;  %v3434_v28 = vld [vmem:[%s4147_s28 + $0x110] sm:$0xf0]  ;;  %v3682_v33 = vld [vmem:[%s4147_s28 + $0xf4] sm:$0xf0]  ;;  %v3433_v46 = vor.u32 %v3685_v22, %v3432_v21 }
  0x3e   : > { %v3469_v44 = vor.u32 %v3691_v34, %v3466_v39  ;;  %v3552_v34 = vld [vmem:[%s4147_s28 + $0x1e8] sm:$0xf]  ;;  %v3437_v55 = vor.u32 %v3683_v27, %v3434_v28 }
  0x40   : > { %1279 = vmatpush.bf16.msra.mxu2 %v3373_v45  ;;  %v3321_v45 = vor.u32 %v3657_v41, %v3320_v40  ;;  %v3714_v40 = vld [vmem:[%s4147_s28 + $0x1f4] sm:$0xf0] }
  0x41   : > { %1293 = vmatpush.bf16.msra.mxu3 %v3501_v52  ;;  %1269 = vmatpush.bf16.msra.mxu1 %v3433_v46 }
  0x42   : > { %1254 = vmatpush.bf16.msra.mxu0 %v3321_v45  ;;  %v3712_v45 = vld [vmem:[%s4147_s28 + $0x1ec] sm:$0xf] }
  0x44   : > { %1280 = vmatpush.bf16.msra.mxu2 %v3357_v61 }
  0x45   : > { %1294 = vmatpush.bf16.msra.mxu3 %v3485_v4 }
  0x48   : > { %1281 = vmatpush.bf16.msra.mxu2 %v3341_v38 }
  0x49   : > { %1295 = vmatpush.bf16.msra.mxu3 %v3469_v44  ;;  %v3680_v44 = vld [vmem:[%s4147_s28 + $0xec] sm:$0xf] }
  0xa6   : > { %v636_v0 = vpop.f32.mrf.mxu2 }
  0xa7   : > { %v697_v5 = vrot.slane %v636_v0, 7  ;;  %v722_v6 = vrot.slane %v636_v0, 6  ;;  %v747_v7 = vrot.slane %v636_v0, 5  ;;  %v650_v9 = vpop.f32.mrf.mxu3  ;;  %v693_v18 = vmul.f32 %v4178_v15, %v636_v0 }
  0xa8   : > { %v698_v11 = vrot.slane %v650_v9, 7  ;;  %v723_v12 = vrot.slane %v650_v9, 6  ;;  %v748_v13 = vrot.slane %v650_v9, 5  ;;  %v694_v25 = vmul.f32 %v4180_v16, %v650_v9 }
  0xa9   : > { %v704_v19 = vsel %vm701_vm1, %v697_v5, 0.0  ;;  %v729_v20 = vsel %vm726_vm2, %v722_v6, 0.0  ;;  %v754_v24 = vsel %vm751_vm3, %v747_v7, 0.0  ;;  %v3655_v5 = vld [vmem:[%s4147_s28 + $0x24] sm:$0xf] }
  0xaa   : > { %v714_v23 = vmul.f32 %v4211_v49, %v704_v19  ;;  %v705_v26 = vsel %vm701_vm1, %v698_v11, 0.0  ;;  %v730_v30 = vsel %vm726_vm2, %v723_v12, 0.0  ;;  %v755_v31 = vsel %vm751_vm3, %v748_v13, 0.0  ;;  %v3322_v6 = vld [vmem:[%s4147_s28 + $0x30] sm:$0xf0] }
  0xab   : > { %v715_v29 = vmul.f32 %v4229_v1, %v705_v26  ;;  %v739_v37 = vmul.f32 %v4214_v50, %v729_v20  ;;  %v740_v43 = vmul.f32 %v4231_v2, %v730_v30  ;;  %v764_v47 = vmul.f32 %v4225_v59, %v754_v24  ;;  %v3687_v7 = vld [vmem:[%s4147_s28 + $0x124] sm:$0xf]  ;;  %v3653_v13 = vld [vmem:[%s4147_s28 + $0xc] sm:$0xf0]  ;;  %v3306_v24 = vld [vmem:[%s4147_s28 + $0x10] sm:$0xf0] }
  0xac   : > { %v718_v35 = vadd.f32 %v714_v23, %v693_v18  ;;  %v765_v53 = vmul.f32 %v4233_v3, %v755_v31  ;;  %v3651_v23 = vld [vmem:[%s4147_s28 + $0x4] sm:$0xf]  ;;  %v3325_v38 = vor.u32 %v3655_v5, %v3322_v6  ;;  %v3410_v6 = vld [vmem:[%s4147_s28 + $0xd8] sm:$0xf0] }
  0xad   : > { %v719_v42 = vadd.f32 %v715_v29, %v694_v25  ;;  %v3309_v48 = vor.u32 %v3651_v23, %v3306_v24 }
  0xae   : > { %v743_v52 = vadd.f32 %v739_v37, %v718_v35  ;;  %v638_v54 = vpop.f32.mrf.mxu2  ;;  %1282 = vmatpush.bf16.msra.mxu2 %v3325_v38  ;;  %v3506_v38 = vld [vmem:[%s4147_s28 + $0x198] sm:$0xf0] }
  0xaf   : > { %v744_v56 = vadd.f32 %v740_v43, %v719_v42  ;;  %v695_v57 = vmul.f32 %v4178_v15, %v638_v54  ;;  %v699_v58 = vrot.slane %v638_v54, 7  ;;  %v724_v60 = vrot.slane %v638_v54, 6  ;;  %v652_v61 = vpop.f32.mrf.mxu3  ;;  %v3450_v15 = vld [vmem:[%s4147_s28 + $0x130] sm:$0xf0] }
  0xb0   : > { %v768_v62 = vadd.f32 %v764_v47, %v743_v52  ;;  %v749_v63 = vrot.slane %v638_v54, 5  ;;  %v696_v0 = vmul.f32 %v4180_v16, %v652_v61  ;;  %v700_v4 = vrot.slane %v652_v61, 7  ;;  %v3304_v16 = vld [vmem:[%s4147_s28] sm:$0xf]  ;;  %v3554_v52 = vld [vmem:[%s4147_s28 + $0x1f8] sm:$0xf0] }
  0xb1   : > { %v769_v9 = vadd.f32 %v765_v53, %v744_v56  ;;  %v706_v10 = vsel %vm701_vm1, %v699_v58, 0.0  ;;  %v731_v11 = vsel %vm726_vm2, %v724_v60, 0.0  ;;  %v725_v12 = vrot.slane %v652_v61, 6  ;;  %v3408_v56 = vld [vmem:[%s4147_s28 + $0xc8] sm:$0xf] }
  0xb2   : > { %v4283_v17 = vadd.f32 %v774_v8, %v768_v62  ;;  %v716_v18 = vmul.f32 %v4211_v49, %v706_v10  ;;  %v741_v19 = vmul.f32 %v4214_v50, %v731_v11  ;;  %v756_v20 = vsel %vm751_vm3, %v749_v63, 0.0  ;;  %v3536_v63 = vld [vmem:[%s4147_s28 + $0x1c8] sm:$0xf]  ;;  %1283 = vmatpush.bf16.msra.mxu2 %v3309_v48  ;;  %v3674_v10 = vld [vmem:[%s4147_s28 + $0xb4] sm:$0xf0] }
  0xb3   : > { %v4295_v25 = vadd.f32 %v775_v14, %v769_v9  ;;  %v766_v26 = vmul.f32 %v4225_v59, %v756_v20  ;;  %v707_v49 = vsel %vm701_vm1, %v700_v4, 0.0  ;;  %v732_v50 = vsel %vm726_vm2, %v725_v12, 0.0  ;;  %v3424_v59 = vld [vmem:[%s4147_s28 + $0xe8] sm:$0xf]  ;;  %v3676_v4 = vld [vmem:[%s4147_s28 + $0xcc] sm:$0xf] }
  0xb4   : > { %v3298_v29 = vmul.f32 -1.442695, %v4283_v17  ;;  %v720_v30 = vadd.f32 %v716_v18, %v695_v57  ;;  %v717_v31 = vmul.f32 %v4229_v1, %v707_v49  ;;  %v742_v32 = vmul.f32 %v4231_v2, %v732_v50  ;;  %v3426_v1 = vld [vmem:[%s4147_s28 + $0xf8] sm:$0xf0]  ;;  %v3678_v57 = vld [vmem:[%s4147_s28 + $0xd4] sm:$0xf0] }
  0xb5   : > { %v3299_v35 = vmul.f32 -1.442695, %v4295_v25  ;;  %v750_v37 = vrot.slane %v652_v61, 5  ;;  %v3453_v39 = vor.u32 %v3687_v7, %v3450_v15  ;;  %v3305_v43 = vor.u32 %v3653_v13, %v3304_v16  ;;  %v3708_v7 = vld [vmem:[%s4147_s28 + $0x1cc] sm:$0xf] }
  0xb6   : > { %3806 = vpow2.f32 %v3298_v29  ;;  %v745_v41 = vadd.f32 %v741_v19, %v720_v30  ;;  %v721_v42 = vadd.f32 %v717_v31, %v696_v0  ;;  %v3425_v58 = vor.u32 %v3682_v33, %v3424_v59  ;;  %v3710_v0 = vld [vmem:[%s4147_s28 + $0x1d4] sm:$0xf0]  ;;  %v3538_v15 = vld [vmem:[%s4147_s28 + $0x1d8] sm:$0xf0]  ;;  %v3392_v9 = vld [vmem:[%s4147_s28 + $0xa8] sm:$0xf] }
  0xb7   : > { %3808 = vpow2.f32 %v3299_v35  ;;  %v757_v2 = vsel %vm751_vm3, %v750_v37, 0.0  ;;  %1296 = vmatpush.bf16.msra.mxu3 %v3453_v39  ;;  %1255 = vmatpush.bf16.msra.mxu0 %v3305_v43  ;;  %v3553_v60 = vor.u32 %v3714_v40, %v3552_v34  ;;  %v3429_v61 = vor.u32 %v3680_v44, %v3426_v1  ;;  %v3520_v11 = vld [vmem:[%s4147_s28 + $0x1a8] sm:$0xf]  ;;  %v3706_v19 = vld [vmem:[%s4147_s28 + $0x1b4] sm:$0xf0] }
  0xb8   : > { %v770_v47 = vadd.f32 %v766_v26, %v745_v41  ;;  %v746_v53 = vadd.f32 %v742_v32, %v721_v42  ;;  %v767_v54 = vmul.f32 %v4233_v3, %v757_v2  ;;  %v3557_v62 = vor.u32 %v3712_v45, %v3554_v52  ;;  %v3672_v20 = vld [vmem:[%s4147_s28 + $0xac] sm:$0xf]  ;;  %v3394_v26 = vld [vmem:[%s4147_s28 + $0xb8] sm:$0xf0]  ;;  %v3376_v29 = vld [vmem:[%s4147_s28 + $0x88] sm:$0xf] }
  0xb9   : > { %1318 = vmatpush.bf16.msrb.mxu1 %v3553_v60  ;;  %v3409_v13 = vor.u32 %v3678_v57, %v3408_v56  ;;  %v3537_v18 = vor.u32 %v3710_v0, %v3536_v63  ;;  %1332 = vmatpush.bf16.msrb.mxu2 %v3429_v61  ;;  %v3413_v23 = vor.u32 %v3676_v4, %v3410_v6  ;;  %v3522_v50 = vld [vmem:[%s4147_s28 + $0x1b8] sm:$0xf0]  ;;  %v3670_v30 = vld [vmem:[%s4147_s28 + $0x94] sm:$0xf0]  ;;  %v3504_v59 = vld [vmem:[%s4147_s28 + $0x188] sm:$0xf] }
  0xba   : > { %v4326_v3 = vadd.f32 %v774_v8, %v770_v47  ;;  %v771_v5 = vadd.f32 %v767_v54, %v746_v53  ;;  %v3541_v24 = vor.u32 %v3708_v7, %v3538_v15  ;;  %v3393_v27 = vor.u32 %v3674_v10, %v3392_v9  ;;  %v3702_v33 = vld [vmem:[%s4147_s28 + $0x194] sm:$0xf0]  ;;  %v3668_v34 = vld [vmem:[%s4147_s28 + $0x8c] sm:$0xf]  ;;  %v3378_v35 = vld [vmem:[%s4147_s28 + $0x98] sm:$0xf0] }
  0xbb   : > { %1297 = vmatpush.bf16.msra.mxu3 %v3437_v55  ;;  %1304 = vmatpush.bf16.msrb.mxu0 %v3425_v58  ;;  %v3521_v28 = vor.u32 %v3706_v19, %v3520_v11  ;;  %v3397_v31 = vor.u32 %v3672_v20, %v3394_v26  ;;  %v3525_v32 = vor.u32 %v3704_v51, %v3522_v50  ;;  %v3700_v37 = vld [vmem:[%s4147_s28 + $0x18c] sm:$0xf]  ;;  %v3360_v43 = vld [vmem:[%s4147_s28 + $0x68] sm:$0xf]  ;;  %v3666_v44 = vld [vmem:[%s4147_s28 + $0x74] sm:$0xf0] }
  0xbc   : > { %v3807_v12 = vpop.eup %3806  ;;  %v3300_v16 = vmul.f32 -1.442695, %v4326_v3  ;;  %v4337_v8 = vadd.f32 %v775_v14, %v771_v5  ;;  %v3377_v41 = vor.u32 %v3670_v30, %v3376_v29  ;;  %v3505_v42 = vor.u32 %v3702_v33, %v3504_v59  ;;  %v3488_v1 = vld [vmem:[%s4147_s28 + $0x168] sm:$0xf]  ;;  %v3698_v52 = vld [vmem:[%s4147_s28 + $0x174] sm:$0xf0] }
  0xbd   : > { %v3809_v21 = vpop.eup %3808  ;;  %v4341_v22 = vadd.f32 1.0, %v3807_v12  ;;  %1319 = vmatpush.bf16.msrb.mxu1 %v3537_v18  ;;  %1333 = vmatpush.bf16.msrb.mxu2 %v3413_v23  ;;  %v3381_v46 = vor.u32 %v3668_v34, %v3378_v35  ;;  %v3509_v48 = vor.u32 %v3700_v37, %v3506_v38  ;;  %v3664_v47 = vld [vmem:[%s4147_s28 + $0x6c] sm:$0xf]  ;;  %v3362_v55 = vld [vmem:[%s4147_s28 + $0x78] sm:$0xf0]  ;;  %v3489_v6 = vor.u32 %v3698_v52, %v3488_v1 }
  0xbe   : > { %v4345_v14 = vadd.f32 1.0, %v3809_v21  ;;  %3810 = vpow2.f32 %v3300_v16  ;;  %v3301_v49 = vmul.f32 -1.442695, %v4337_v8  ;;  %v3696_v56 = vld [vmem:[%s4147_s28 + $0x16c] sm:$0xf]  ;;  %v3365_v9 = vor.u32 %v3664_v47, %v3362_v55 }
  0xbf   : > { %1346 = vmatpush.bf16.msrb.mxu3 %v3557_v62  ;;  %3812 = vrcp.f32 %v4341_v22  ;;  %1305 = vmatpush.bf16.msrb.mxu0 %v3409_v13  ;;  %v807_v39 = vand.u32 2147483647, %v4341_v22  ;;  %v3490_v57 = vld [vmem:[%s4147_s28 + $0x178] sm:$0xf0]  ;;  %v809_v60 = vand.u32 2147483648, %v4341_v22  ;;  %v3361_v62 = vor.u32 %v3666_v44, %v3360_v43 }
  0xc0   : > { %3814 = vrcp.f32 %v4345_v14  ;;  %v822_v61 = vand.u32 2147483647, %v4345_v14  ;;  %v3344_v63 = vld [vmem:[%s4147_s28 + $0x48] sm:$0xf]  ;;  %v3662_v7 = vld [vmem:[%s4147_s28 + $0x54] sm:$0xf0]  ;;  %v3493_v10 = vor.u32 %v3696_v56, %v3490_v57  ;;  %vm803_vm6 = vweird.f32 %v4341_v22 }
  0xc1   : > { %3816 = vpow2.f32 %v3301_v49  ;;  %1320 = vmatpush.bf16.msrb.mxu1 %v3521_v28  ;;  %1334 = vmatpush.bf16.msrb.mxu2 %v3397_v31  ;;  %v3472_v15 = vld [vmem:[%s4147_s28 + $0x148] sm:$0xf]  ;;  %v3694_v11 = vld [vmem:[%s4147_s28 + $0x154] sm:$0xf0]  ;;  %v3660_v12 = vld [vmem:[%s4147_s28 + $0x4c] sm:$0xf]  ;;  %v3345_v51 = vor.u32 %v3662_v7, %v3344_v63  ;;  %vm818_vm11 = vweird.f32 %v4345_v14 }
  0xc2   : > { %v3346_v16 = vld [vmem:[%s4147_s28 + $0x58] sm:$0xf0]  ;;  %v824_v19 = vand.u32 2147483648, %v4345_v14  ;;  %v3692_v20 = vld [vmem:[%s4147_s28 + $0x14c] sm:$0xf]  ;;  %vm4394_vm4 = vcmp.eq.f32.partialorder %v807_v39, 8.507059e+37 }
  0xc3   : > { %1347 = vmatpush.bf16.msrb.mxu3 %v3541_v24  ;;  %1306 = vmatpush.bf16.msrb.mxu0 %v3393_v27  ;;  %v3474_v21 = vld [vmem:[%s4147_s28 + $0x158] sm:$0xf0]  ;;  %v810_v24 = vor.u32 1.1754944e-38, %v809_v60  ;;  %v3473_v27 = vor.u32 %v3694_v11, %v3472_v15  ;;  %v3328_v28 = vld [vmem:[%s4147_s28 + $0x28] sm:$0xf]  ;;  %v3349_v31 = vor.u32 %v3660_v12, %v3346_v16  ;;  %vm823_vm1 = vcmp.eq.f32.partialorder %v822_v61, 8.507059e+37 }
  0xc4   : > { %v3811_v40 = vpop.eup %3810  ;;  %v3658_v29 = vld [vmem:[%s4147_s28 + $0x34] sm:$0xf0]  ;;  %v3456_v59 = vld [vmem:[%s4147_s28 + $0x128] sm:$0xf]  ;;  %v3656_v34 = vld [vmem:[%s4147_s28 + $0x2c] sm:$0xf] }
  0xc5   : > { %v4363_v45 = vpop.eup %3812  ;;  %v4365_v2 = vadd.f32 1.0, %v3811_v40  ;;  %1321 = vmatpush.bf16.msrb.mxu1 %v3505_v42  ;;  %1335 = vmatpush.bf16.msrb.mxu2 %v3381_v46  ;;  %v3690_v33 = vld [vmem:[%s4147_s28 + $0x134] sm:$0xf0]  ;;  %v3330_v37 = vld [vmem:[%s4147_s28 + $0x38] sm:$0xf0] }
  0xc6   : > { %v4369_v53 = vpop.eup %3814  ;;  %v799_v54 = vmul.f32 %v4363_v45, %v4341_v22  ;;  %vm804_vm5 = vweird.f32 %v4363_v45  ;;  %v3688_v38 = vld [vmem:[%s4147_s28 + $0x12c] sm:$0xf]  ;;  %v3458_v39 = vld [vmem:[%s4147_s28 + $0x138] sm:$0xf0]  ;;  %v3329_v22 = vor.u32 %v3658_v29, %v3328_v28  ;;  %v3312_v52 = vld [vmem:[%s4147_s28 + $0x8] sm:$0xf]  ;;  %v3333_v55 = vor.u32 %v3656_v34, %v3330_v37 }
  0xc7   : > { %1348 = vmatpush.bf16.msrb.mxu3 %v3525_v32  ;;  %v3817_v58 = vpop.eup %3816  ;;  %3818 = vrcp.f32 %v4365_v2  ;;  %1307 = vmatpush.bf16.msrb.mxu0 %v3377_v41  ;;  %v814_v5 = vmul.f32 %v4369_v53, %v4345_v14  ;;  %v839_v26 = vand.u32 2147483648, %v4365_v2  ;;  %v3477_v32 = vor.u32 %v3692_v20, %v3474_v21  ;;  %vm4417_vm7 = vmor %vm803_vm6, %vm804_vm5  ;;  %v3654_v47 = vld [vmem:[%s4147_s28 + $0x14] sm:$0xf0]  ;;  %v3440_v57 = vld [vmem:[%s4147_s28 + $0x108] sm:$0xf] }
  0xc8   : > { %v4380_v0 = vadd.f32 1.0, %v3817_v58  ;;  %v800_v4 = vsub.f32 1.0, %v799_v54  ;;  %v837_v41 = vand.u32 2147483647, %v4365_v2  ;;  %vm819_vm8 = vweird.f32 %v4369_v53  ;;  %v3652_v58 = vld [vmem:[%s4147_s28 + $0xc] sm:$0xf] }
  0xc9   : > { %v815_v18 = vsub.f32 1.0, %v814_v5  ;;  %1322 = vmatpush.bf16.msrb.mxu1 %v3489_v6  ;;  %1336 = vmatpush.bf16.msrb.mxu2 %v3365_v9  ;;  %v840_v42 = vor.u32 1.1754944e-38, %v839_v26  ;;  %v3461_v56 = vor.u32 %v3688_v38, %v3458_v39  ;;  %vm833_vm9 = vweird.f32 %v4365_v2  ;;  %v3684_v63 = vld [vmem:[%s4147_s28 + $0x10c] sm:$0xf]  ;;  %vm4447_vm12 = vmor %vm818_vm11, %vm819_vm8  ;;  %v1360_v28 = vld [vmem:[%s498_s21] sm:$0x3] }
  0xca   : > { %3820 = vrcp.f32 %v4380_v0  ;;  %v801_v13 = vmul.f32 %v4363_v45, %v800_v4  ;;  %v3442_v4 = vld [vmem:[%s4147_s28 + $0x118] sm:$0xf0]  ;;  %v852_v15 = vand.u32 2147483647, %v4380_v0  ;;  %v3313_v9 = vor.u32 %v3654_v47, %v3312_v52 }
  0xcb   : > { %1349 = vmatpush.bf16.msrb.mxu3 %v3509_v48  ;;  %v816_v50 = vmul.f32 %v4369_v53, %v815_v18  ;;  %1308 = vmatpush.bf16.msrb.mxu0 %v3361_v62  ;;  %v3457_v48 = vor.u32 %v3690_v33, %v3456_v59  ;;  %v3314_v62 = vld [vmem:[%s4147_s28 + $0x18] sm:$0xf0]  ;;  %v854_v12 = vand.u32 2147483648, %v4380_v0  ;;  %v3445_v20 = vor.u32 %v3684_v63, %v3442_v4 }
  0xcc   : > { %v802_v49 = vadd.f32 %v4363_v45, %v801_v13  ;;  %v3317_v18 = vor.u32 %v3652_v58, %v3314_v62  ;;  %vm838_vm15 = vcmp.eq.f32.partialorder %v837_v41, 8.507059e+37  ;;  %v825_v21 = vor.u32 1.1754944e-38, %v824_v19 }
  0xcd   : > { %v4404_v30 = vpop.eup %3818  ;;  %v817_v46 = vadd.f32 %v4369_v53, %v816_v50  ;;  %1323 = vmatpush.bf16.msrb.mxu1 %v3473_v27  ;;  %1337 = vmatpush.bf16.msrb.mxu2 %v3349_v31  ;;  %vm848_vm2 = vweird.f32 %v4380_v0  ;;  %v4489_v50 = vpop.f32.mrf.mxu2  ;;  %vm1440_vm8 = vcmask 1040384   ;;  %vm1448_vm11 = vcmask 1043459  }
  0xce   : > { %v829_v35 = vmul.f32 %v4404_v30, %v4365_v2  ;;  %v806_v44 = vsel %vm4417_vm7, %v4363_v45, %v802_v49  ;;  %v3686_v45 = vld [vmem:[%s4147_s28 + $0x114] sm:$0xf0]  ;;  %vm834_vm10 = vweird.f32 %v4404_v30  ;;  %v855_v49 = vor.u32 1.1754944e-38, %v854_v12  ;;  %5796 = vst [vmem:[#allocation6_spill] sm:$0xff] %v4489_v50  ;;  %v4491_v27 = vpop.f32.mrf.mxu3  ;;  %s5529_s28 = scalar_lea.vmem %s5764_s8, %s3629_s13 }
  0xcf   : > { %1350 = vmatpush.bf16.msrb.mxu3 %v3493_v10  ;;  %1309 = vmatpush.bf16.msrb.mxu0 %v3345_v51  ;;  %v811_v5 = vsel %vm4394_vm4, %v810_v24, %v806_v44  ;;  %v821_v11 = vsel %vm4447_vm12, %v4369_v53, %v817_v46  ;;  %v3441_v16 = vor.u32 %v3686_v45, %v3440_v57  ;;  %vm835_vm13 = vmor %vm833_vm9, %vm834_vm10  ;;  %vm853_vm4 = vcmp.eq.f32.partialorder %v852_v15, 8.507059e+37 }
  0xd0   : > { %v4423_v43 = vpop.eup %3820  ;;  %v830_v1 = vsub.f32 1.0, %v829_v35  ;;  %v4471_v24 = vmul.f32 %v811_v5, %v4283_v17  ;;  %v826_v51 = vsel %vm823_vm1, %v825_v21, %v821_v11  ;;  %5797 = vst [vmem:[#allocation7_spill] sm:$0xff] %v4491_v27  ;;  %v1363_v35 = vperm.slane %v1360_v28, 1 }
  0xd1   : > { %v844_v54 = vmul.f32 %v4423_v43, %v4380_v0  ;;  %1324 = vmatpush.bf16.msrb.mxu1 %v3457_v48  ;;  %vm849_vm14 = vweird.f32 %v4423_v43  ;;  %1338 = vmatpush.bf16.msrb.mxu2 %v3333_v55  ;;  %vm1442_vm7 = vcmask 1041409   ;;  %vm1454_vm9 = vcmask 1045509  }
  0xd2   : > { %v831_v60 = vmul.f32 %v4404_v30, %v830_v1  ;;  %5792 = vst [vmem:[#allocation2_spill] sm:$0xff] %v4471_v24  ;;  %vm850_vm3 = vmor %vm848_vm2, %vm849_vm14  ;;  %vm1445_vm10 = vcmask 1042434   ;;  %vm1457_vm14 = vcmask 1046534   ;;  %vm1460_vm1 = vcmask 1046528  }
  0xd3   : > { %1351 = vmatpush.bf16.msrb.mxu3 %v3477_v32  ;;  %v845_v7 = vsub.f32 1.0, %v844_v54  ;;  %1310 = vmatpush.bf16.msrb.mxu0 %v3329_v22  ;;  %vm2738_vm2 = vcmask 1041408  }
  0xd4   : > { %v832_v10 = vadd.f32 %v4404_v30, %v831_v60 }
  0xd5   : > { %v846_v13 = vmul.f32 %v4423_v43, %v845_v7  ;;  %1325 = vmatpush.bf16.msrb.mxu1 %v3441_v16  ;;  %1339 = vmatpush.bf16.msrb.mxu2 %v3317_v18 }
  0xd6   : > { %v836_v53 = vsel %vm835_vm13, %v4404_v30, %v832_v10  ;;  %v1362_v30 = vperm.slane %v1360_v28, 0 }
  0xd7   : > { %1352 = vmatpush.bf16.msrb.mxu3 %v3461_v56  ;;  %v841_v23 = vsel %vm838_vm15, %v840_v42, %v836_v53  ;;  %v847_v2 = vadd.f32 %v4423_v43, %v846_v13  ;;  %1311 = vmatpush.bf16.msrb.mxu0 %v3313_v9  ;;  %vm1451_vm15 = vcmask 1044484  }
  0xd8   : > { %v4474_v26 = vmul.f32 %v841_v23, %v4326_v3  ;;  %v4482_v3 = vmul.f32 %v826_v51, %v4295_v25  ;;  %v4493_v25 = vpop.f32.mrf.mxu2 }
  0xd9   : > { %v851_v14 = vsel %vm850_vm3, %v4423_v43, %v847_v2  ;;  %5798 = vst [vmem:[#allocation8_spill] sm:$0xff] %v4493_v25  ;;  %vm2743_vm3 = vcmask 1042432  }
  0xda   : > { %5793 = vst [vmem:[#allocation3_spill] sm:$0xff] %v4474_v26  ;;  %v862_v61 = vpack.c.bf16 %v4474_v26, %v4471_v24  ;;  %v856_v17 = vsel %vm853_vm4, %v855_v49, %v851_v14  ;;  %vm2748_vm4 = vcmask 1043456  }
  0xdb   : > { %1353 = vmatpush.bf16.msrb.mxu3 %v3445_v20  ;;  %5794 = vst [vmem:[#allocation4_spill] sm:$0xff] %v4482_v3  ;;  %v4485_v0 = vmul.f32 %v856_v17, %v4337_v8  ;;  %v4499_v8 = vpop.f32.mrf.mxu3  ;;  %v4521_v20 = vadd.s32 8, %v4128_v36 }
  0xdc   : > { %1256 = vmatmul.bf16.vlgmr.msra.gmra.mxu0 %v862_v61  ;;  %1284 = vmatmul.bf16.vlgmr.msra.gmra.mxu2 %v862_v61  ;;  %5799 = vst [vmem:[#allocation9_spill] sm:$0xff] %v4499_v8 }
  0xdd   : > { %5795 = vst [vmem:[#allocation5_spill] sm:$0xff] %v4485_v0  ;;  %v863_v19 = vpack.c.bf16 %v4485_v0, %v4482_v3 }
  0xdf   : > { %1270 = vmatmul.bf16.vlgmr.msra.gmra.mxu1 %v863_v19  ;;  %1298 = vmatmul.bf16.vlgmr.msra.gmra.mxu3 %v863_v19 }
  0xec   : > { %1312 = vmatmul.bf16.vlgmr.msrb.gmra.mxu0 %v862_v61  ;;  %1340 = vmatmul.bf16.vlgmr.msrb.gmra.mxu2 %v862_v61 }
  0xef   : > { %1326 = vmatmul.bf16.vlgmr.msrb.gmra.mxu1 %v863_v19  ;;  %1354 = vmatmul.bf16.vlgmr.msrb.gmra.mxu3 %v863_v19 }
 0x159   : > { %v1257_v29 = vpop.f32.mrf.mxu0 }
 0x15c   : > { %v1271_v31 = vpop.f32.mrf.mxu1 }
 0x15d   : > { %v1272_v32 = vadd.f32 %v1271_v31, %v1257_v29 }
 0x15f   : > { %v4501_v59 = vadd.f32 %v1362_v30, %v1272_v32  ;;  %v1285_v33 = vpop.f32.mrf.mxu2 }
 0x161   : > { %v1374_v34 = vand.u32 2147483647, %v4501_v59  ;;  %v1259_v37 = vpop.f32.mrf.mxu0 }
 0x162   : > { %v1299_v38 = vpop.f32.mrf.mxu3 }
 0x163   : > { %v1378_v39 = vsub.f32 0.0, %v1374_v34  ;;  %v1300_v40 = vadd.f32 %v1299_v38, %v1285_v33 }
 0x164   : > { %v1273_v41 = vpop.f32.mrf.mxu1 }
 0x165   : > { %v1382_v42 = vmul.f32 1.442695, %v1378_v39  ;;  %v4504_v22 = vadd.f32 %v1363_v35, %v1300_v40  ;;  %v1274_v43 = vadd.f32 %v1273_v41, %v1259_v37 }
 0x167   : > { %3822 = vpow2.f32 %v1382_v42  ;;  %v1375_v44 = vand.u32 2147483647, %v4504_v22  ;;  %v4507_v1 = vadd.f32 %v1362_v30, %v1274_v43  ;;  %v1287_v46 = vpop.f32.mrf.mxu2  ;;  %v1370_v30 = vmax.f32 %v4501_v59, 0.0 }
 0x168   : > { %v1371_v34 = vmax.f32 %v4504_v22, 0.0 }
 0x169   : > { %v1379_v48 = vsub.f32 0.0, %v1375_v44  ;;  %v1376_v52 = vand.u32 2147483647, %v4507_v1  ;;  %v1313_v54 = vpop.f32.mrf.mxu0 }
 0x16a   : > { %v1301_v47 = vpop.f32.mrf.mxu3 }
 0x16b   : > { %v1384_v55 = vmul.f32 1.442695, %v1379_v48  ;;  %v1380_v56 = vsub.f32 0.0, %v1376_v52  ;;  %v1302_v57 = vadd.f32 %v1301_v47, %v1287_v46 }
 0x16c   : > { %v1327_v45 = vpop.f32.mrf.mxu1 }
 0x16d   : > { %v3823_v58 = vpop.eup %3822  ;;  %3824 = vpow2.f32 %v1384_v55  ;;  %v1386_v60 = vmul.f32 1.442695, %v1380_v56  ;;  %v4510_v62 = vadd.f32 %v1363_v35, %v1302_v57  ;;  %v4512_v63 = vadd.f32 %v1327_v45, %v1313_v54 }
 0x16e   : > { %v1390_v4 = vadd.f32 1.0, %v3823_v58  ;;  %v1393_v10 = vmul.f32 -0.5, %v3823_v58  ;;  %v1396_v23 = vand.u32 2147483647, %v3823_v58 }
 0x16f   : > { %3826 = vpow2.f32 %v1386_v60  ;;  %v1377_v5 = vand.u32 2147483647, %v4510_v62  ;;  %v1800_v6 = vperm.slane %v4512_v63, 2  ;;  %v1787_v7 = vperm.slane %v4512_v63, 1 }
 0x170   : > { %3828 = vlog2.f32 %v1390_v4  ;;  %v1774_v9 = vperm.slane %v4512_v63, 0  ;;  %v1394_v21 = vadd.f32 1.0, %v1393_v10  ;;  %vm1397_vm5 = vcmp.lt.f32.partialorder %v1396_v23, 0.0004427343 }
 0x171   : > { %v1381_v15 = vsub.f32 0.0, %v1377_v5  ;;  %1805 = vperm.xlu2 %3759, %v1800_v6   ;;  %1792 = vperm.xlu1 %3757, %v1787_v7   ;;  %v1373_v46 = vmax.f32 %v4510_v62, 0.0 }
 0x172   : > { %1779 = vperm.xlu0 %3755, %v1774_v9   ;;  %v1395_v14 = vmul.f32 %v3823_v58, %v1394_v21 }
 0x173   : > { %v3825_v11 = vpop.eup %3824  ;;  %v1388_v12 = vmul.f32 1.442695, %v1381_v15  ;;  %v1813_v15 = vperm.slane %v4512_v63, 3 }
 0x174   : > { %v1399_v16 = vadd.f32 1.0, %v3825_v11  ;;  %v1402_v18 = vmul.f32 -0.5, %v3825_v11  ;;  %v1405_v61 = vand.u32 2147483647, %v3825_v11 }
 0x175   : > { %v4518_v13 = vpop.eup %3826  ;;  %3830 = vpow2.f32 %v1388_v12 }
 0x176   : > { %v3829_v53 = vpop.eup %3828  ;;  %3832 = vlog2.f32 %v1399_v16  ;;  %v1408_v51 = vadd.f32 1.0, %v4518_v13  ;;  %v1403_v49 = vadd.f32 1.0, %v1402_v18  ;;  %vm1406_vm6 = vcmp.lt.f32.partialorder %v1405_v61, 0.0004427343 }
 0x177   : > { %v1392_v2 = vmul.f32 0.6931472, %v3829_v53  ;;  %v1411_v38 = vmul.f32 -0.5, %v4518_v13  ;;  %v1414_v44 = vand.u32 2147483647, %v4518_v13  ;;  %v1826_v53 = vperm.slane %v4512_v63, 4 }
 0x178   : > { %3834 = vlog2.f32 %v1408_v51  ;;  %v1404_v32 = vmul.f32 %v3825_v11, %v1403_v49  ;;  %v1372_v11 = vmax.f32 %v4507_v1, 0.0  ;;  %v1839_v51 = vperm.slane %v4512_v63, 5 }
 0x179   : > { %3760 = vset.pattern.permute.xlu2 %v4521_v20  ;;  %3758 = vset.pattern.permute.xlu1 %v4521_v20  ;;  %v1398_v28 = vsel %vm1397_vm5, %v1395_v14, %v1392_v2  ;;  %v1412_v22 = vadd.f32 1.0, %v1411_v38  ;;  %vm1415_vm13 = vcmp.lt.f32.partialorder %v1414_v44, 0.0004427343  ;;  %vm2753_vm5 = vcmask 1044480  }
 0x17a   : > { %3756 = vset.pattern.permute.xlu0 %v4521_v20  ;;  %v4529_v35 = vadd.f32 %v1398_v28, %v1370_v30  ;;  %v1852_v28 = vperm.slane %v4512_v63, 6 }
 0x17b   : > { %v3831_v17 = vpop.eup %3830 }
 0x17c   : > { %v3833_v19 = vpop.eup %3832  ;;  %v1417_v29 = vadd.f32 1.0, %v3831_v17  ;;  %v1420_v33 = vmul.f32 -0.5, %v3831_v17  ;;  %v1423_v41 = vand.u32 2147483647, %v3831_v17  ;;  %v1734_v48 = vmul.f32 %v4529_v35, %v4471_v24 }
 0x17d   : > { %v1401_v31 = vmul.f32 0.6931472, %v3833_v19 }
 0x17e   : > { %3836 = vlog2.f32 %v1417_v29  ;;  %v1421_v40 = vadd.f32 1.0, %v1420_v33  ;;  %v3835_v59 = vpop.eup %3834  ;;  %vm1424_vm12 = vcmp.lt.f32.partialorder %v1423_v41, 0.0004427343  ;;  %v1355_v33 = vpop.f32.mrf.mxu3  ;;  %v1865_v41 = vperm.slane %v4512_v63, 7 }
 0x17f   : > { %v1407_v37 = vsel %vm1406_vm6, %v1404_v32, %v1401_v31  ;;  %v1410_v57 = vmul.f32 0.6931472, %v3835_v59  ;;  %v1341_v32 = vpop.f32.mrf.mxu2  ;;  %vm2758_vm6 = vcmask 1045504  }
 0x180   : > { %v1427_v39 = vadd.f32 %v1407_v37, %v1371_v34  ;;  %v1422_v58 = vmul.f32 %v3831_v17, %v1421_v40  ;;  %v4647_v40 = vadd.f32 %v1355_v33, %v1341_v32 }
 0x181   : > { %1811 = vperm.xlu2 %3760, %v1800_v6   ;;  %1798 = vperm.xlu1 %3758, %v1787_v7   ;;  %v1413_v6 = vmul.f32 %v4518_v13, %v1412_v22 }
 0x182   : > { %v4532_v42 = vrot.slane %v1427_v39, 7  ;;  %v1735_v43 = vmul.f32 %v1427_v39, %v4482_v3  ;;  %1785 = vperm.xlu0 %3756, %v1774_v9   ;;  %v5767_v22 = vperm.slane %v4647_v40, 2 }
 0x183   : > { %v1416_v10 = vsel %vm1415_vm13, %v1413_v6, %v1410_v57 }
 0x184   : > { %v3837_v52 = vpop.eup %3836  ;;  %v1742_v47 = vrot.slane %v1735_v43, 7  ;;  %v4542_v54 = vsel %vm1440_vm8, %v4529_v35, %v4532_v42  ;;  %v4547_v55 = vsel %vm1442_vm7, %v4529_v35, %v4532_v42  ;;  %v4552_v56 = vsel %vm1454_vm9, %v4529_v35, %v4532_v42 }
 0x185   : > { %v1419_v45 = vmul.f32 0.6931472, %v3837_v52  ;;  %v4573_v16 = vadd.f32 %v1416_v10, %v1372_v11  ;;  %v4586_v1 = vsel %vm1445_vm10, %v4529_v35, %v4532_v42  ;;  %v4593_v21 = vsel %vm1457_vm14, %v4529_v35, %v4532_v42 }
 0x186   : > { %v4555_v60 = vsel %vm1445_vm10, %v1734_v48, %v1742_v47  ;;  %v4558_v62 = vsel %vm1448_vm11, %v1734_v48, %v1742_v47  ;;  %v4561_v4 = vsel %vm1442_vm7, %v1734_v48, %v1742_v47  ;;  %v4564_v5 = vsel %vm1440_vm8, %v1734_v48, %v1742_v47 }
 0x187   : > { %v1425_v7 = vsel %vm1424_vm12, %v1422_v58, %v1419_v45  ;;  %v4581_v18 = vsel %vm1454_vm9, %v1734_v48, %v1742_v47  ;;  %v4601_v2 = vsel %vm1457_vm14, %v1734_v48, %v1742_v47  ;;  %v4607_v49 = vsel %vm1448_vm11, %v4529_v35, %v4532_v42 }
 0x188   : > { %v1429_v9 = vadd.f32 %v1425_v7, %v1373_v46  ;;  %v4612_v14 = vsel %vm1451_vm15, %v4529_v35, %v4532_v42  ;;  %v4622_v17 = vsel %vm1451_vm15, %v1734_v48, %v1742_v47  ;;  %v4625_v19 = vsel %vm1460_vm1, %v1742_v47, %v1734_v48 }
 0x189   : > { %1824 = vperm.xlu2 %3760, %v1813_v15   ;;  %3761 = vset.pattern.permute.xlu1 %v4128_v36  ;;  %v1736_v31 = vmul.f32 %v4573_v16, %v4474_v26  ;;  %v4642_v38 = vsel %vm1460_vm1, %v4532_v42, %v4529_v35  ;;  %v5766_v46 = vperm.slane %v4647_v40, 4  ;;  %v2126_v52 = vperm.slane %v4647_v40, 0 }
 0x18a   : > { %v4569_v12 = vrot.slane %v1429_v9, 7  ;;  %3762 = vset.pattern.permute.xlu0 %v4128_v36  ;;  %v1737_v29 = vmul.f32 %v1429_v9, %v4485_v0  ;;  %v1748_v45 = vrot.slane %v4555_v60, 2  ;;  %v5768_v58 = vperm.slane %v4647_v40, 5  ;;  %v4782_v0 = vld [vmem:[%s4709_s25 + $0x18] sm:$0xff] }
 0x18b   : > { %v2204_v11 = vperm.slane %v4647_v40, 1  ;;  %v1444_v32 = vrot.slane %v4547_v55, 1 }
 0x18c   : > { %v4578_v13 = vsel %vm1454_vm9, %v4573_v16, %v4569_v12  ;;  %v4598_v23 = vsel %vm1457_vm14, %v4573_v16, %v4569_v12  ;;  %v4618_v61 = vsel %vm1451_vm15, %v4573_v16, %v4569_v12  ;;  %v1743_v30 = vrot.slane %v1737_v29, 7  ;;  %v4723_v29 = vld [vmem:[%s4709_s25 + $0x8] sm:$0xff] }
 0x18d   : > { %5800 = vst [vmem:[#allocation10_spill] sm:$0xff] %v4578_v13  ;;  %v4666_v63 = vsel %vm1440_vm8, %v4573_v16, %v4569_v12  ;;  %v4671_v42 = vsel %vm1442_vm7, %v4573_v16, %v4569_v12  ;;  %v4676_v44 = vsel %vm1445_vm10, %v4573_v16, %v4569_v12  ;;  %v4692_v57 = vsel %vm1448_vm11, %v4573_v16, %v4569_v12 }
 0x18e   : > { %5801 = vst [vmem:[#allocation11_spill] sm:$0xff] %v4598_v23  ;;  %v4633_v34 = vsel %vm1442_vm7, %v1736_v31, %v1743_v30  ;;  %v4636_v37 = vsel %vm1448_vm11, %v1736_v31, %v1743_v30  ;;  %v4645_v39 = vsel %vm1457_vm14, %v1736_v31, %v1743_v30  ;;  %v4651_v59 = vsel %vm1440_vm8, %v1736_v31, %v1743_v30 }
 0x18f   : > { %5802 = vst [vmem:[#allocation12_spill] sm:$0xff] %v4618_v61  ;;  %v4654_v43 = vsel %vm1460_vm1, %v1743_v30, %v1736_v31  ;;  %v4659_v35 = vsel %vm1445_vm10, %v1736_v31, %v1743_v30  ;;  %v4681_v48 = vsel %vm1451_vm15, %v1736_v31, %v1743_v30  ;;  %v4687_v47 = vsel %vm1454_vm9, %v1736_v31, %v1743_v30  ;;  %v1315_v30 = vpop.f32.mrf.mxu0  ;;  %v1329_v31 = vpop.f32.mrf.mxu1 }
 0x190   : > { %5803 = vst [vmem:[#allocation13_spill] sm:$0xff] %v4633_v34  ;;  %v1986_v6 = vperm.slane %v1748_v45, 0  ;;  %v1987_v7 = vperm.slane %v1748_v45, 1  ;;  %v4714_v60 = vsel %vm1460_vm1, %v4569_v12, %v4573_v16  ;;  %v4732_v33 = vadd.f32 %v1329_v31, %v1315_v30 }
 0x191   : > { %3764 = vset.pattern.permute.xlu2 %v4128_v36  ;;  %1818 = vperm.xlu1 %3761, %v1813_v15   ;;  %5804 = vst [vmem:[#allocation14_spill] sm:$0xff] %v4636_v37  ;;  %v5769_v45 = vperm.slane %v4647_v40, 3  ;;  %v5816_v23 = vperm.slane %v4564_v5, 1 }
 0x192   : > { %1831 = vperm.xlu0 %3762, %v1826_v53   ;;  %5805 = vst [vmem:[#allocation15_spill] sm:$0xff] %v4645_v39 }
 0x193   : > { %5806 = vst [vmem:[#allocation16_spill] sm:$0xff] %v4651_v59 }
 0x194   : > { %5807 = vst [vmem:[#allocation17_spill] sm:$0xff] %v4654_v43 }
 0x195   : > { %5808 = vst [vmem:[#allocation18_spill] sm:$0xff] %v4659_v35 }
 0x196   : > { %5809 = vst [vmem:[#allocation19_spill] sm:$0xff] %v4676_v44 }
 0x197   : > { %5810 = vst [vmem:[#allocation20_spill] sm:$0xff] %v4681_v48 }
 0x198   : > { %5811 = vst [vmem:[#allocation21_spill] sm:$0xff] %v4687_v47 }
 0x199   : > { %1844 = vperm.xlu2 %3764, %v1839_v51   ;;  %3763 = vset.pattern.permute.xlu1 %v4521_v20  ;;  %5812 = vst [vmem:[#allocation22_spill] sm:$0xff] %v4692_v57 }
 0x19a   : > { %3765 = vset.pattern.permute.xlu0 %v4521_v20  ;;  %5813 = vst [vmem:[#allocation23_spill] sm:$0xff] %v4714_v60 }
 0x1a1   : > { %1857 = vperm.xlu2 %3764, %v1852_v28   ;;  %1837 = vperm.xlu1 %3763, %v1826_v53   ;;  %v1478_v53 = vperm.slane %v4542_v54, 0 }
 0x1a2   : > { %1863 = vperm.xlu0 %3765, %v1852_v28   ;;  %v5770_v28 = vperm.slane %v4542_v54, 1 }
 0x1a4   : > { %v1543_v16 = vmul.f32 %v5770_v28, %v4723_v29  ;;  %v4761_v28 = vld [vmem:[%s4709_s25 + $0x10] sm:$0xff] }
 0x1a6   : > { %v1608_v55 = vmul.f32 1.442695, %v1543_v16 }
 0x1a9   : > { %3767 = vset.pattern.permute.xlu2 %v4521_v20  ;;  %1850 = vperm.xlu1 %3763, %v1839_v51   ;;  %v4719_v51 = vld [vmem:[%s4709_s25] sm:$0xff] }
 0x1aa   : > { %3772 = vset.pattern.permute.xlu0 %v4128_v36  ;;  %v1542_v12 = vmul.f32 %v1478_v53, %v4719_v51 }
 0x1b1   : > { %1876 = vperm.xlu2 %3767, %v1865_v41   ;;  %3766 = vset.pattern.permute.xlu1 %v4128_v36 }
 0x1b2   : > { %2287 = vperm.xlu0 %3772, %v5767_v22   ;;  %v5771_v22 = vperm.slane %v4732_v33, 1 }
 0x1b9   : > { %3768 = vset.pattern.permute.xlu2 %v4128_v36  ;;  %1870 = vperm.xlu1 %3766, %v1865_v41   ;;  %v4734_v41 = vperm.slane %v1444_v32, 0 }
 0x1ba   : > { %2443 = vperm.xlu0 %3772, %v5766_v46   ;;  %v1606_v46 = vmul.f32 1.442695, %v1542_v12 }
 0x1bb   : > { %v1546_v30 = vmul.f32 %v4734_v41, %v4719_v51 }
 0x1bc   : > { %3838 = vpow2.f32 %v1606_v46 }
 0x1bd   : > { %3840 = vpow2.f32 %v1608_v55 }
 0x1c1   : > { %2131 = vperm.xlu2 %3768, %v2126_v52   ;;  %3769 = vset.pattern.permute.xlu1 %v4521_v20 }
 0x1c2   : > { %3777 = vset.pattern.permute.xlu0 %v4521_v20 }
 0x1c9   : > { %3771 = vset.pattern.permute.xlu2 %v4521_v20  ;;  %2137 = vperm.xlu1 %3769, %v2126_v52   ;;  %v1447_v52 = vrot.slane %v4586_v1, 2  ;;  %v1450_v1 = vrot.slane %v4607_v49, 3  ;;  %v1746_v49 = vrot.slane %v4561_v4, 1 }
 0x1ca   : > { %2527 = vperm.xlu0 %3777, %v5768_v58  }
 0x1cb   : > { %v1806_v15 = vpop.permute.xlu2 %1805  ;;  %v4745_v31 = vperm.slane %v1447_v52, 0  ;;  %v4752_v16 = vperm.slane %v1447_v52, 1  ;;  %v4763_v3 = vperm.slane %v1450_v1, 0  ;;  %v4767_v24 = vperm.slane %v1450_v1, 1 }
 0x1cc   : > { %v4702_v9 = vmul.f32 %v1986_v6, %v1806_v15  ;;  %v4704_v10 = vmul.f32 %v1987_v7, %v1806_v15  ;;  %v4738_v15 = vperm.slane %v1444_v32, 1 }
 0x1cd   : > { %v1550_v46 = vmul.f32 %v4745_v31, %v4719_v51 }
 0x1ce   : > { %v1547_v12 = vmul.f32 %v4738_v15, %v4723_v29 }
 0x1cf   : > { %v1622_v26 = vmul.f32 1.442695, %v1550_v46  ;;  %v5814_v46 = vperm.slane %v4542_v54, 1 }
 0x1d0   : > { %v1616_v52 = vmul.f32 1.442695, %v1547_v12 }
 0x1d1   : > { %2215 = vperm.xlu2 %3771, %v2204_v11   ;;  %3770 = vset.pattern.permute.xlu1 %v4128_v36  ;;  %v1545_v25 = vmul.f32 %v5814_v46, %v4782_v0 }
 0x1d2   : > { %3782 = vset.pattern.permute.xlu0 %v4128_v36 }
 0x1d3   : > { %v1612_v34 = vmul.f32 1.442695, %v1545_v25  ;;  %v1549_v25 = vmul.f32 %v4738_v15, %v4782_v0  ;;  %v1453_v15 = vrot.slane %v4612_v14, 4 }
 0x1d9   : > { %2371 = vperm.xlu2 %3771, %v5769_v45   ;;  %2209 = vperm.xlu1 %3770, %v2204_v11   ;;  %v1750_v45 = vrot.slane %v4558_v62, 3  ;;  %v3839_v62 = vpop.eup %3838 }
 0x1da   : > { %1896 = vperm.xlu0 %3782, %v5771_v22   ;;  %v1614_v22 = vmul.f32 1.442695, %v1546_v30  ;;  %v4777_v30 = vperm.slane %v1746_v49, 0  ;;  %v3841_v1 = vpop.eup %3840  ;;  %v2110_v60 = vmul.f32 0.0, %v3839_v62  ;;  %v5781_v62 = vperm.slane %v4732_v33, 3 }
 0x1db   : > { %v1812_v32 = vpop.permute.xlu2 %1811  ;;  %v4773_v4 = vperm.slane %v1750_v45, 0  ;;  %v4775_v55 = vperm.slane %v1750_v45, 1  ;;  %v2111_v47 = vmul.f32 0.0, %v3841_v1  ;;  %v5817_v1 = vperm.slane %v4647_v40, 5 }
 0x1dc   : > { %v4754_v58 = vmul.f32 %v1986_v6, %v1812_v32  ;;  %v4756_v11 = vmul.f32 %v1987_v7, %v1812_v32  ;;  %v1551_v6 = vmul.f32 %v4752_v16, %v4723_v29  ;;  %v1544_v7 = vmul.f32 %v1478_v53, %v4761_v28 }
 0x1dd   : > { %v4779_v32 = vperm.slane %v1746_v49, 1  ;;  %3842 = vpow2.f32 %v1614_v22  ;;  %v1554_v53 = vmul.f32 %v4763_v3, %v4719_v51  ;;  %v1555_v49 = vmul.f32 %v4767_v24, %v4723_v29 }
 0x1de   : > { %3844 = vpow2.f32 %v1616_v52  ;;  %v1624_v50 = vmul.f32 1.442695, %v1551_v6  ;;  %v1610_v43 = vmul.f32 1.442695, %v1544_v7  ;;  %v5815_v6 = vperm.slane %v4564_v5, 0 }
 0x1df   : > { %3846 = vpow2.f32 %v1622_v26  ;;  %v1630_v13 = vmul.f32 1.442695, %v1554_v53  ;;  %v1632_v37 = vmul.f32 1.442695, %v1555_v49 }
 0x1e0   : > { %3848 = vpow2.f32 %v1624_v50 }
 0x1e1   : > { %3776 = vset.pattern.permute.xlu2 %v4128_v36  ;;  %3773 = vset.pattern.permute.xlu1 %v4521_v20  ;;  %3850 = vpow2.f32 %v1610_v43  ;;  %v1552_v43 = vmul.f32 %v4745_v31, %v4761_v28 }
 0x1e2   : > { %3785 = vset.pattern.permute.xlu0 %v4521_v20  ;;  %3852 = vpow2.f32 %v1630_v13 }
 0x1e3   : > { %v1825_v45 = vpop.permute.xlu2 %1824  ;;  %v1793_v12 = vpop.permute.xlu1 %1792  ;;  %3854 = vpow2.f32 %v1632_v37 }
 0x1e4   : > { %v4793_v8 = vmul.f32 %v4773_v4, %v1825_v45  ;;  %v4796_v22 = vmul.f32 %v4775_v55, %v1825_v45  ;;  %v2050_v52 = vmul.f32 %v4777_v30, %v1793_v12  ;;  %v2051_v27 = vmul.f32 %v4779_v32, %v1793_v12  ;;  %v1780_v39 = vpop.permute.xlu0 %1779  ;;  %v3843_v54 = vpop.eup %3842 }
 0x1e5   : > { %v2046_v48 = vmul.f32 %v5815_v6, %v1780_v39  ;;  %v2047_v45 = vmul.f32 %v5816_v23, %v1780_v39  ;;  %v3845_v12 = vpop.eup %3844  ;;  %v1548_v6 = vmul.f32 %v4734_v41, %v4761_v28  ;;  %v5818_v23 = vperm.slane %v4647_v40, 2 }
 0x1e6   : > { %v3847_v39 = vpop.eup %3846  ;;  %3856 = vpow2.f32 %v1612_v34  ;;  %v1754_v41 = vrot.slane %v4581_v18, 5  ;;  %v1626_v18 = vmul.f32 1.442695, %v1552_v43  ;;  %v1756_v43 = vrot.slane %v4601_v2, 6 }
 0x1e7   : > { %v4807_v46 = vadd.f32 %v2110_v60, %v2046_v48  ;;  %v4809_v7 = vadd.f32 %v2111_v47, %v2047_v45  ;;  %v3849_v60 = vpop.eup %3848  ;;  %v1618_v13 = vmul.f32 1.442695, %v1548_v6  ;;  %v5819_v2 = vperm.slane %v4564_v5, 0 }
 0x1e8   : > { %v3851_v37 = vpop.eup %3850  ;;  %v4846_v6 = vperm.slane %v1754_v41, 0 }
 0x1e9   : > { %2521 = vperm.xlu2 %3776, %v5817_v1   ;;  %v2188_v26 = vmul.f32 %v3843_v54, %v4807_v46  ;;  %v2189_v50 = vmul.f32 %v3845_v12, %v4809_v7  ;;  %2293 = vperm.xlu1 %3773, %v5818_v23   ;;  %v3853_v34 = vpop.eup %3852  ;;  %v1456_v54 = vrot.slane %v4552_v56, 5  ;;  %3858 = vpow2.f32 %v1618_v13 }
 0x1ea   : > { %1928 = vperm.xlu0 %3785, %v5781_v62   ;;  %v3855_v14 = vpop.eup %3854  ;;  %v1487_v23 = vperm.slane %v1453_v15, 1 }
 0x1eb   : > { %v4824_v48 = vadd.f32 %v2188_v26, %v2050_v52  ;;  %v4826_v47 = vadd.f32 %v2189_v50, %v2051_v27  ;;  %v1553_v52 = vmul.f32 %v4752_v16, %v4782_v0  ;;  %v1620_v27 = vmul.f32 1.442695, %v1549_v25 }
 0x1ec   : > { %v4848_v16 = vperm.slane %v1754_v41, 1  ;;  %v1556_v26 = vmul.f32 %v4763_v3, %v4761_v28  ;;  %v3857_v50 = vpop.eup %3856  ;;  %v1557_v3 = vmul.f32 %v4767_v24, %v4782_v0  ;;  %v5820_v24 = vperm.slane %v4564_v5, 1 }
 0x1ed   : > { %v2266_v53 = vmul.f32 %v3847_v39, %v4824_v48  ;;  %v2267_v49 = vmul.f32 %v3849_v60, %v4826_v47  ;;  %3860 = vpow2.f32 %v1620_v27  ;;  %v1628_v39 = vmul.f32 1.442695, %v1553_v52 }
 0x1ee   : > { %3862 = vpow2.f32 %v1626_v18  ;;  %v2113_v52 = vmul.f32 0.0, %v3857_v50  ;;  %v4878_v18 = vperm.slane %v1456_v54, 0  ;;  %v4884_v50 = vperm.slane %v1756_v43, 0 }
 0x1ef   : > { %v4840_v12 = vadd.f32 %v2266_v53, %v4702_v9  ;;  %v4843_v1 = vadd.f32 %v2267_v49, %v4704_v10  ;;  %v1486_v10 = vperm.slane %v1453_v15, 0  ;;  %v2112_v53 = vmul.f32 0.0, %v3851_v37  ;;  %v3859_v31 = vpop.eup %3858 }
 0x1f0   : > { %3864 = vpow2.f32 %v1628_v39  ;;  %v1459_v37 = vrot.slane %v4593_v21, 6  ;;  %v1559_v21 = vmul.f32 %v1487_v23, %v4723_v29 }
 0x1f1   : > { %3779 = vset.pattern.permute.xlu2 %v4521_v20  ;;  %3774 = vset.pattern.permute.xlu1 %v4128_v36  ;;  %v4854_v56 = vmul.f32 %v3853_v34, %v4840_v12  ;;  %v4857_v9 = vmul.f32 %v3855_v14, %v4843_v1  ;;  %v1634_v34 = vmul.f32 1.442695, %v1556_v26  ;;  %v1560_v45 = vmul.f32 %v1486_v10, %v4761_v28 }
 0x1f2   : > { %3788 = vset.pattern.permute.xlu0 %v4128_v36  ;;  %v1558_v39 = vmul.f32 %v1486_v10, %v4719_v51  ;;  %v4900_v10 = vperm.slane %v1459_v37, 0 }
 0x1f3   : > { %v1845_v25 = vpop.permute.xlu2 %1844  ;;  %v1799_v13 = vpop.permute.xlu1 %1798  ;;  %3866 = vpow2.f32 %v1634_v34 }
 0x1f4   : > { %v4864_v60 = vmul.f32 %v4846_v6, %v1845_v25  ;;  %v4867_v41 = vmul.f32 %v4848_v16, %v1845_v25  ;;  %v2052_v49 = vmul.f32 %v4777_v30, %v1799_v13  ;;  %v2053_v15 = vmul.f32 %v4779_v32, %v1799_v13  ;;  %v1786_v27 = vpop.permute.xlu0 %1785  ;;  %v3861_v5 = vpop.eup %3860 }
 0x1f5   : > { %v2048_v14 = vmul.f32 %v5819_v2, %v1786_v27  ;;  %v2049_v62 = vmul.f32 %v5820_v24, %v1786_v27  ;;  %v1561_v25 = vmul.f32 %v1487_v23, %v4782_v0  ;;  %v1636_v30 = vmul.f32 1.442695, %v1557_v3  ;;  %v3863_v2 = vpop.eup %3862 }
 0x1f6   : > { %v4886_v13 = vperm.slane %v1756_v43, 1  ;;  %v5821_v27 = vperm.slane %v4647_v40, 6  ;;  %v4892_v3 = vperm.slane %v1456_v54, 1  ;;  %v1642_v43 = vmul.f32 1.442695, %v1560_v45 }
 0x1f7   : > { %v4880_v32 = vadd.f32 %v2112_v53, %v2048_v14  ;;  %v4882_v26 = vadd.f32 %v2113_v52, %v2049_v62  ;;  %v5822_v52 = vperm.slane %v4647_v40, 3  ;;  %v1644_v14 = vmul.f32 1.442695, %v1561_v25  ;;  %v3865_v25 = vpop.eup %3864 }
 0x1f8   : > { %v5823_v24 = vperm.slane %v4732_v33, 6  ;;  %3868 = vpow2.f32 %v1636_v30  ;;  %v4902_v23 = vperm.slane %v1459_v37, 1  ;;  %v1562_v54 = vmul.f32 %v4878_v18, %v4719_v51 }
 0x1f9   : > { %2605 = vperm.xlu2 %3779, %v5821_v27   ;;  %v2190_v53 = vmul.f32 %v3859_v31, %v4880_v32  ;;  %v2191_v62 = vmul.f32 %v3861_v5, %v4882_v26  ;;  %2365 = vperm.xlu1 %3774, %v5822_v52   ;;  %v1638_v52 = vmul.f32 1.442695, %v1558_v39  ;;  %v1563_v30 = vmul.f32 %v4892_v3, %v4723_v29 }
 0x1fa   : > { %1961 = vperm.xlu0 %3788, %v5823_v24   ;;  %3870 = vpow2.f32 %v1642_v43  ;;  %v1646_v57 = vmul.f32 1.442695, %v1562_v54 }
 0x1fb   : > { %v1858_v34 = vpop.permute.xlu2 %1857  ;;  %v4906_v31 = vadd.f32 %v2190_v53, %v2052_v49  ;;  %v4908_v5 = vadd.f32 %v2191_v62, %v2053_v15  ;;  %v1640_v49 = vmul.f32 1.442695, %v1559_v21  ;;  %v3867_v53 = vpop.eup %3866  ;;  %v1752_v15 = vrot.slane %v4622_v17, 4 }
 0x1fc   : > { %v4911_v27 = vmul.f32 %v4884_v50, %v1858_v34  ;;  %v4914_v45 = vmul.f32 %v4886_v13, %v1858_v34  ;;  %3872 = vpow2.f32 %v1644_v14  ;;  %v1566_v62 = vmul.f32 %v4900_v10, %v4719_v51 }
 0x1fd   : > { %v2268_v37 = vmul.f32 %v3863_v2, %v4906_v31  ;;  %v2269_v24 = vmul.f32 %v3865_v25, %v4908_v5  ;;  %v1567_v2 = vmul.f32 %v4902_v23, %v4723_v29  ;;  %3874 = vpow2.f32 %v1638_v52 }
 0x1fe   : > { %v3869_v25 = vpop.eup %3868  ;;  %v1648_v21 = vmul.f32 1.442695, %v1563_v30  ;;  %3876 = vpow2.f32 %v1640_v49  ;;  %v1758_v14 = vrot.slane %v4625_v19, 7  ;;  %v1654_v54 = vmul.f32 1.442695, %v1566_v62 }
 0x1ff   : > { %v4924_v34 = vadd.f32 %v2268_v37, %v4754_v58  ;;  %v4927_v39 = vadd.f32 %v2269_v24, %v4756_v11  ;;  %v4936_v58 = vperm.slane %v1752_v15, 0  ;;  %v4938_v11 = vperm.slane %v1752_v15, 1 }
 0x200   : > { %v3871_v37 = vpop.eup %3870  ;;  %3878 = vpow2.f32 %v1646_v57  ;;  %v1462_v19 = vrot.slane %v4642_v38, 7  ;;  %v5784_v38 = vperm.slane %v4732_v33, 7 }
 0x201   : > { %3780 = vset.pattern.permute.xlu2 %v4128_v36  ;;  %3775 = vset.pattern.permute.xlu1 %v4521_v20  ;;  %v2346_v17 = vmul.f32 %v3867_v53, %v4924_v34  ;;  %v2347_v43 = vmul.f32 %v3869_v25, %v4927_v39  ;;  %v1656_v53 = vmul.f32 1.442695, %v1567_v2  ;;  %3880 = vpow2.f32 %v1648_v21 }
 0x202   : > { %3791 = vset.pattern.permute.xlu0 %v4521_v20  ;;  %v3873_v49 = vpop.eup %3872  ;;  %v4962_v21 = vperm.slane %v1758_v14, 0  ;;  %3882 = vpow2.f32 %v1654_v54  ;;  %v4984_v35 = vperm.slane %v1462_v19, 1 }
 0x203   : > { %v1819_v24 = vpop.permute.xlu1 %1818  ;;  %v4942_v52 = vadd.f32 %v2346_v17, %v4793_v8  ;;  %v4945_v30 = vadd.f32 %v2347_v43, %v4796_v22  ;;  %v3875_v17 = vpop.eup %3874  ;;  %3884 = vpow2.f32 %v1656_v53 }
 0x204   : > { %v2058_v25 = vmul.f32 %v4773_v4, %v1819_v24  ;;  %v2059_v61 = vmul.f32 %v4775_v55, %v1819_v24  ;;  %v1832_v15 = vpop.permute.xlu0 %1831  ;;  %v5782_v55 = vperm.slane %v4647_v40, 7  ;;  %v3877_v2 = vpop.eup %3876 }
 0x205   : > { %v2062_v62 = vmul.f32 %v4936_v58, %v1832_v15  ;;  %v2063_v44 = vmul.f32 %v4938_v11, %v1832_v15  ;;  %v2424_v8 = vmul.f32 %v3871_v37, %v4942_v52  ;;  %v2425_v22 = vmul.f32 %v3873_v49, %v4945_v30  ;;  %v1357_v24 = vpop.f32.mrf.mxu3 }
 0x206   : > { %v4955_v57 = vadd.f32 %v4854_v56, %v2058_v25  ;;  %v4958_v4 = vadd.f32 %v4857_v9, %v2059_v61  ;;  %v1564_v56 = vmul.f32 %v4878_v18, %v4761_v28  ;;  %v3879_v61 = vpop.eup %3878  ;;  %v1343_v9 = vpop.f32.mrf.mxu2  ;;  %v5825_v49 = vperm.slane %v4647_v40, 4 }
 0x207   : > { %v4972_v25 = vperm.slane %v1758_v14, 1  ;;  %v1565_v15 = vmul.f32 %v4892_v3, %v4782_v0  ;;  %v4992_v3 = vadd.f32 %v1357_v24, %v1343_v9 }
 0x208   : > { %5824 = vst [vmem:[#allocation24_spill] sm:$0xff] %v4958_v4  ;;  %v2422_v43 = vmul.f32 %v3875_v17, %v4955_v57  ;;  %v2423_v37 = vmul.f32 %v3877_v2, %v4958_v4  ;;  %v3881_v17 = vpop.eup %3880  ;;  %v1650_v53 = vmul.f32 1.442695, %v1564_v56 }
 0x209   : > { %2677 = vperm.xlu2 %3780, %v5782_v55   ;;  %2449 = vperm.xlu1 %3775, %v5825_v49   ;;  %v4976_v55 = vperm.slane %v1462_v19, 0  ;;  %v1652_v4 = vmul.f32 1.442695, %v1565_v15  ;;  %v2139_v56 = vperm.slane %v4992_v3, 0 }
 0x20a   : > { %1980 = vperm.xlu0 %3791, %v5784_v38   ;;  %v4980_v54 = vadd.f32 %v2422_v43, %v2062_v62  ;;  %v4982_v2 = vadd.f32 %v2423_v37, %v2063_v44  ;;  %v3883_v62 = vpop.eup %3882  ;;  %v1571_v37 = vmul.f32 %v4984_v35, %v4723_v29  ;;  %3886 = vpow2.f32 %v1650_v53 }
 0x20b   : > { %v1877_v18 = vpop.permute.xlu2 %1876  ;;  %v1570_v44 = vmul.f32 %v4976_v55, %v4719_v51  ;;  %v3885_v9 = vpop.eup %3884  ;;  %3888 = vpow2.f32 %v1652_v4  ;;  %v1568_v29 = vmul.f32 %v4900_v10, %v4761_v28  ;;  %v1878_v53 = vperm.slane %v4732_v33, 0 }
 0x20c   : > { %v4987_v14 = vmul.f32 %v4962_v21, %v1877_v18  ;;  %v4990_v49 = vmul.f32 %v4972_v25, %v1877_v18  ;;  %v2500_v59 = vmul.f32 %v3879_v61, %v4980_v54  ;;  %v2501_v38 = vmul.f32 %v3881_v17, %v4982_v2 }
 0x20d   : > { %v1569_v17 = vmul.f32 %v4902_v23, %v4782_v0 }
 0x20e   : > { %v4999_v19 = vadd.f32 %v2500_v59, %v4864_v60  ;;  %v5002_v43 = vadd.f32 %v2501_v38, %v4867_v41  ;;  %v1662_v59 = vmul.f32 1.442695, %v1570_v44  ;;  %v1664_v60 = vmul.f32 1.442695, %v1571_v37 }
 0x20f   : > { %v1658_v37 = vmul.f32 1.442695, %v1568_v29 }
 0x210   : > { %v2578_v61 = vmul.f32 %v3883_v62, %v4999_v19  ;;  %v2579_v51 = vmul.f32 %v3885_v9, %v5002_v43  ;;  %3890 = vpow2.f32 %v1662_v59  ;;  %v3887_v44 = vpop.eup %3886  ;;  %v1660_v9 = vmul.f32 1.442695, %v1569_v17 }
 0x211   : > { %3781 = vset.pattern.permute.xlu2 %v4521_v20  ;;  %3778 = vset.pattern.permute.xlu1 %v4128_v36  ;;  %3892 = vpow2.f32 %v1664_v60 }
 0x212   : > { %2150 = vperm.xlu0 %3791, %v2139_v56   ;;  %3894 = vpow2.f32 %v1658_v37  ;;  %v5034_v60 = vadd.f32 %v2578_v61, %v4911_v27 }
 0x213   : > { %v1838_v41 = vpop.permute.xlu1 %1837  ;;  %3896 = vpow2.f32 %v1660_v9  ;;  %v1904_v9 = vperm.slane %v4732_v33, 2 }
 0x214   : > { %v2064_v38 = vmul.f32 %v4936_v58, %v1838_v41  ;;  %v2065_v24 = vmul.f32 %v4938_v11, %v1838_v41  ;;  %v1864_v15 = vpop.permute.xlu0 %1863  ;;  %v3889_v58 = vpop.eup %3888  ;;  %v5037_v41 = vadd.f32 %v2579_v51, %v4914_v45 }
 0x215   : > { %v2072_v18 = vmul.f32 %v4884_v50, %v1864_v15  ;;  %v2073_v4 = vmul.f32 %v4886_v13, %v1864_v15  ;;  %v5826_v50 = vperm.slane %v4647_v40, 6 }
 0x216   : > { %v5022_v62 = vadd.f32 %v2424_v8, %v2064_v38  ;;  %v5024_v10 = vadd.f32 %v2425_v22, %v2065_v24  ;;  %v3891_v8 = vpop.eup %3890 }
 0x217   : > { %v3893_v38 = vpop.eup %3892  ;;  %v2656_v17 = vmul.f32 %v3891_v8, %v5034_v60  ;;  %v2685_v8 = vperm.slane %v4992_v3, 7 }
 0x218   : > { %v2502_v11 = vmul.f32 %v3887_v44, %v5022_v62  ;;  %v2503_v23 = vmul.f32 %v3889_v58, %v5024_v10  ;;  %v2657_v44 = vmul.f32 %v3893_v38, %v5037_v41  ;;  %v3895_v58 = vpop.eup %3894 }
 0x219   : > { %1889 = vperm.xlu2 %3781, %v1878_v53   ;;  %2599 = vperm.xlu1 %3778, %v5826_v50   ;;  %v3897_v27 = vpop.eup %3896 }
 0x21a   : > { %3802 = vset.pattern.permute.xlu0 %v4128_v36 }
 0x21b   : > { %v2132_v13 = vpop.permute.xlu2 %2131  ;;  %v1851_v59 = vpop.permute.xlu1 %1850 }
 0x21c   : > { %v2152_v22 = vmul.f32 %v2132_v13, %v4807_v46  ;;  %v2153_v29 = vmul.f32 %v2132_v13, %v4809_v7  ;;  %v2068_v24 = vmul.f32 %v4846_v6, %v1851_v59  ;;  %v2069_v15 = vmul.f32 %v4848_v16, %v1851_v59 }
 0x21d   : > { %v2607_v7 = vperm.slane %v4992_v3, 6  ;;  %v5828_v59 = vperm.slane %v4732_v33, 1 }
 0x21e   : > { %v2510_v37 = vadd.f32 %v2502_v11, %v2068_v24  ;;  %v2511_v46 = vadd.f32 %v2503_v23, %v2069_v15 }
 0x220   : > { %v2580_v6 = vmul.f32 %v3895_v58, %v2510_v37  ;;  %v2581_v45 = vmul.f32 %v3897_v27, %v2511_v46 }
 0x221   : > { %3784 = vset.pattern.permute.xlu2 %v4128_v36  ;;  %1883 = vperm.xlu1 %3778, %v1878_v53  }
 0x222   : > { %2612 = vperm.xlu0 %3802, %v2607_v7   ;;  %v5053_v11 = vadd.f32 %v2580_v6, %v2072_v18  ;;  %v5055_v23 = vadd.f32 %v2581_v45, %v2073_v4  ;;  %v5827_v4 = vperm.slane %v4732_v33, 3  ;;  %v1930_v45 = vperm.slane %v4732_v33, 4 }
 0x224   : > { %v2288_v16 = vpop.permute.xlu0 %2287 }
 0x225   : > { %v5048_v61 = vmul.f32 %v2288_v16, %v4840_v12  ;;  %v5051_v51 = vmul.f32 %v2288_v16, %v4843_v1 }
 0x229   : > { %1909 = vperm.xlu2 %3784, %v1904_v9   ;;  %3783 = vset.pattern.permute.xlu1 %v4521_v20 }
 0x22a   : > { %3805 = vset.pattern.permute.xlu0 %v4521_v20 }
 0x22b   : > { %v2216_v53 = vpop.permute.xlu2 %2215  ;;  %v1871_v50 = vpop.permute.xlu1 %1870 }
 0x22c   : > { %v2232_v13 = vmul.f32 %v2216_v53, %v4906_v31  ;;  %v2233_v12 = vmul.f32 %v2216_v53, %v4908_v5  ;;  %v2074_v1 = vmul.f32 %v4962_v21, %v1871_v50  ;;  %v2075_v18 = vmul.f32 %v4972_v25, %v1871_v50  ;;  %v5081_v24 = vpop.permute.xlu0 %2443 }
 0x22e   : > { %v5077_v21 = vadd.f32 %v2656_v17, %v2074_v1  ;;  %v5079_v25 = vadd.f32 %v2657_v44, %v2075_v18  ;;  %v1943_v18 = vperm.slane %v4732_v33, 5 }
 0x231   : > { %1922 = vperm.xlu2 %3784, %v5827_v4   ;;  %1902 = vperm.xlu1 %3783, %v5828_v59  }
 0x232   : > { %2696 = vperm.xlu0 %3805, %v2685_v8  }
 0x233   : > { %v2372_v38 = vpop.permute.xlu2 %2371 }
 0x234   : > { %v5072_v31 = vmul.f32 %v2372_v38, %v4942_v52  ;;  %v5075_v5 = vmul.f32 %v2372_v38, %v4945_v30 }
 0x239   : > { %3787 = vset.pattern.permute.xlu2 %v4521_v20  ;;  %1915 = vperm.xlu1 %3783, %v1904_v9  }
 0x23b   : > { %v2138_v15 = vpop.permute.xlu1 %2137 }
 0x23c   : > { %v2154_v58 = vmul.f32 %v2138_v15, %v4880_v32  ;;  %v2155_v27 = vmul.f32 %v2138_v15, %v4882_v26  ;;  %v2528_v30 = vpop.permute.xlu0 %2527  ;;  %v1572_v32 = vmul.f32 %v4976_v55, %v4761_v28  ;;  %v1573_v26 = vmul.f32 %v4984_v35, %v4782_v0 }
 0x23d   : > { %v2544_v44 = vmul.f32 %v2528_v30, %v2510_v37  ;;  %v2545_v16 = vmul.f32 %v2528_v30, %v2511_v46 }
 0x23e   : > { %v2160_v6 = vadd.f32 %v2154_v58, %v2152_v22  ;;  %v2167_v52 = vadd.f32 %v2155_v27, %v2153_v29  ;;  %v1666_v37 = vmul.f32 1.442695, %v1572_v32 }
 0x240   : > { %v2161_v22 = vrot.slane %v2160_v6, 4  ;;  %v2168_v29 = vrot.slane %v2167_v52, 4  ;;  %3898 = vpow2.f32 %v1666_v37 }
 0x241   : > { %1941 = vperm.xlu2 %3787, %v1930_v45   ;;  %3786 = vset.pattern.permute.xlu1 %v4128_v36 }
 0x242   : > { %v2162_v46 = vadd.f32 %v2161_v22, %v2160_v6 }
 0x243   : > { %v2522_v17 = vpop.permute.xlu2 %2521 }
 0x244   : > { %v2542_v53 = vmul.f32 %v2522_v17, %v4999_v19  ;;  %v2543_v9 = vmul.f32 %v2522_v17, %v5002_v43  ;;  %v2169_v19 = vadd.f32 %v2168_v29, %v2167_v52  ;;  %v1668_v43 = vmul.f32 1.442695, %v1573_v26 }
 0x245   : > { %v2163_v35 = vrot.slane %v2162_v46, 2 }
 0x246   : > { %v5094_v50 = vadd.f32 %v2544_v44, %v2542_v53  ;;  %v5096_v1 = vadd.f32 %v2545_v16, %v2543_v9  ;;  %v2170_v38 = vrot.slane %v2169_v19, 2  ;;  %3900 = vpow2.f32 %v1668_v43  ;;  %v3899_v52 = vpop.eup %3898 }
 0x247   : > { %v2164_v17 = vadd.f32 %v2163_v35, %v2162_v46  ;;  %v2658_v9 = vmul.f32 %v3899_v52, %v5053_v11 }
 0x248   : > { %v2171_v6 = vadd.f32 %v2170_v38, %v2169_v19 }
 0x249   : > { %1954 = vperm.xlu2 %3787, %v1943_v18   ;;  %1935 = vperm.xlu1 %3786, %v1930_v45   ;;  %v2165_v26 = vrot.slane %v2164_v17, 1  ;;  %v5111_v37 = vadd.f32 %v2658_v9, %v4987_v14 }
 0x24a   : > { %v2172_v22 = vrot.slane %v2171_v6, 1 }
 0x24b   : > { %v2210_v4 = vpop.permute.xlu1 %2209 }
 0x24c   : > { %v2230_v55 = vmul.f32 %v2210_v4, %v4824_v48  ;;  %v2231_v59 = vmul.f32 %v2210_v4, %v4826_v47  ;;  %v3901_v48 = vpop.eup %3900  ;;  %v5829_v4 = vperm.slane %v4732_v33, 7 }
 0x24d   : > { %v2659_v32 = vmul.f32 %v3901_v48, %v5055_v23 }
 0x24e   : > { %v2238_v15 = vadd.f32 %v2232_v13, %v2230_v55  ;;  %v2245_v58 = vadd.f32 %v2233_v12, %v2231_v59  ;;  %v2173_v55 = vadd.f32 %v2172_v22, %v2171_v6 }
 0x24f   : > { %v5114_v46 = vadd.f32 %v2659_v32, %v4990_v49 }
 0x250   : > { %v2239_v27 = vrot.slane %v2238_v15, 4  ;;  %v2246_v30 = vrot.slane %v2245_v58, 4 }
 0x251   : > { %3790 = vset.pattern.permute.xlu2 %v4128_v36  ;;  %1948 = vperm.xlu1 %3786, %v1943_v18  }
 0x252   : > { %v2240_v45 = vadd.f32 %v2239_v27, %v2238_v15  ;;  %v2247_v44 = vadd.f32 %v2246_v30, %v2245_v58  ;;  %v1494_v58 = vperm.slane %v4666_v63, 0 }
 0x253   : > { %v2606_v16 = vpop.permute.xlu2 %2605 }
 0x254   : > { %v5103_v47 = vmul.f32 %v2606_v16, %v5053_v11  ;;  %v5106_v53 = vmul.f32 %v2606_v16, %v5055_v23  ;;  %v2241_v13 = vrot.slane %v2240_v45, 2  ;;  %v2248_v12 = vrot.slane %v2247_v44, 2 }
 0x255   : > { %v2166_v11 = vadd.f32 %v2165_v26, %v2164_v17  ;;  %v1495_v17 = vperm.slane %v4666_v63, 1 }
 0x256   : > { %v2242_v29 = vadd.f32 %v2241_v13, %v2240_v45  ;;  %v2249_v18 = vadd.f32 %v2248_v12, %v2247_v44  ;;  %v5830_v45 = vperm.slane %v4732_v33, 6 }
 0x258   : > { %v2243_v19 = vrot.slane %v2242_v29, 1  ;;  %v2250_v43 = vrot.slane %v2249_v18, 1 }
 0x259   : > { %1974 = vperm.xlu2 %3790, %v5829_v4   ;;  %3789 = vset.pattern.permute.xlu1 %v4521_v20 }
 0x25a   : > { %v2244_v23 = vadd.f32 %v2243_v19, %v2242_v29  ;;  %v2251_v59 = vadd.f32 %v2250_v43, %v2249_v18 }
 0x25b   : > { %v2294_v35 = vpop.permute.xlu1 %2293 }
 0x25c   : > { %v2734_v38 = vsel %vm1440_vm8, %v2166_v11, %v2244_v23  ;;  %v2735_v14 = vsel %vm1440_vm8, %v2173_v55, %v2251_v59  ;;  %v2310_v15 = vmul.f32 %v2294_v35, %v4924_v34  ;;  %v2311_v49 = vmul.f32 %v2294_v35, %v4927_v39  ;;  %v5831_v11 = vld [vmem:[#allocation24_spill] sm:$0xff] }
 0x25d   : > { %v1576_v34 = vmul.f32 %v1494_v58, %v4761_v28  ;;  %v2217_v35 = vperm.slane %v4992_v3, 1 }
 0x25e   : > { %v2316_v27 = vadd.f32 %v2310_v15, %v5048_v61  ;;  %v2323_v30 = vadd.f32 %v2311_v49, %v5051_v51  ;;  %v1577_v61 = vmul.f32 %v1495_v17, %v4782_v0 }
 0x25f   : > { %v1674_v13 = vmul.f32 1.442695, %v1576_v34 }
 0x260   : > { %v2317_v6 = vrot.slane %v2316_v27, 4  ;;  %v2324_v52 = vrot.slane %v2323_v30, 4  ;;  %v1676_v32 = vmul.f32 1.442695, %v1577_v61 }
 0x261   : > { %2144 = vperm.xlu2 %3790, %v2139_v56   ;;  %1967 = vperm.xlu1 %3789, %v5830_v45   ;;  %3902 = vpow2.f32 %v1674_v13 }
 0x262   : > { %v2318_v39 = vadd.f32 %v2317_v6, %v2316_v27  ;;  %v2325_v44 = vadd.f32 %v2324_v52, %v2323_v30  ;;  %3904 = vpow2.f32 %v1676_v32 }
 0x263   : > { %v2678_v16 = vpop.permute.xlu2 %2677 }
 0x264   : > { %v5138_v51 = vmul.f32 %v2678_v16, %v5077_v21  ;;  %v5141_v48 = vmul.f32 %v2678_v16, %v5079_v25  ;;  %v2319_v56 = vrot.slane %v2318_v39, 2  ;;  %v2326_v33 = vrot.slane %v2325_v44, 2 }
 0x265   : > { %v1465_v25 = vrot.slane %v4671_v42, 1 }
 0x266   : > { %v2320_v12 = vadd.f32 %v2319_v56, %v2318_v39  ;;  %v2327_v9 = vadd.f32 %v2326_v33, %v2325_v44 }
 0x267   : > { %v5153_v15 = vperm.slane %v1465_v25, 0  ;;  %v3903_v49 = vpop.eup %3902  ;;  %v5157_v6 = vperm.slane %v1465_v25, 1 }
 0x268   : > { %v2321_v26 = vrot.slane %v2320_v12, 1  ;;  %v2328_v22 = vrot.slane %v2327_v9, 1  ;;  %v3905_v27 = vpop.eup %3904  ;;  %v2116_v44 = vmul.f32 0.0, %v3903_v49 }
 0x269   : > { %3793 = vset.pattern.permute.xlu2 %v4521_v20  ;;  %3792 = vset.pattern.permute.xlu1 %v4128_v36  ;;  %v2117_v16 = vmul.f32 0.0, %v3905_v27 }
 0x26a   : > { %v2322_v29 = vadd.f32 %v2321_v26, %v2320_v12  ;;  %v2329_v21 = vadd.f32 %v2328_v22, %v2327_v9  ;;  %v1581_v12 = vmul.f32 %v5157_v6, %v4782_v0  ;;  %v2551_v26 = vrot.slane %v5094_v50, 4 }
 0x26b   : > { %v2366_v18 = vpop.permute.xlu1 %2365  ;;  %v2558_v22 = vrot.slane %v5096_v1, 4  ;;  %v2464_v0 = vmul.f32 %v5081_v24, %v4980_v54 }
 0x26c   : > { %v2739_v19 = vsel %vm2738_vm2, %v2734_v38, %v2322_v29  ;;  %v2740_v43 = vsel %vm2738_vm2, %v2735_v14, %v2329_v21  ;;  %v2386_v4 = vmul.f32 %v2366_v18, %v4955_v57  ;;  %v2387_v55 = vmul.f32 %v2366_v18, %v5831_v11  ;;  %v5832_v38 = vld [vmem:[#allocation16_spill] sm:$0xff] }
 0x26d   : > { %v1998_v14 = vperm.slane %v5832_v38, 0  ;;  %v1999_v57 = vperm.slane %v5832_v38, 1  ;;  %v1684_v25 = vmul.f32 1.442695, %v1581_v12  ;;  %v2465_v11 = vmul.f32 %v5081_v24, %v4982_v2 }
 0x26e   : > { %v2394_v23 = vadd.f32 %v5072_v31, %v2386_v4  ;;  %v2401_v59 = vadd.f32 %v5075_v5, %v2387_v55  ;;  %v1580_v5 = vmul.f32 %v5153_v15, %v4761_v28  ;;  %v2552_v55 = vadd.f32 %v2551_v26, %v5094_v50 }
 0x26f   : > { %v2295_v50 = vperm.slane %v4992_v3, 2 }
 0x270   : > { %v2395_v42 = vrot.slane %v2394_v23, 4  ;;  %v2402_v30 = vrot.slane %v2401_v59, 4  ;;  %v1682_v28 = vmul.f32 1.442695, %v1580_v5 }
 0x271   : > { %2228 = vperm.xlu2 %3793, %v2217_v35   ;;  %2222 = vperm.xlu1 %3792, %v2217_v35  }
 0x272   : > { %v2396_v52 = vadd.f32 %v2395_v42, %v2394_v23  ;;  %v2403_v31 = vadd.f32 %v2402_v30, %v2401_v59  ;;  %3906 = vpow2.f32 %v1682_v28  ;;  %v2559_v23 = vadd.f32 %v2558_v22, %v5096_v1  ;;  %v5833_v30 = vld [vmem:[#allocation18_spill] sm:$0xff] }
 0x273   : > { %v1890_v45 = vpop.permute.xlu2 %1889  ;;  %v1763_v54 = vrot.slane %v5833_v30, 2  ;;  %3908 = vpow2.f32 %v1684_v25  ;;  %v2553_v1 = vrot.slane %v2552_v55, 2  ;;  %v5836_v30 = vld [vmem:[#allocation22_spill] sm:$0xff] }
 0x274   : > { %v2080_v34 = vmul.f32 %v1998_v14, %v1890_v45  ;;  %v2081_v39 = vmul.f32 %v1999_v57, %v1890_v45  ;;  %v2397_v61 = vrot.slane %v2396_v52, 2  ;;  %v2404_v56 = vrot.slane %v2403_v31, 2 }
 0x276   : > { %v5165_v33 = vadd.f32 %v2116_v44, %v2080_v34  ;;  %v5167_v13 = vadd.f32 %v2117_v16, %v2081_v39  ;;  %v2398_v9 = vadd.f32 %v2397_v61, %v2396_v52  ;;  %v2405_v32 = vadd.f32 %v2404_v56, %v2403_v31  ;;  %v5197_v34 = vld [vmem:[%s4709_s25] sm:$0xff]  ;;  %v5203_v56 = vld [vmem:[%s4709_s25 + $0x8] sm:$0xff] }
 0x277   : > { %v2560_v52 = vrot.slane %v2559_v23, 2  ;;  %v1574_v39 = vmul.f32 %v5197_v34, %v1494_v58  ;;  %v1575_v12 = vmul.f32 %v5203_v56, %v1495_v17 }
 0x278   : > { %v2399_v29 = vrot.slane %v2398_v9, 1  ;;  %v2406_v21 = vrot.slane %v2405_v32, 1 }
 0x279   : > { %3794 = vset.pattern.permute.xlu2 %v4128_v36  ;;  %3795 = vset.pattern.permute.xlu1 %v4521_v20  ;;  %v2561_v28 = vadd.f32 %v2560_v52, %v2559_v23  ;;  %v1672_v23 = vmul.f32 1.442695, %v1575_v12  ;;  %v1579_v52 = vmul.f32 %v5203_v56, %v5157_v6 }
 0x27a   : > { %v2400_v18 = vadd.f32 %v2399_v29, %v2398_v9  ;;  %v2407_v4 = vadd.f32 %v2406_v21, %v2405_v32  ;;  %v2554_v32 = vadd.f32 %v2553_v1, %v2552_v55 }
 0x27b   : > { %v2450_v59 = vpop.permute.xlu1 %2449 }
 0x27c   : > { %v5182_v35 = vsel %vm2743_vm3, %v2739_v19, %v2400_v18  ;;  %v5185_v49 = vsel %vm2743_vm3, %v2740_v43, %v2407_v4  ;;  %v2466_v27 = vmul.f32 %v2450_v59, %v5022_v62  ;;  %v2467_v42 = vmul.f32 %v2450_v59, %v5024_v10  ;;  %v3907_v19 = vpop.eup %3906  ;;  %v5834_v10 = vld [vmem:[#allocation19_spill] sm:$0xff]  ;;  %v5835_v4 = vld [vmem:[#allocation12_spill] sm:$0xff] }
 0x27d   : > { %v5191_v43 = vperm.slane %v1763_v54, 0  ;;  %v5193_v62 = vperm.slane %v1763_v54, 1  ;;  %v1467_v5 = vrot.slane %v5834_v10, 2  ;;  %v3909_v9 = vpop.eup %3908  ;;  %v5215_v21 = vmul.f32 %v3907_v19, %v5165_v33 }
 0x27e   : > { %v2472_v2 = vadd.f32 %v2466_v27, %v2464_v0  ;;  %v2479_v24 = vadd.f32 %v2467_v42, %v2465_v11  ;;  %v5218_v25 = vmul.f32 %v3909_v9, %v5167_v13  ;;  %v1670_v18 = vmul.f32 1.442695, %v1574_v39 }
 0x27f   : > { %v5220_v63 = vperm.slane %v1467_v5, 0  ;;  %v5222_v17 = vperm.slane %v1467_v5, 1  ;;  %v1471_v0 = vrot.slane %v5835_v4, 4  ;;  %v2555_v59 = vrot.slane %v2554_v32, 1 }
 0x280   : > { %v2473_v31 = vrot.slane %v2472_v2, 4  ;;  %v2480_v45 = vrot.slane %v2479_v24, 4  ;;  %v2562_v27 = vrot.slane %v2561_v28, 1  ;;  %v1578_v42 = vmul.f32 %v5197_v34, %v5153_v15 }
 0x281   : > { %2300 = vperm.xlu2 %3794, %v2295_v50   ;;  %2306 = vperm.xlu1 %3795, %v2295_v50   ;;  %v1469_v54 = vrot.slane %v5836_v30, 3  ;;  %v1582_v19 = vmul.f32 %v5197_v34, %v5220_v63  ;;  %v1583_v15 = vmul.f32 %v5203_v56, %v5222_v17  ;;  %3910 = vpow2.f32 %v1670_v18 }
 0x282   : > { %v2474_v44 = vadd.f32 %v2473_v31, %v2472_v2  ;;  %v2481_v16 = vadd.f32 %v2480_v45, %v2479_v24  ;;  %v5837_v2 = vld [vmem:[#allocation13_spill] sm:$0xff]  ;;  %3912 = vpow2.f32 %v1672_v23  ;;  %v2556_v10 = vadd.f32 %v2555_v59, %v2554_v32  ;;  %v5838_v59 = vld [vmem:[#allocation14_spill] sm:$0xff] }
 0x283   : > { %v1910_v61 = vpop.permute.xlu2 %1909  ;;  %v1761_v24 = vrot.slane %v5837_v2, 1  ;;  %v2563_v5 = vadd.f32 %v2562_v27, %v2561_v28  ;;  %v1680_v28 = vmul.f32 1.442695, %v1579_v52  ;;  %v2373_v4 = vperm.slane %v4992_v3, 3 }
 0x284   : > { %v5209_v26 = vmul.f32 %v5191_v43, %v1910_v61  ;;  %v5212_v22 = vmul.f32 %v5193_v62, %v1910_v61  ;;  %v2475_v29 = vrot.slane %v2474_v44, 2  ;;  %v2482_v58 = vrot.slane %v2481_v16, 2 }
 0x285   : > { %v1765_v27 = vrot.slane %v5838_v59, 3 }
 0x286   : > { %v2476_v11 = vadd.f32 %v2475_v29, %v2474_v44  ;;  %v2483_v55 = vadd.f32 %v2482_v58, %v2481_v16  ;;  %v1678_v44 = vmul.f32 1.442695, %v1578_v42  ;;  %v5237_v16 = vperm.slane %v1469_v54, 0 }
 0x287   : > { %v5251_v58 = vperm.slane %v1469_v54, 1 }
 0x288   : > { %v2477_v50 = vrot.slane %v2476_v11, 1  ;;  %v2484_v1 = vrot.slane %v2483_v55, 1  ;;  %3914 = vpow2.f32 %v1678_v44  ;;  %v5276_v44 = vld [vmem:[%s4709_s25 + $0x10] sm:$0xff] }
 0x289   : > { %3797 = vset.pattern.permute.xlu2 %v4521_v20  ;;  %3796 = vset.pattern.permute.xlu1 %v4128_v36  ;;  %3916 = vpow2.f32 %v1680_v28  ;;  %v1587_v54 = vmul.f32 %v5203_v56, %v5251_v58 }
 0x28a   : > { %v2478_v31 = vadd.f32 %v2477_v50, %v2476_v11  ;;  %v2485_v45 = vadd.f32 %v2484_v1, %v2483_v55  ;;  %v3911_v11 = vpop.eup %3910  ;;  %v1586_v55 = vmul.f32 %v5197_v34, %v5237_v16 }
 0x28b   : > { %v2600_v39 = vpop.permute.xlu1 %2599  ;;  %v3913_v23 = vpop.eup %3912  ;;  %v2114_v52 = vmul.f32 0.0, %v3911_v11 }
 0x28c   : > { %v2749_v6 = vsel %vm2748_vm4, %v5182_v35, %v2478_v31  ;;  %v2750_v61 = vsel %vm2748_vm4, %v5185_v49, %v2485_v45  ;;  %v2620_v12 = vmul.f32 %v2600_v39, %v5034_v60  ;;  %v2621_v9 = vmul.f32 %v2600_v39, %v5037_v41 }
 0x28d   : > { %v5246_v29 = vsel %vm2753_vm5, %v2749_v6, %v2556_v10  ;;  %v5249_v32 = vsel %vm2753_vm5, %v2750_v61, %v2563_v5  ;;  %v1686_v49 = vmul.f32 1.442695, %v1582_v19  ;;  %v5256_v60 = vperm.slane %v1471_v0, 0  ;;  %v1897_v10 = vpop.permute.xlu0 %1896 }
 0x28e   : > { %v2628_v18 = vadd.f32 %v5103_v47, %v2620_v12  ;;  %v2635_v35 = vadd.f32 %v5106_v53, %v2621_v9  ;;  %v5258_v41 = vperm.slane %v1471_v0, 1  ;;  %v5263_v47 = vperm.slane %v1761_v24, 0  ;;  %v3915_v9 = vpop.eup %3914 }
 0x28f   : > { %v1688_v53 = vmul.f32 1.442695, %v1583_v15  ;;  %v5267_v0 = vperm.slane %v1761_v24, 1  ;;  %3918 = vpow2.f32 %v1686_v49  ;;  %v2115_v19 = vmul.f32 0.0, %v3913_v23  ;;  %v3917_v38 = vpop.eup %3916  ;;  %v1923_v23 = vpop.permute.xlu2 %1922 }
 0x290   : > { %v2629_v42 = vrot.slane %v2628_v18, 4  ;;  %v2636_v30 = vrot.slane %v2635_v35, 4  ;;  %v1590_v31 = vmul.f32 %v5197_v34, %v5256_v60  ;;  %v1694_v45 = vmul.f32 1.442695, %v1586_v55 }
 0x291   : > { %2384 = vperm.xlu2 %3797, %v2373_v4   ;;  %2378 = vperm.xlu1 %3796, %v2373_v4   ;;  %3920 = vpow2.f32 %v1688_v53  ;;  %v1584_v6 = vmul.f32 %v5276_v44, %v5220_v63  ;;  %v1591_v61 = vmul.f32 %v5203_v56, %v5258_v41  ;;  %v1696_v12 = vmul.f32 1.442695, %v1587_v54  ;;  %v5293_v53 = vld [vmem:[%s4709_s25 + $0x18] sm:$0xff] }
 0x292   : > { %v2630_v2 = vadd.f32 %v2629_v42, %v2628_v18  ;;  %v2637_v50 = vadd.f32 %v2636_v30, %v2635_v35  ;;  %v2083_v4 = vmul.f32 %v5267_v0, %v1897_v10  ;;  %3922 = vpow2.f32 %v1694_v45 }
 0x293   : > { %v1884_v1 = vpop.permute.xlu1 %1883  ;;  %v1702_v49 = vmul.f32 1.442695, %v1590_v31  ;;  %v1585_v54 = vmul.f32 %v5293_v53, %v5222_v17  ;;  %3924 = vpow2.f32 %v1696_v12  ;;  %v1690_v45 = vmul.f32 1.442695, %v1584_v6 }
 0x294   : > { %v2631_v5 = vrot.slane %v2630_v2, 2  ;;  %v2638_v39 = vrot.slane %v2637_v50, 2  ;;  %v2078_v15 = vmul.f32 %v1998_v14, %v1884_v1  ;;  %v2079_v24 = vmul.f32 %v1999_v57, %v1884_v1 }
 0x295   : > { %v2082_v57 = vmul.f32 %v5263_v47, %v1897_v10  ;;  %v3919_v63 = vpop.eup %3918  ;;  %3926 = vpow2.f32 %v1702_v49  ;;  %v5315_v6 = vpop.permute.xlu0 %1928 }
 0x296   : > { %v2632_v28 = vadd.f32 %v2631_v5, %v2630_v2  ;;  %v2639_v18 = vadd.f32 %v2638_v39, %v2637_v50  ;;  %v5282_v35 = vadd.f32 %v2114_v52, %v2078_v15  ;;  %v5284_v14 = vadd.f32 %v2115_v19, %v2079_v24 }
 0x297   : > { %v1704_v2 = vmul.f32 1.442695, %v1591_v61  ;;  %v3921_v31 = vpop.eup %3920  ;;  %v5313_v24 = vperm.slane %v1765_v27, 0  ;;  %v1692_v61 = vmul.f32 1.442695, %v1585_v54  ;;  %v1592_v54 = vmul.f32 %v5276_v44, %v5256_v60 }
 0x298   : > { %v2633_v11 = vrot.slane %v2632_v28, 1  ;;  %v2640_v55 = vrot.slane %v2639_v18, 1  ;;  %v2192_v42 = vmul.f32 %v3915_v9, %v5282_v35  ;;  %v2193_v30 = vmul.f32 %v3917_v38, %v5284_v14  ;;  %v3923_v15 = vpop.eup %3922 }
 0x299   : > { %3798 = vset.pattern.permute.xlu2 %v4128_v36  ;;  %3799 = vset.pattern.permute.xlu1 %v4521_v20  ;;  %3928 = vpow2.f32 %v1704_v2 }
 0x29a   : > { %v2634_v50 = vadd.f32 %v2633_v11, %v2632_v28  ;;  %v2641_v1 = vadd.f32 %v2640_v55, %v2639_v18  ;;  %v5297_v52 = vadd.f32 %v2192_v42, %v2082_v57  ;;  %v5299_v19 = vadd.f32 %v2193_v30, %v2083_v4  ;;  %v3925_v28 = vpop.eup %3924  ;;  %v5839_v18 = vld [vmem:[#allocation10_spill] sm:$0xff]  ;;  %v5840_v42 = vld [vmem:[#allocation11_spill] sm:$0xff] }
 0x29b   : > { %v1473_v38 = vrot.slane %v5839_v18, 5  ;;  %v1588_v57 = vmul.f32 %v5276_v44, %v5237_v16  ;;  %3930 = vpow2.f32 %v1690_v45  ;;  %v2090_v4 = vmul.f32 %v5313_v24, %v1923_v23 }
 0x29c   : > { %v5303_v10 = vsel %vm2758_vm6, %v5246_v29, %v2634_v50  ;;  %v5307_v5 = vsel %vm2758_vm6, %v5249_v32, %v2641_v1  ;;  %v2270_v17 = vmul.f32 %v3919_v63, %v5297_v52  ;;  %v2271_v39 = vmul.f32 %v3921_v31, %v5299_v19 }
 0x29d   : > { %v5319_v29 = vperm.slane %v1765_v27, 1  ;;  %v2451_v32 = vperm.slane %v4992_v3, 4  ;;  %v5333_v27 = vpop.permute.xlu2 %1941  ;;  %v1589_v63 = vmul.f32 %v5293_v53, %v5251_v58  ;;  %3932 = vpow2.f32 %v1692_v61 }
 0x29e   : > { %v5323_v12 = vadd.f32 %v2270_v17, %v5209_v26  ;;  %v5326_v9 = vadd.f32 %v2271_v39, %v5212_v22  ;;  %v3927_v22 = vpop.eup %3926  ;;  %v1698_v2 = vmul.f32 1.442695, %v1588_v57  ;;  %v1504_v50 = vperm.slane %v1473_v38, 0 }
 0x29f   : > { %v2091_v59 = vmul.f32 %v5319_v29, %v1923_v23  ;;  %v3929_v55 = vpop.eup %3928  ;;  %v1475_v23 = vrot.slane %v5840_v42, 6  ;;  %v1593_v39 = vmul.f32 %v5293_v53, %v5258_v41  ;;  %v1505_v61 = vperm.slane %v1473_v38, 1 }
 0x2a0   : > { %v2348_v26 = vmul.f32 %v3923_v15, %v5323_v12  ;;  %v2349_v49 = vmul.f32 %v3925_v28, %v5326_v9  ;;  %v1700_v15 = vmul.f32 1.442695, %v1589_v63  ;;  %v1596_v18 = vmul.f32 %v5276_v44, %v1504_v50 }
 0x2a1   : > { %2456 = vperm.xlu2 %3798, %v2451_v32   ;;  %2462 = vperm.xlu1 %3799, %v2451_v32   ;;  %v3931_v17 = vpop.eup %3930  ;;  %v5356_v32 = vpop.permute.xlu0 %1961  ;;  %v1506_v28 = vperm.slane %v1475_v23, 0  ;;  %3934 = vpow2.f32 %v1698_v2  ;;  %v1706_v57 = vmul.f32 1.442695, %v1592_v54  ;;  %v5841_v2 = vld [vmem:[#allocation20_spill] sm:$0xff] }
 0x2a2   : > { %v5339_v11 = vadd.f32 %v2348_v26, %v2090_v4  ;;  %v5341_v16 = vadd.f32 %v2349_v49, %v2091_v59  ;;  %3936 = vpow2.f32 %v1700_v15  ;;  %v5369_v4 = vperm.slane %v1475_v23, 1 }
 0x2a3   : > { %v1903_v30 = vpop.permute.xlu1 %1902  ;;  %v1600_v49 = vmul.f32 %v5276_v44, %v1506_v28  ;;  %3938 = vpow2.f32 %v1706_v57 }
 0x2a4   : > { %v2084_v1 = vmul.f32 %v5263_v47, %v1903_v30  ;;  %v2085_v31 = vmul.f32 %v5267_v0, %v1903_v30  ;;  %v5349_v58 = vmul.f32 %v3927_v22, %v5339_v11  ;;  %v5352_v45 = vmul.f32 %v3929_v55, %v5341_v16  ;;  %v3933_v0 = vpop.eup %3932 }
 0x2a5   : > { %v1955_v59 = vpop.permute.xlu2 %1954  ;;  %v1714_v22 = vmul.f32 1.442695, %v1596_v18  ;;  %v1601_v42 = vmul.f32 %v5293_v53, %v5369_v4  ;;  %v2093_v18 = vmul.f32 %v5319_v29, %v5315_v6 }
 0x2a6   : > { %v5359_v60 = vadd.f32 %v5215_v21, %v2084_v1  ;;  %v5362_v47 = vadd.f32 %v5218_v25, %v2085_v31  ;;  %v1708_v21 = vmul.f32 1.442695, %v1593_v39  ;;  %v1597_v25 = vmul.f32 %v5293_v53, %v1505_v61 }
 0x2a7   : > { %v3935_v54 = vpop.eup %3934  ;;  %v1767_v1 = vrot.slane %v5841_v2, 4  ;;  %v2529_v39 = vperm.slane %v4992_v3, 5 }
 0x2a8   : > { %v2272_v41 = vmul.f32 %v3931_v17, %v5359_v60  ;;  %v2273_v38 = vmul.f32 %v3933_v0, %v5362_v47  ;;  %3940 = vpow2.f32 %v1708_v21  ;;  %v1716_v30 = vmul.f32 1.442695, %v1597_v25  ;;  %v3937_v15 = vpop.eup %3936 }
 0x2a9   : > { %3801 = vset.pattern.permute.xlu2 %v4521_v20  ;;  %3800 = vset.pattern.permute.xlu1 %v4128_v36  ;;  %v5377_v23 = vpop.permute.xlu0 %1980  ;;  %3942 = vpow2.f32 %v1714_v22  ;;  %v2092_v0 = vmul.f32 %v5313_v24, %v5315_v6  ;;  %v1595_v25 = vmul.f32 %v5203_v56, %v1505_v61  ;;  %v2007_v22 = vperm.slane %v1767_v1, 1 }
 0x2aa   : > { %3944 = vpow2.f32 %v1716_v30 }
 0x2ab   : > { %v1916_v26 = vpop.permute.xlu1 %1915  ;;  %v2097_v2 = vmul.f32 %v2007_v22, %v5333_v27 }
 0x2ac   : > { %v2088_v63 = vmul.f32 %v5191_v43, %v1916_v26  ;;  %v2089_v55 = vmul.f32 %v5193_v62, %v1916_v26  ;;  %v1594_v43 = vmul.f32 %v5197_v34, %v1504_v50  ;;  %v1722_v62 = vmul.f32 1.442695, %v1600_v49  ;;  %v3939_v26 = vpop.eup %3938 }
 0x2ad   : > { %v1724_v50 = vmul.f32 1.442695, %v1601_v42  ;;  %v2006_v49 = vperm.slane %v1767_v1, 0  ;;  %v1712_v1 = vmul.f32 1.442695, %v1595_v25 }
 0x2ae   : > { %v5380_v31 = vadd.f32 %v2272_v41, %v2088_v63  ;;  %v5382_v17 = vadd.f32 %v2273_v38, %v2089_v55  ;;  %v5842_v38 = vld [vmem:[#allocation21_spill] sm:$0xff]  ;;  %v3941_v29 = vpop.eup %3940  ;;  %v1710_v55 = vmul.f32 1.442695, %v1594_v43  ;;  %3946 = vpow2.f32 %v1722_v62 }
 0x2af   : > { %v1769_v21 = vrot.slane %v5842_v38, 5  ;;  %v3943_v30 = vpop.eup %3942  ;;  %3948 = vpow2.f32 %v1724_v50 }
 0x2b0   : > { %v2350_v57 = vmul.f32 %v3935_v54, %v5380_v31  ;;  %v2351_v41 = vmul.f32 %v3937_v15, %v5382_v17  ;;  %v2096_v54 = vmul.f32 %v2006_v49, %v5333_v27  ;;  %v3945_v43 = vpop.eup %3944  ;;  %3950 = vpow2.f32 %v1710_v55 }
 0x2b1   : > { %2540 = vperm.xlu2 %3801, %v2529_v39   ;;  %2534 = vperm.xlu1 %3800, %v2529_v39   ;;  %v2008_v39 = vperm.slane %v1769_v21, 0  ;;  %v2009_v15 = vperm.slane %v1769_v21, 1  ;;  %v2151_v62 = vpop.permute.xlu0 %2150  ;;  %3952 = vpow2.f32 %v1712_v1 }
 0x2b2   : > { %v5394_v63 = vadd.f32 %v2350_v57, %v2092_v0  ;;  %v5396_v24 = vadd.f32 %v2351_v41, %v2093_v18  ;;  %v1598_v0 = vmul.f32 %v5197_v34, %v1506_v28  ;;  %v1599_v28 = vmul.f32 %v5203_v56, %v5369_v4 }
 0x2b3   : > { %v5398_v6 = vpop.permute.xlu2 %1974  ;;  %v2100_v41 = vmul.f32 %v2008_v39, %v1955_v59  ;;  %v2101_v27 = vmul.f32 %v2009_v15, %v1955_v59 }
 0x2b4   : > { %v2428_v61 = vmul.f32 %v3939_v26, %v5394_v63  ;;  %v2429_v42 = vmul.f32 %v3941_v29, %v5396_v24  ;;  %v3947_v25 = vpop.eup %3946  ;;  %v1718_v50 = vmul.f32 1.442695, %v1598_v0 }
 0x2b5   : > { %v3949_v59 = vpop.eup %3948 }
 0x2b6   : > { %v5405_v18 = vadd.f32 %v2428_v61, %v2096_v54  ;;  %v5407_v57 = vadd.f32 %v2429_v42, %v2097_v2  ;;  %v2159_v54 = vmul.f32 %v2151_v62, %v5167_v13  ;;  %v3951_v0 = vpop.eup %3950  ;;  %3954 = vpow2.f32 %v1718_v50 }
 0x2b7   : > { %v3953_v13 = vpop.eup %3952 }
 0x2b8   : > { %v2506_v38 = vmul.f32 %v3943_v30, %v5405_v18  ;;  %v2507_v26 = vmul.f32 %v3945_v43, %v5407_v57 }
 0x2b9   : > { %3804 = vset.pattern.permute.xlu2 %v4128_v36  ;;  %3803 = vset.pattern.permute.xlu1 %v4521_v20  ;;  %v2158_v36 = vmul.f32 %v2151_v62, %v5165_v33 }
 0x2ba   : > { %v5415_v29 = vadd.f32 %v2506_v38, %v2100_v41  ;;  %v5417_v55 = vadd.f32 %v2507_v26, %v2101_v27  ;;  %v1720_v27 = vmul.f32 1.442695, %v1599_v28 }
 0x2bb   : > { %v2145_v21 = vpop.permute.xlu2 %2144  ;;  %v1936_v2 = vpop.permute.xlu1 %1935 }
 0x2bc   : > { %v2156_v61 = vmul.f32 %v2145_v21, %v5282_v35  ;;  %v2157_v20 = vmul.f32 %v2145_v21, %v5284_v14  ;;  %v2094_v42 = vmul.f32 %v2006_v49, %v1936_v2  ;;  %v2095_v30 = vmul.f32 %v2007_v22, %v1936_v2  ;;  %v5843_v49 = vld [vmem:[#allocation23_spill] sm:$0xff]  ;;  %v3955_v28 = vpop.eup %3954 }
 0x2bd   : > { %v2584_v4 = vmul.f32 %v3947_v25, %v5415_v29  ;;  %v2585_v1 = vmul.f32 %v3949_v59, %v5417_v55  ;;  %v1477_v22 = vrot.slane %v5843_v49, 7  ;;  %3956 = vpow2.f32 %v1720_v27  ;;  %v5845_v2 = vld [vmem:[#allocation15_spill] sm:$0xff] }
 0x2be   : > { %v2174_v43 = vadd.f32 %v2158_v36, %v2156_v61  ;;  %v2181_v41 = vadd.f32 %v2159_v54, %v2157_v20  ;;  %v5426_v38 = vadd.f32 %v5349_v58, %v2094_v42  ;;  %v5429_v33 = vadd.f32 %v5352_v45, %v2095_v30 }
 0x2bf   : > { %v1508_v45 = vperm.slane %v1477_v22, 0  ;;  %v1509_v25 = vperm.slane %v1477_v22, 1  ;;  %v1771_v61 = vrot.slane %v5845_v2, 6 }
 0x2c0   : > { %v2504_v35 = vmul.f32 %v3951_v0, %v5426_v38  ;;  %v2505_v14 = vmul.f32 %v3953_v13, %v5429_v33  ;;  %v2175_v49 = vrot.slane %v2174_v43, 4  ;;  %v2182_v22 = vrot.slane %v2181_v41, 4 }
 0x2c1   : > { %2690 = vperm.xlu2 %3804, %v2685_v8   ;;  %2618 = vperm.xlu1 %3803, %v2607_v7   ;;  %v1604_v3 = vmul.f32 %v5276_v44, %v1508_v45  ;;  %v5844_v7 = vperm.slane %v4647_v40, 7  ;;  %v2010_v20 = vperm.slane %v1771_v61, 0  ;;  %v2011_v42 = vperm.slane %v1771_v61, 1 }
 0x2c3   : > { %v1949_v58 = vpop.permute.xlu1 %1948  ;;  %v3957_v50 = vpop.eup %3956 }
 0x2c4   : > { %v2098_v62 = vmul.f32 %v2008_v39, %v1949_v58  ;;  %v2099_v26 = vmul.f32 %v2009_v15, %v1949_v58  ;;  %v1605_v39 = vmul.f32 %v5293_v53, %v1509_v25  ;;  %v1730_v15 = vmul.f32 1.442695, %v1604_v3 }
 0x2c6   : > { %v5438_v21 = vadd.f32 %v2504_v35, %v2098_v62  ;;  %v5440_v8 = vadd.f32 %v2505_v14, %v2099_v26  ;;  %v1732_v54 = vmul.f32 1.442695, %v1605_v39  ;;  %3958 = vpow2.f32 %v1730_v15 }
 0x2c7   : > { %v2176_v62 = vadd.f32 %v2175_v49, %v2174_v43  ;;  %v2183_v26 = vadd.f32 %v2182_v22, %v2181_v41  ;;  %v2102_v22 = vmul.f32 %v2010_v20, %v5356_v32 }
 0x2c8   : > { %v5443_v59 = vmul.f32 %v3955_v28, %v5438_v21  ;;  %v5446_v36 = vmul.f32 %v3957_v50, %v5440_v8  ;;  %3960 = vpow2.f32 %v1732_v54  ;;  %v1602_v50 = vmul.f32 %v5197_v34, %v1508_v45 }
 0x2c9   : > { %2683 = vperm.xlu1 %3803, %v5844_v7   ;;  %v2177_v15 = vrot.slane %v2176_v62, 2  ;;  %v2184_v54 = vrot.slane %v2183_v26, 2 }
 0x2cb   : > { %v2229_v58 = vpop.permute.xlu2 %2228  ;;  %v2185_v34 = vadd.f32 %v2184_v54, %v2183_v26 }
 0x2cc   : > { %v3959_v13 = vpop.eup %3958  ;;  %v2237_v3 = vmul.f32 %v2229_v58, %v5362_v47 }
 0x2ce   : > { %v3961_v40 = vpop.eup %3960 }
 0x2d3   : > { %v1968_v30 = vpop.permute.xlu1 %1967 }
 0x2d4   : > { %v2104_v0 = vmul.f32 %v2010_v20, %v1968_v30  ;;  %v2105_v27 = vmul.f32 %v2011_v42, %v1968_v30  ;;  %v1726_v30 = vmul.f32 1.442695, %v1602_v50 }
 0x2d6   : > { %v5453_v35 = vadd.f32 %v2584_v4, %v2104_v0  ;;  %v5455_v44 = vadd.f32 %v2585_v1, %v2105_v27  ;;  %v1603_v4 = vmul.f32 %v5203_v56, %v1509_v25  ;;  %v2236_v1 = vmul.f32 %v2229_v58, %v5359_v60  ;;  %v5846_v25 = vld [vmem:[#allocation17_spill] sm:$0xff] }
 0x2d7   : > { %v2178_v27 = vadd.f32 %v2177_v15, %v2176_v62  ;;  %v1773_v60 = vrot.slane %v5846_v25, 7  ;;  %3962 = vpow2.f32 %v1726_v30  ;;  %v2103_v58 = vmul.f32 %v2011_v42, %v5356_v32 }
 0x2d8   : > { %v5458_v14 = vmul.f32 %v3959_v13, %v5453_v35  ;;  %v5461_v53 = vmul.f32 %v3961_v40, %v5455_v44  ;;  %v1728_v0 = vmul.f32 1.442695, %v1603_v4 }
 0x2d9   : > { %v2013_v50 = vperm.slane %v1773_v60, 1  ;;  %v5478_v15 = vadd.f32 %v5446_v36, %v2103_v58 }
 0x2da   : > { %3964 = vpow2.f32 %v1728_v0 }
 0x2db   : > { %v2301_v62 = vpop.permute.xlu2 %2300 }
 0x2dc   : > { %v2313_v30 = vmul.f32 %v2301_v62, %v5326_v9 }
 0x2e3   : > { %v2223_v28 = vpop.permute.xlu1 %2222 }
 0x2e4   : > { %v2234_v7 = vmul.f32 %v2223_v28, %v5297_v52  ;;  %v2235_v39 = vmul.f32 %v2223_v28, %v5299_v19  ;;  %v2179_v52 = vrot.slane %v2178_v27, 1  ;;  %v2186_v19 = vrot.slane %v2185_v34, 1 }
 0x2e5   : > { %v2012_v28 = vperm.slane %v1773_v60, 0 }
 0x2e6   : > { %v2252_v2 = vadd.f32 %v2236_v1, %v2234_v7  ;;  %v2259_v61 = vadd.f32 %v2237_v3, %v2235_v39  ;;  %v3963_v1 = vpop.eup %3962  ;;  %v2107_v7 = vmul.f32 %v2013_v50, %v5398_v6  ;;  %v5475_v39 = vadd.f32 %v5443_v59, %v2102_v22 }
 0x2e7   : > { %v2106_v3 = vmul.f32 %v2012_v28, %v5398_v6  ;;  %v3965_v54 = vpop.eup %3964  ;;  %v2180_v20 = vadd.f32 %v2179_v52, %v2178_v27 }
 0x2e8   : > { %v2253_v43 = vrot.slane %v2252_v2, 4  ;;  %v2260_v41 = vrot.slane %v2259_v61, 4  ;;  %v2661_v6 = vmul.f32 %v3965_v54, %v5478_v15 }
 0x2ea   : > { %v2254_v45 = vadd.f32 %v2253_v43, %v2252_v2  ;;  %v2261_v56 = vadd.f32 %v2260_v41, %v2259_v61  ;;  %v2187_v2 = vadd.f32 %v2186_v19, %v2185_v34  ;;  %v2312_v61 = vmul.f32 %v2301_v62, %v5323_v12 }
 0x2eb   : > { %v2660_v41 = vmul.f32 %v3963_v1, %v5475_v39  ;;  %v2385_v22 = vpop.permute.xlu2 %2384 }
 0x2ec   : > { %v2255_v47 = vrot.slane %v2254_v45, 2  ;;  %v2262_v13 = vrot.slane %v2261_v56, 2 }
 0x2ed   : > { %v5488_v34 = vadd.f32 %v2660_v41, %v2106_v3  ;;  %v2392_v3 = vmul.f32 %v2385_v22, %v5394_v63 }
 0x2ee   : > { %v2256_v40 = vadd.f32 %v2255_v47, %v2254_v45  ;;  %v2263_v49 = vadd.f32 %v2262_v13, %v2261_v56  ;;  %v5490_v45 = vadd.f32 %v2661_v6, %v2107_v7  ;;  %v2393_v7 = vmul.f32 %v2385_v22, %v5396_v24 }
 0x2f0   : > { %v2257_v26 = vrot.slane %v2256_v40, 1  ;;  %v2264_v4 = vrot.slane %v2263_v49, 1 }
 0x2f2   : > { %v2258_v32 = vadd.f32 %v2257_v26, %v2256_v40  ;;  %v2265_v42 = vadd.f32 %v2264_v4, %v2263_v49  ;;  %v2108_v49 = vmul.f32 %v2012_v28, %v5377_v23 }
 0x2f3   : > { %v2307_v43 = vpop.permute.xlu1 %2306 }
 0x2f4   : > { %v2736_v59 = vsel %vm1440_vm8, %v2180_v20, %v2258_v32  ;;  %v2737_v0 = vsel %vm1440_vm8, %v2187_v2, %v2265_v42  ;;  %v2314_v36 = vmul.f32 %v2307_v43, %v5380_v31  ;;  %v2315_v27 = vmul.f32 %v2307_v43, %v5382_v17 }
 0x2f5   : > { %v2109_v31 = vmul.f32 %v2013_v50, %v5377_v23  ;;  %v2670_v62 = vadd.f32 %v5458_v14, %v2108_v49  ;;  %v5849_v49 = vld [vmem:[#allocation6_spill] sm:$0xff] }
 0x2f6   : > { %v2330_v12 = vadd.f32 %v2314_v36, %v2312_v61  ;;  %v2337_v56 = vadd.f32 %v2315_v27, %v2313_v30 }
 0x2f7   : > { %v2671_v26 = vadd.f32 %v5461_v53, %v2109_v31  ;;  %v3558_v31 = vmul.f32 -1.442695, %v5849_v49 }
 0x2f8   : > { %v2331_v9 = vrot.slane %v2330_v12, 4  ;;  %v2338_v25 = vrot.slane %v2337_v56, 4 }
 0x2fa   : > { %v2332_v60 = vadd.f32 %v2331_v9, %v2330_v12  ;;  %v2339_v47 = vadd.f32 %v2338_v25, %v2337_v56 }
 0x2fb   : > { %v2457_v53 = vpop.permute.xlu2 %2456 }
 0x2fc   : > { %v2333_v13 = vrot.slane %v2332_v60, 2  ;;  %v2340_v52 = vrot.slane %v2339_v47, 2  ;;  %v2468_v25 = vmul.f32 %v2457_v53, %v5426_v38 }
 0x2fe   : > { %v2334_v19 = vadd.f32 %v2333_v13, %v2332_v60  ;;  %v2341_v40 = vadd.f32 %v2340_v52, %v2339_v47  ;;  %v2469_v60 = vmul.f32 %v2457_v53, %v5429_v33 }
 0x300   : > { %v2335_v17 = vrot.slane %v2334_v19, 1  ;;  %v2342_v58 = vrot.slane %v2341_v40, 1 }
 0x302   : > { %v2336_v4 = vadd.f32 %v2335_v17, %v2334_v19  ;;  %v2343_v1 = vadd.f32 %v2342_v58, %v2341_v40  ;;  %v5850_v58 = vld [vmem:[#allocation7_spill] sm:$0xff] }
 0x303   : > { %v2379_v54 = vpop.permute.xlu1 %2378 }
 0x304   : > { %v2741_v20 = vsel %vm2738_vm2, %v2736_v59, %v2336_v4  ;;  %v2742_v28 = vsel %vm2738_vm2, %v2737_v0, %v2343_v1  ;;  %v2390_v23 = vmul.f32 %v2379_v54, %v5339_v11  ;;  %v2391_v50 = vmul.f32 %v2379_v54, %v5341_v16  ;;  %v5847_v59 = vld [vmem:[#allocation8_spill] sm:$0xff]  ;;  %v5848_v0 = vld [vmem:[#allocation9_spill] sm:$0xff]  ;;  %v5504_v11 = vpop.permute.xlu0 %2612 }
 0x305   : > { %v3560_v27 = vmul.f32 -1.442695, %v5847_v59  ;;  %v3561_v12 = vmul.f32 -1.442695, %v5848_v0  ;;  %v3559_v4 = vmul.f32 -1.442695, %v5850_v58 }
 0x306   : > { %v2408_v2 = vadd.f32 %v2392_v3, %v2390_v23  ;;  %v2415_v32 = vadd.f32 %v2393_v7, %v2391_v50 }
 0x307   : > { %3966 = vpow2.f32 %v3560_v27 }
 0x308   : > { %v2409_v14 = vrot.slane %v2408_v2, 4  ;;  %v2416_v42 = vrot.slane %v2415_v32, 4  ;;  %3968 = vpow2.f32 %v3561_v12 }
 0x309   : > { %3970 = vpow2.f32 %v3558_v31 }
 0x30a   : > { %v2410_v61 = vadd.f32 %v2409_v14, %v2408_v2  ;;  %v2417_v30 = vadd.f32 %v2416_v42, %v2415_v32  ;;  %3972 = vpow2.f32 %v3559_v4  ;;  %v3728_v4 = vld [vmem:[%s5529_s28 + $0x68] sm:$0xff] }
 0x30b   : > { %v2541_v9 = vpop.permute.xlu2 %2540 }
 0x30c   : > { %v2411_v43 = vrot.slane %v2410_v61, 2  ;;  %v2418_v63 = vrot.slane %v2417_v30, 2  ;;  %v2697_v33 = vpop.permute.xlu0 %2696 }
 0x30d   : > { %v2705_v23 = vmul.f32 %v2697_v33, %v2671_v26 }
 0x30e   : > { %v2412_v41 = vadd.f32 %v2411_v43, %v2410_v61  ;;  %v2419_v24 = vadd.f32 %v2418_v63, %v2417_v30 }
 0x310   : > { %v2413_v6 = vrot.slane %v2412_v41, 1  ;;  %v2420_v36 = vrot.slane %v2419_v24, 1 }
 0x312   : > { %v2414_v16 = vadd.f32 %v2413_v6, %v2412_v41  ;;  %v2421_v56 = vadd.f32 %v2420_v36, %v2419_v24  ;;  %v2548_v6 = vmul.f32 %v2541_v9, %v5415_v29  ;;  %v2549_v36 = vmul.f32 %v2541_v9, %v5417_v55  ;;  %v3721_v55 = vld [vmem:[%s5529_s28 + $0x30] sm:$0xff] }
 0x313   : > { %v2463_v47 = vpop.permute.xlu1 %2462  ;;  %v3729_v9 = vld [vmem:[%s5529_s28 + $0x70] sm:$0xff] }
 0x314   : > { %v2746_v13 = vsel %vm2743_vm3, %v2741_v20, %v2414_v16  ;;  %v2747_v52 = vsel %vm2743_vm3, %v2742_v28, %v2421_v56  ;;  %v2470_v19 = vmul.f32 %v2463_v47, %v5405_v18  ;;  %v2471_v40 = vmul.f32 %v2463_v47, %v5407_v57  ;;  %v3967_v20 = vpop.eup %3966  ;;  %v3730_v47 = vld [vmem:[%s5529_s28 + $0x78] sm:$0xff] }
 0x315   : > { %v2704_v28 = vmul.f32 %v2697_v33, %v2670_v62  ;;  %v3969_v50 = vpop.eup %3968  ;;  %v5520_v53 = vadd.f32 1.0, %v3967_v20  ;;  %3009 = vmatpush.bf16.msra.mxu1 %v3730_v47 }
 0x316   : > { %v2486_v22 = vadd.f32 %v2470_v19, %v2468_v25  ;;  %v2493_v17 = vadd.f32 %v2471_v40, %v2469_v60  ;;  %v5522_v43 = vadd.f32 1.0, %v3969_v50  ;;  %v3722_v60 = vld [vmem:[%s5529_s28 + $0x38] sm:$0xff]  ;;  %v3727_v50 = vld [vmem:[%s5529_s28 + $0x60] sm:$0xff] }
 0x317   : > { %3974 = vrcp.f32 %v5520_v53  ;;  %2995 = vmatpush.bf16.msra.mxu0 %v3722_v60  ;;  %vm2832_vm7 = vweird.f32 %v5520_v53 }
 0x318   : > { %v2487_v38 = vrot.slane %v2486_v22, 4  ;;  %v2494_v1 = vrot.slane %v2493_v17, 4  ;;  %3976 = vrcp.f32 %v5522_v43  ;;  %vm2847_vm9 = vweird.f32 %v5522_v43 }
 0x319   : > { %3010 = vmatpush.bf16.msra.mxu1 %v3729_v9  ;;  %v3726_v9 = vld [vmem:[%s5529_s28 + $0x58] sm:$0xff] }
 0x31a   : > { %v2488_v3 = vadd.f32 %v2487_v38, %v2486_v22  ;;  %v2495_v7 = vadd.f32 %v2494_v1, %v2493_v17  ;;  %v3720_v17 = vld [vmem:[%s5529_s28 + $0x28] sm:$0xff]  ;;  %v5563_v38 = vld [vmem:[%s507_s15] sm:$0x3] }
 0x31b   : > { %v2691_v54 = vpop.permute.xlu2 %2690  ;;  %2996 = vmatpush.bf16.msra.mxu0 %v3721_v55  ;;  %v2770_v20 = vperm.slane %v5563_v38, 1  ;;  %v3718_v55 = vld [vmem:[%s5529_s28 + $0x18] sm:$0xff] }
 0x31c   : > { %v2702_v18 = vmul.f32 %v2691_v54, %v5488_v34  ;;  %v2703_v57 = vmul.f32 %v2691_v54, %v5490_v45  ;;  %v2489_v2 = vrot.slane %v2488_v3, 2  ;;  %v2496_v32 = vrot.slane %v2495_v7, 2  ;;  %v3971_v34 = vpop.eup %3970 }
 0x31d   : > { %v3973_v62 = vpop.eup %3972  ;;  %v5532_v24 = vadd.f32 1.0, %v3971_v34  ;;  %v2769_v54 = vperm.slane %v5563_v38, 0  ;;  %3011 = vmatpush.bf16.msra.mxu1 %v3728_v4 }
 0x31e   : > { %v5516_v14 = vadd.f32 %v2704_v28, %v2702_v18  ;;  %v5518_v42 = vadd.f32 %v2705_v23, %v2703_v57  ;;  %v2490_v61 = vadd.f32 %v2489_v2, %v2488_v3  ;;  %v2497_v30 = vadd.f32 %v2496_v32, %v2495_v7  ;;  %v3719_v23 = vld [vmem:[%s5529_s28 + $0x20] sm:$0xff] }
 0x31f   : > { %v5547_v19 = vadd.f32 1.0, %v3973_v62  ;;  %3978 = vrcp.f32 %v5532_v24  ;;  %2997 = vmatpush.bf16.msra.mxu0 %v3720_v17  ;;  %v2806_v62 = vand.u32 2147483647, %v5532_v24  ;;  %v2625_v17 = vmul.f32 %v5504_v11, %v5478_v15 }
 0x320   : > { %v2491_v63 = vrot.slane %v2490_v61, 1  ;;  %v2498_v45 = vrot.slane %v2497_v30, 1  ;;  %v2721_v32 = vrot.slane %v5516_v14, 4  ;;  %vm2802_vm11 = vweird.f32 %v5532_v24 }
 0x321   : > { %3980 = vrcp.f32 %v5547_v19  ;;  %v2823_v47 = vand.u32 2147483648, %v5547_v19  ;;  %3012 = vmatpush.bf16.msra.mxu1 %v3727_v50  ;;  %vm2817_vm13 = vweird.f32 %v5547_v19 }
 0x322   : > { %v2492_v26 = vadd.f32 %v2491_v63, %v2490_v61  ;;  %v2499_v41 = vadd.f32 %v2498_v45, %v2497_v30  ;;  %v2728_v61 = vrot.slane %v5518_v42, 4  ;;  %v5851_v30 = vld [vmem:[#allocation3_spill] sm:$0xff]  ;;  %v5852_v63 = vld [vmem:[#allocation5_spill] sm:$0xff] }
 0x323   : > { %v2535_v27 = vpop.permute.xlu1 %2534  ;;  %v5582_v34 = vmul.f32 %v2769_v54, %v5851_v30  ;;  %v5587_v45 = vmul.f32 %v2770_v20, %v5852_v63  ;;  %2998 = vmatpush.bf16.msra.mxu0 %v3719_v23  ;;  %v2851_v30 = vand.u32 2147483647, %v5522_v43  ;;  %v2853_v63 = vand.u32 2147483648, %v5522_v43 }
 0x324   : > { %v5538_v12 = vsel %vm2748_vm4, %v2746_v13, %v2492_v26  ;;  %v5541_v16 = vsel %vm2748_vm4, %v2747_v52, %v2499_v41  ;;  %v2546_v56 = vmul.f32 %v2535_v27, %v5438_v21  ;;  %v2547_v25 = vmul.f32 %v2535_v27, %v5440_v8  ;;  %v5555_v13 = vpop.eup %3974 }
 0x325   : > { %v5558_v52 = vpop.eup %3976  ;;  %v2828_v3 = vmul.f32 %v5555_v13, %v5520_v53  ;;  %v2808_v26 = vand.u32 2147483648, %v5532_v24  ;;  %v2821_v27 = vand.u32 2147483647, %v5547_v19  ;;  %vm2833_vm8 = vweird.f32 %v5555_v13  ;;  %3013 = vmatpush.bf16.msra.mxu1 %v3726_v9  ;;  %v3724_v9 = vld [vmem:[%s5529_s28 + $0x48] sm:$0xff] }
 0x326   : > { %v2564_v40 = vadd.f32 %v2548_v6, %v2546_v56  ;;  %v2571_v29 = vadd.f32 %v2549_v36, %v2547_v25  ;;  %v2843_v7 = vmul.f32 %v5558_v52, %v5522_v43  ;;  %v5571_v18 = vpop.eup %3978  ;;  %vm2848_vm10 = vweird.f32 %v5558_v52  ;;  %vm5639_vm14 = vmor %vm2832_vm7, %vm2833_vm8 }
 0x327   : > { %v5575_v2 = vpop.eup %3980  ;;  %v5593_v36 = vmul.f32 %v5571_v18, %v5532_v24  ;;  %v2829_v56 = vsub.f32 1.0, %v2828_v3  ;;  %2999 = vmatpush.bf16.msra.mxu0 %v3718_v55  ;;  %vm2803_vm12 = vweird.f32 %v5571_v18  ;;  %vm5652_vm15 = vmor %vm2847_vm9, %vm2848_vm10  ;;  %vm5670_vm3 = vcmp.eq.f32.partialorder %v2851_v30, 8.507059e+37 }
 0x328   : > { %v2565_v21 = vrot.slane %v2564_v40, 4  ;;  %v2572_v8 = vrot.slane %v2571_v29, 4  ;;  %v2844_v25 = vsub.f32 1.0, %v2843_v7  ;;  %v5598_v60 = vmul.f32 %v5575_v2, %v5547_v19 }
 0x329   : > { %vm2818_vm4 = vweird.f32 %v5575_v2  ;;  %vm2822_vm8 = vcmp.eq.f32.partialorder %v2821_v27, 8.507059e+37 }
 0x32a   : > { %v2566_v31 = vadd.f32 %v2565_v21, %v2564_v40  ;;  %v2573_v22 = vadd.f32 %v2572_v8, %v2571_v29  ;;  %v2722_v21 = vadd.f32 %v2721_v32, %v5516_v14  ;;  %v2729_v8 = vadd.f32 %v2728_v61, %v5518_v42  ;;  %vm5701_vm7 = vmor %vm2817_vm13, %vm2818_vm4 }
 0x32b   : > { %v2845_v15 = vmul.f32 %v5558_v52, %v2844_v25  ;;  %v3716_v25 = vld [vmem:[%s5529_s28 + $0x8] sm:$0xff] }
 0x32c   : > { %v2567_v1 = vrot.slane %v2566_v31, 2  ;;  %v2574_v33 = vrot.slane %v2573_v22, 2  ;;  %v2730_v7 = vrot.slane %v2729_v8, 2 }
 0x32d   : > { %v2846_v61 = vadd.f32 %v5558_v52, %v2845_v15  ;;  %v3715_v15 = vld [vmem:[%s5529_s28] sm:$0xff] }
 0x32e   : > { %v2568_v57 = vadd.f32 %v2567_v1, %v2566_v31  ;;  %v2575_v28 = vadd.f32 %v2574_v33, %v2573_v22  ;;  %v2624_v22 = vmul.f32 %v5504_v11, %v5475_v39  ;;  %v2830_v33 = vmul.f32 %v5555_v13, %v2829_v56 }
 0x32f   : > { %v2836_v39 = vand.u32 2147483647, %v5520_v53  ;;  %v2838_v11 = vand.u32 2147483648, %v5520_v53 }
 0x330   : > { %v2569_v41 = vrot.slane %v2568_v57, 1  ;;  %v2576_v6 = vrot.slane %v2575_v28, 1  ;;  %v2831_v50 = vadd.f32 %v5555_v13, %v2830_v33 }
 0x331   : > { %vm5657_vm2 = vcmp.eq.f32.partialorder %v2836_v39, 8.507059e+37 }
 0x332   : > { %v2570_v40 = vadd.f32 %v2569_v41, %v2568_v57  ;;  %v2577_v29 = vadd.f32 %v2576_v6, %v2575_v28  ;;  %v5631_v57 = vor.u32 1.1754944e-38, %v2808_v26  ;;  %v2799_v26 = vsub.f32 1.0, %v5593_v36 }
 0x333   : > { %v2619_v31 = vpop.permute.xlu1 %2618  ;;  %v2814_v41 = vsub.f32 1.0, %v5598_v60  ;;  %v2839_v36 = vor.u32 1.1754944e-38, %v2838_v11  ;;  %v2731_v60 = vadd.f32 %v2730_v7, %v2729_v8  ;;  %v2854_v8 = vor.u32 1.1754944e-38, %v2853_v63 }
 0x334   : > { %v5611_v4 = vsel %vm2753_vm5, %v5538_v12, %v2570_v40  ;;  %v5615_v1 = vsel %vm2753_vm5, %v5541_v16, %v2577_v29  ;;  %v2626_v14 = vmul.f32 %v2619_v31, %v5453_v35  ;;  %v2627_v42 = vmul.f32 %v2619_v31, %v5455_v44  ;;  %v3717_v16 = vld [vmem:[%s5529_s28 + $0x10] sm:$0xff]  ;;  %vm5692_vm5 = vmor %vm2802_vm11, %vm2803_vm12 }
 0x335   : > { %v3725_v35 = vld [vmem:[%s5529_s28 + $0x50] sm:$0xff]  ;;  %v2723_v44 = vrot.slane %v2722_v21, 2  ;;  %3000 = vmatpush.bf16.msra.mxu0 %v3717_v16  ;;  %v2800_v11 = vmul.f32 %v5571_v18, %v2799_v26 }
 0x336   : > { %v2642_v12 = vadd.f32 %v2626_v14, %v2624_v22  ;;  %v2649_v3 = vadd.f32 %v2627_v42, %v2625_v17  ;;  %3014 = vmatpush.bf16.msra.mxu1 %v3725_v35  ;;  %v2835_v14 = vsel %vm5639_vm14, %v5555_v13, %v2831_v50  ;;  %v2850_v42 = vsel %vm5652_vm15, %v5558_v52, %v2846_v61  ;;  %v3723_v52 = vld [vmem:[%s5529_s28 + $0x40] sm:$0xff] }
 0x337   : > { %v2724_v29 = vadd.f32 %v2723_v44, %v2722_v21  ;;  %v2815_v13 = vmul.f32 %v5575_v2, %v2814_v41  ;;  %v2801_v30 = vadd.f32 %v5571_v18, %v2800_v11 }
 0x338   : > { %v2643_v28 = vrot.slane %v2642_v12, 4  ;;  %v2650_v23 = vrot.slane %v2649_v3, 4 }
 0x339   : > { %3001 = vmatpush.bf16.msra.mxu0 %v3716_v25 }
 0x33a   : > { %v2644_v6 = vadd.f32 %v2643_v28, %v2642_v12  ;;  %v2651_v56 = vadd.f32 %v2650_v23, %v2649_v3  ;;  %v2725_v12 = vrot.slane %v2724_v29, 1  ;;  %v2732_v3 = vrot.slane %v2731_v60, 1  ;;  %3015 = vmatpush.bf16.msra.mxu1 %v3724_v9 }
 0x33b   : > { %v2684_v55 = vpop.permute.xlu1 %2683  ;;  %v2855_v28 = vsel %vm5670_vm3, %v2854_v8, %v2850_v42 }
 0x33c   : > { %v2645_v43 = vrot.slane %v2644_v6, 2  ;;  %v2652_v31 = vrot.slane %v2651_v56, 2  ;;  %v2700_v22 = vmul.f32 %v2684_v55, %v5111_v37  ;;  %v2701_v17 = vmul.f32 %v2684_v55, %v5114_v46 }
 0x33d   : > { %3002 = vmatpush.bf16.msra.mxu0 %v3715_v15  ;;  %v2726_v26 = vadd.f32 %v2725_v12, %v2724_v29  ;;  %v2733_v41 = vadd.f32 %v2732_v3, %v2731_v60  ;;  %v2860_v29 = vmul.f32 %v2855_v28, %v5848_v0 }
 0x33e   : > { %v2646_v33 = vadd.f32 %v2645_v43, %v2644_v6  ;;  %v2653_v39 = vadd.f32 %v2652_v31, %v2651_v56  ;;  %v2706_v37 = vadd.f32 %v2700_v22, %v5138_v51  ;;  %v2713_v46 = vadd.f32 %v2701_v17, %v5141_v48  ;;  %3016 = vmatpush.bf16.msra.mxu1 %v3723_v52 }
 0x33f   : > { %v2824_v51 = vor.u32 1.1754944e-38, %v2823_v47  ;;  %v2840_v48 = vsel %vm5657_vm2, %v2839_v36, %v2835_v14  ;;  %v2816_v47 = vadd.f32 %v5575_v2, %v2815_v13 }
 0x340   : > { %v2647_v16 = vrot.slane %v2646_v33, 1  ;;  %v2654_v35 = vrot.slane %v2653_v39, 1  ;;  %v2707_v44 = vrot.slane %v2706_v37, 4  ;;  %v2714_v7 = vrot.slane %v2713_v46, 4 }
 0x341   : > { %v2859_v36 = vmul.f32 %v2840_v48, %v5847_v59  ;;  %v2820_v59 = vsel %vm5701_vm7, %v5575_v2, %v2816_v47 }
 0x342   : > { %v2648_v23 = vadd.f32 %v2647_v16, %v2646_v33  ;;  %v2655_v50 = vadd.f32 %v2654_v35, %v2653_v39  ;;  %v2708_v32 = vadd.f32 %v2707_v44, %v2706_v37  ;;  %v2715_v61 = vadd.f32 %v2714_v7, %v2713_v46 }
 0x343   : > { %v2825_v14 = vsel %vm2822_vm8, %v2824_v51, %v2820_v59 }
 0x344   : > { %v2761_v6 = vsel %vm2758_vm6, %v5611_v4, %v2648_v23  ;;  %v2762_v56 = vsel %vm2758_vm6, %v5615_v1, %v2655_v50  ;;  %v2709_v25 = vrot.slane %v2708_v32, 2  ;;  %v2716_v40 = vrot.slane %v2715_v61, 2 }
 0x345   : > { %v2765_v60 = vsel %vm1460_vm1, %v2761_v6, %v2726_v26  ;;  %v2766_v55 = vsel %vm1460_vm1, %v2762_v56, %v2733_v41  ;;  %v2805_v4 = vsel %vm5692_vm5, %v5571_v18, %v2801_v30  ;;  %vm2807_vm6 = vcmp.eq.f32.partialorder %v2806_v62, 8.507059e+37  ;;  %v5865_v18 = vld [vmem:[#allocation2_spill] sm:$0xff]  ;;  %v5866_v62 = vld [vmem:[#allocation4_spill] sm:$0xff] }
 0x346   : > { %v2710_v9 = vadd.f32 %v2709_v25, %v2708_v32  ;;  %v2717_v43 = vadd.f32 %v2716_v40, %v2715_v61  ;;  %v2779_v31 = vadd.f32 %v5582_v34, %v2765_v60  ;;  %v2780_v22 = vadd.f32 %v5587_v45, %v2766_v55 }
 0x347   : > { %v2810_v45 = vsel %vm2807_vm6, %v5631_v57, %v2805_v4  ;;  %v2773_v24 = vmul.f32 %v2769_v54, %v5865_v18  ;;  %v2774_v2 = vmul.f32 %v2770_v20, %v5866_v62  ;;  %v2858_v8 = vmul.f32 %v2825_v14, %v5850_v58  ;;  %v3987_v58 = vld [vmem:[%s4111_s20 + $0x8] sm:$0xff] }
 0x348   : > { %v2711_v0 = vrot.slane %v2710_v9, 1  ;;  %v2718_v1 = vrot.slane %v2717_v43, 1  ;;  %v2863_v17 = vmul.f32 %v2859_v36, %v2779_v31  ;;  %v2864_v34 = vmul.f32 %v2860_v29, %v2780_v22 }
 0x349   : > { %v2857_v57 = vmul.f32 %v2810_v45, %v5849_v49 }
 0x34a   : > { %v2712_v42 = vadd.f32 %v2711_v0, %v2710_v9  ;;  %v2719_v21 = vadd.f32 %v2718_v1, %v2717_v43 }
 0x34c   : > { %v2763_v19 = vsel %vm1460_vm1, %v5303_v10, %v2712_v42  ;;  %v2764_v27 = vsel %vm1460_vm1, %v5307_v5, %v2719_v21  ;;  %v3986_v10 = vld [vmem:[%s4111_s20] sm:$0xff] }
 0x34d   : > { %v2777_v33 = vadd.f32 %v2773_v24, %v2763_v19  ;;  %v2778_v39 = vadd.f32 %v2774_v2, %v2764_v27 }
 0x34f   : > { %v2861_v54 = vmul.f32 %v2857_v57, %v2777_v33  ;;  %v2862_v37 = vmul.f32 %v2858_v8, %v2778_v39 }
 0x351   : > { %v2865_v46 = vpack.c.bf16 %v2863_v17, %v2861_v54  ;;  %v2866_v38 = vpack.c.bf16 %v2864_v34, %v2862_v37 }
 0x353   : > { %3003 = vmatmul.bf16.vlgmr.msra.gmra.mxu0 %v2865_v46  ;;  %3017 = vmatmul.bf16.vlgmr.msra.gmra.mxu1 %v2866_v38 }
 0x3d0   : > { %v3004_v20 = vpop.f32.mrf.mxu0  ;;  %v3018_v15 = vpop.f32.mrf.mxu1 }
 0x3d1   : > { %v3005_v11 = vadd.f32 %v3986_v10, %v3004_v20 }
 0x3d3   : > { %v3019_v5 = vadd.f32 %v3018_v15, %v3005_v11 }
 0x3d5   : > { %3023 = vst.msk [vmem:[%s521_s18] sm:$0xff] %vm623_vm0, %v3019_v5 }
 0x3d8   : > { %v3006_v49 = vpop.f32.mrf.mxu0  ;;  %v3020_v12 = vpop.f32.mrf.mxu1 }
 0x3d9   : > { %v3007_v13 = vadd.f32 %v3987_v58, %v3006_v49 }
 0x3db   : > { %v3021_v3 = vadd.f32 %v3020_v12, %v3007_v13 }
 0x3dd   : > { %3024 = vst.msk [vmem:[%s521_s18 + $0x8] sm:$0xff] %vm623_vm0, %v3021_v3 }
 0x3de PF: > { %s19_s11 = sadd.s32 1, %s4010_s11   ;;  %s5867_s30 = smov %s4006_s10 }
 0x3df   : > { %p16_p5 = scmp.ge.s32.totalorder %s19_s11, 4   ;;  %s5868_s10 = smov %s5870_s12 }
 0x3e1   :  { %18 = sbr.rel (!%p16_p5) target bundleno = 2 (0x2), region = 110 }

</bundles_post_ra>
